<compile_context>
chip_gen: v6e
topology: v6e:2x2x1
jax: 0.10.0
libtpu: 0.0.40
codegen_flags: <defaults>
</compile_context>

<pallas_src>
import functools
import math

import jax
import jax.numpy as jnp
from jax.experimental import pallas as pl
from jax.experimental.pallas import tpu as pltpu

EPS = 1e-5
TILE_N_MAX = 512                # node rows per grid step (multiple of 128).
NCORES = 2                      # leading "parallel" axis for stats kernels (v7x 2 TCs).
VMEM_LIMIT = 32 * 1024 * 1024   # explicit scoped-VMEM cap; working set at TILE_N=512
                                # is < 2 MiB per kernel, safe on v5e/v6e/v7x.


def _round_up(x, m):
    return ((x + m - 1) // m) * m


# --------------------------------------------------------------------------
# Pallas kernels
# --------------------------------------------------------------------------

def _gn_stats_kernel(d_ref, bidr_ref, acc_ref, *, batch_size):
    """Accumulate per-batch [sum | sum-of-squares] over node tiles.

    d:(tn,C), bidr:(1,tn) int32 (-1 marks padded rows).  acc:(1,B,2C) resident
    across the inner ("arbitrary") grid axis; one partial per core on axis 0.
    """
    @pl.when(pl.program_id(1) == 0)
    def _():
        acc_ref[...] = jnp.zeros_like(acc_ref)

    d = d_ref[...].astype(jnp.float32)
    tn = d.shape[0]
    oh_t = (bidr_ref[...] == jax.lax.broadcasted_iota(
        jnp.int32, (batch_size, tn), 0)).astype(jnp.float32)        # (B, tn)
    dcat = jnp.concatenate([d, d * d], axis=-1)                     # (tn, 2C)
    acc_ref[...] += jnp.dot(oh_t, dcat, preferred_element_type=jnp.float32)[None]


def _gn_norm_silu_kernel(d_ref, sel_ref, ss_ref, out_ref):
    """Lane-dense normalize + affine + SiLU on a packed (rows, P*C) tile.

    sel:(rows, P*B) one-hot selector, ss:(P*B, 2*P*C) block-diagonal
    [scale | shift] tables.  Padded rows (all-zero selector) produce exact 0.
    """
    d = d_ref[...].astype(jnp.float32)
    ss = jnp.dot(sel_ref[...], ss_ref[...], preferred_element_type=jnp.float32)
    w = d.shape[1]
    y = d * ss[:, :w] + ss[:, w:]
    out_ref[...] = (y * jax.nn.sigmoid(y)).astype(out_ref.dtype)


def _conv_emb_stats_kernel(cm_ref, w_ref, embo_ref, bidc_ref, bidr_ref,
                           h_ref, acc_ref, *, batch_size):
    """GraphConv wide-K matmul + per-node emb add, fused with norm2 statistics."""
    @pl.when(pl.program_id(1) == 0)
    def _():
        acc_ref[...] = jnp.zeros_like(acc_ref)

    # bf16 operands, f32 MXU accumulation.
    h = jnp.dot(cm_ref[...], w_ref[...], preferred_element_type=jnp.float32)
    tn = h.shape[0]
    # emb_out broadcast-back on batch_id (precomputed (B, Cout) in the wrapper).
    oh = (bidc_ref[...] == jax.lax.broadcasted_iota(
        jnp.int32, (tn, batch_size), 1)).astype(jnp.float32)        # (tn, B)
    h = h + jnp.dot(oh, embo_ref[...], preferred_element_type=jnp.float32)
    h_ref[...] = h.astype(h_ref.dtype)
    # norm2 statistics on the tile while it is still in VMEM.
    oh_t = (bidr_ref[...] == jax.lax.broadcasted_iota(
        jnp.int32, (batch_size, tn), 0)).astype(jnp.float32)        # (B, tn)
    hcat = jnp.concatenate([h, h * h], axis=-1)                     # (tn, 2*Cout)
    acc_ref[...] += jnp.dot(oh_t, hcat, preferred_element_type=jnp.float32)[None]


def _conv_skip_kernel(cmx_ref, w_ref, out_ref):
    """Single wide-K matmul: [cm2 | x] @ [conv2_w ; skip_w] (conv2 + skip + residual)."""
    out_ref[...] = jnp.dot(cmx_ref[...], w_ref[...],
                           preferred_element_type=jnp.float32)


# --------------------------------------------------------------------------
# pallas_call wrapper
# --------------------------------------------------------------------------

def _pcall(kernel, grid, in_arrays, in_specs, out_shape, out_specs, semantics):
    return pl.pallas_call(
        kernel,
        out_shape=out_shape,
        grid_spec=pltpu.PrefetchScalarGridSpec(
            num_scalar_prefetch=0,
            grid=grid,
            in_specs=in_specs,
            out_specs=out_specs),
        compiler_params=pltpu.CompilerParams(
            dimension_semantics=semantics, vmem_limit_bytes=VMEM_LIMIT),
    )(*in_arrays)


# --------------------------------------------------------------------------
# Glue: group selection, stats finalization, sparse edge aggregation
# --------------------------------------------------------------------------

def norm_groups(in_channels):
    """Replicates graphnormalization + DualOctreeGroupNorm group selection."""
    group = min(32, in_channels)
    if in_channels <= 32:
        group = max(in_channels // 4, 1)   # guard the torch //4 for tiny widths
    elif in_channels % group != 0:
        group = 30
    assert in_channels % group == 0
    return group, in_channels // group


def _group_adjust(t, group, cpg):
    """Replicates DualOctreeGroupNorm._adjust_for_group on a (B, C) tensor."""
    if cpg > 1:
        b = t.shape[0]
        t = t.reshape(b, group, cpg).sum(-1, keepdims=True)
        t = jnp.broadcast_to(t, (b, group, cpg)).reshape(b, group * cpg)
    return t


def _finalize_stats(stats, counts, gamma, beta, group, cpg):
    """Exact DualOctreeGroupNorm math on the tiny (B, 2C) accumulator -> scale/shift."""
    c = gamma.shape[1]
    sums, sqsums = stats[:, :c], stats[:, c:]
    inv_count = 1.0 / (counts * float(cpg) + EPS)                    # (B, 1)
    mean = _group_adjust(sums * inv_count, group, cpg)               # (B, C)
    var = (sqsums - 2.0 * mean * sums + counts * mean * mean) * inv_count
    var = jnp.maximum(_group_adjust(var, group, cpg), 0.0)           # clamp: f32 cancellation
    inv_std = jax.lax.rsqrt(var + EPS)
    scale = gamma * inv_std                                          # (B, C)
    shift = beta - mean * scale                                      # (B, C)
    return scale, shift


def _pack_tables(scale, shift, pack):
    """Block-diagonal (pack*B, pack*C) tables, concatenated -> (pack*B, 2*pack*C)."""
    b, c = scale.shape
    eye = jnp.eye(pack, dtype=scale.dtype)

    def blockdiag(t):
        return (eye[:, None, :, None] * t[None, :, None, :]).reshape(pack * b, pack * c)

    return jnp.concatenate([blockdiag(scale), blockdiag(shift)], axis=1)


def _make_sel(bid_pad, pack, batch_size):
    """(n_pad//pack, pack*B) one-hot selector; padded rows (bid == -1) are all-zero."""
    r = bid_pad.shape[0] // pack
    bid_pk = bid_pad.reshape(r, pack)
    return (bid_pk[:, :, None] == jnp.arange(batch_size)[None, None, :]
            ).astype(jnp.float32).reshape(r, pack * batch_size)


def scatter_mean_wide(h, col, idx, n_nodes, n_edge_type):
    """Sparse scatter_mean(h[col], row*E+etype) reshaped to (N, E*C), bf16 output.

    Gather reads are bf16 (h is bf16); segment accumulation stays f32.
    # TODO(synk): move this data-dependent gather/scatter into the Pallas kernels
    # via scalar-prefetched CSR (sorted edges + per-tile offsets in SMEM).
    """
    c = h.shape[1]
    gathered = jnp.take(h, col, axis=0).astype(jnp.float32)           # (nE, C)
    seg = jnp.zeros((n_nodes * n_edge_type, c), jnp.float32).at[idx].add(gathered)
    cnt = jnp.zeros((n_nodes * n_edge_type, 1), jnp.float32).at[idx].add(1.0)
    mean = seg / jnp.maximum(cnt, 1.0)
    return mean.reshape(n_nodes, n_edge_type * c).astype(jnp.bfloat16)


def _pad_rows(a, n_pad, value=0):
    n = a.shape[0]
    if n == n_pad:
        return a
    pad = [(0, n_pad - n)] + [(0, 0)] * (a.ndim - 1)
    return jnp.pad(a, pad, constant_values=value)


def init_params(key, channels, out_channels, emb_channels, n_edge_type,
                avg_degree=7):
    ks = jax.random.split(key, 9)

    def graph_conv_w(k, cin, cout):
        std = math.sqrt(2.0 / float(avg_degree * cin + avg_degree * cout))
        a = math.sqrt(3.0) * std
        return jax.random.uniform(k, (n_edge_type * cin, cout), jnp.float32, -a, a)

    lin_a = 1.0 / math.sqrt(emb_channels)
    skip_a = 1.0 / math.sqrt(channels)
    return {
        "norm1_w": 1.0 + 0.1 * jax.random.normal(ks[0], (1, channels), jnp.float32),
        "norm1_b": 0.05 * jax.random.normal(ks[1], (1, channels), jnp.float32),
        "conv1_w": graph_conv_w(ks[2], channels, out_channels),        # (E*Cin, Cout)
        "emb_w": jax.random.uniform(ks[3], (emb_channels, out_channels),
                                    jnp.float32, -lin_a, lin_a),
        "emb_b": jax.random.uniform(ks[4], (1, out_channels), jnp.float32,
                                    -lin_a, lin_a),
        "norm2_w": 1.0 + 0.1 * jax.random.normal(ks[5], (1, out_channels), jnp.float32),
        "norm2_b": 0.05 * jax.random.normal(ks[6], (1, out_channels), jnp.float32),
        # NOTE: original wraps conv2 in zero_module (all-zero init); small non-zero
        # values here so the fused conv2 kernel is exercised.
        "conv2_w": 0.1 * graph_conv_w(ks[7], out_channels, out_channels),  # (E*Cout, Cout)
        "skip_w": jax.random.uniform(ks[8], (channels, out_channels), jnp.float32,
                                     -skip_a, skip_a),
    }


# --------------------------------------------------------------------------
# Forward orchestration
# --------------------------------------------------------------------------

def _norm_silu_call(data_pk, sel, ss, tile_rows, grid_n):
    r, w = data_pk.shape
    return _pcall(
        _gn_norm_silu_kernel,
        (grid_n,),
        (data_pk, sel, ss),
        [pl.BlockSpec((tile_rows, w), lambda i: (i, 0)),
         pl.BlockSpec((tile_rows, sel.shape[1]), lambda i: (i, 0)),
         pl.BlockSpec(ss.shape, lambda i: (0, 0))],
        jax.ShapeDtypeStruct((r, w), jnp.bfloat16),
        pl.BlockSpec((tile_rows, w), lambda i: (i, 0)),
        ("parallel",))


def graph_res_block_embed_forward(x, emb, edge_index, edge_type, batch_id,
                                  params, *, batch_size, n_edge_type=7):
    # n_node_type <= 1 path of GraphConv (no node-type one-hot concat).
    n, c_in = x.shape
    c_out = params["emb_w"].shape[1]

    # Lane-dense packing factors (P*C == 128 when C divides 128).
    pack1 = 128 // c_in if (c_in <= 128 and 128 % c_in == 0) else 1
    pack2 = 128 // c_out if (c_out <= 128 and 128 % c_out == 0) else 1

    tile_n = min(TILE_N_MAX, _round_up(n, 128))        # multiple of 128 rows
    n_pad = _round_up(n, NCORES * tile_n)
    grid_n = n_pad // tile_n
    gpc = grid_n // NCORES                              # node tiles per core

    x_p = _pad_rows(x, n_pad)
    bid = batch_id.astype(jnp.int32)
    bid_pad = _pad_rows(bid, n_pad, value=-1)           # (n_pad,)
    bid_col = bid_pad[:, None]                          # (n_pad, 1)
    bid_row = bid_pad[None, :]                          # (1, n_pad)
    counts = jnp.sum((bid[:, None] == jnp.arange(batch_size)[None, :]
                      ).astype(jnp.float32), axis=0)[:, None]          # (B, 1)

    sel1 = _make_sel(bid_pad, pack1, batch_size)
    sel2 = _make_sel(bid_pad, pack2, batch_size)

    row, col = edge_index[0], edge_index[1]
    idx = row * n_edge_type + edge_type

    g1, cpg1 = norm_groups(c_in)
    g2, cpg2 = norm_groups(c_out)

    # emb_layers hoisted out of the kernel (tiny matmul, computed once).
    emb_out = jnp.dot(emb * jax.nn.sigmoid(emb), params["emb_w"]) + params["emb_b"]
    emb_out = emb_out.astype(jnp.float32)

    # ---- norm1 statistics (per-core partial sums; finalized in XLA) ----
    acc1 = _pcall(
        functools.partial(_gn_stats_kernel, batch_size=batch_size),
        (NCORES, gpc),
        (x_p, bid_row),
        [pl.BlockSpec((tile_n, c_in), lambda cr, i: (cr * gpc + i, 0)),
         pl.BlockSpec((1, tile_n), lambda cr, i: (0, cr * gpc + i))],
        jax.ShapeDtypeStruct((NCORES, batch_size, 2 * c_in), jnp.float32),
        pl.BlockSpec((1, batch_size, 2 * c_in), lambda cr, i: (cr, 0, 0)),
        ("parallel", "arbitrary"))
    scale1, shift1 = _finalize_stats(acc1.sum(0), counts,
                                     params["norm1_w"], params["norm1_b"], g1, cpg1)
    ss1 = _pack_tables(scale1, shift1, pack1)

    # ---- norm1 normalize + SiLU (lane-dense packed layout, bf16 out) ----
    x_pk = x_p.reshape(n_pad // pack1, pack1 * c_in)
    h1 = _norm_silu_call(x_pk, sel1, ss1, tile_n // pack1, grid_n)
    h1 = h1.reshape(n_pad, c_in)[:n]

    # ---- GraphConv aggregation (XLA sparse glue, bf16 slab) ----
    cm1 = _pad_rows(scatter_mean_wide(h1, col, idx, n, n_edge_type), n_pad)

    # ---- conv1 + emb add + norm2 statistics (fused) ----
    w1 = params["conv1_w"].astype(jnp.bfloat16)
    h2, acc2 = _pcall(
        functools.partial(_conv_emb_stats_kernel, batch_size=batch_size),
        (NCORES, gpc),
        (cm1, w1, emb_out, bid_col, bid_row),
        [pl.BlockSpec((tile_n, cm1.shape[1]), lambda cr, i: (cr * gpc + i, 0)),
         pl.BlockSpec(w1.shape, lambda cr, i: (0, 0)),
         pl.BlockSpec((batch_size, c_out), lambda cr, i: (0, 0)),
         pl.BlockSpec((tile_n, 1), lambda cr, i: (cr * gpc + i, 0)),
         pl.BlockSpec((1, tile_n), lambda cr, i: (0, cr * gpc + i))],
        (jax.ShapeDtypeStruct((n_pad, c_out), jnp.bfloat16),
         jax.ShapeDtypeStruct((NCORES, batch_size, 2 * c_out), jnp.float32)),
        (pl.BlockSpec((tile_n, c_out), lambda cr, i: (cr * gpc + i, 0)),
         pl.BlockSpec((1, batch_size, 2 * c_out), lambda cr, i: (cr, 0, 0))),
        ("parallel", "arbitrary"))
    scale2, shift2 = _finalize_stats(acc2.sum(0), counts,
                                     params["norm2_w"], params["norm2_b"], g2, cpg2)
    ss2 = _pack_tables(scale2, shift2, pack2)

    # ---- norm2 normalize + SiLU (dropout = identity at inference) ----
    h2_pk = h2.reshape(n_pad // pack2, pack2 * c_out)
    h3 = _norm_silu_call(h2_pk, sel2, ss2, tile_n // pack2, grid_n)
    h3 = h3.reshape(n_pad, c_out)[:n]

    # ---- conv2 + skip fused into one wide-K matmul ----
    cm2 = scatter_mean_wide(h3, col, idx, n, n_edge_type)            # (n, E*Cout) bf16
    cmx = _pad_rows(jnp.concatenate([cm2, x.astype(jnp.bfloat16)], axis=1), n_pad)
    w_cat = jnp.concatenate([params["conv2_w"], params["skip_w"]],
                            axis=0).astype(jnp.bfloat16)             # (E*Cout+Cin, Cout)
    out = _pcall(
        _conv_skip_kernel,
        (grid_n,),
        (cmx, w_cat),
        [pl.BlockSpec((tile_n, cmx.shape[1]), lambda i: (i, 0)),
         pl.BlockSpec(w_cat.shape, lambda i: (0, 0))],
        jax.ShapeDtypeStruct((n_pad, c_out), jnp.float32),
        pl.BlockSpec((tile_n, c_out), lambda i: (i, 0)),
        ("parallel",))
    return out[:n]


# --------------------------------------------------------------------------
# Pure-JAX f32 reference (mirrors the PyTorch forward) for correctness check
# --------------------------------------------------------------------------

def reference_forward(x, emb, edge_index, edge_type, batch_id, batch_size,
                      params, n_edge_type=7):
    n = x.shape[0]

    def segsum(data, ids, num):
        return jnp.zeros((num,) + data.shape[1:], data.dtype).at[ids].add(data)

    def adjust(t, group, cpg):
        if cpg > 1:
            b = t.shape[0]
            t = t.reshape(b, group, cpg).sum(-1, keepdims=True)
            t = jnp.broadcast_to(t, (b, group, cpg)).reshape(b, group * cpg)
        return t

    def gn(data, gamma, beta):
        group, cpg = norm_groups(data.shape[1])
        ones = jnp.ones((data.shape[0], 1), jnp.float32)
        count = segsum(ones, batch_id, batch_size) * cpg
        inv_count = 1.0 / (count + EPS)
        mean = adjust(segsum(data, batch_id, batch_size) * inv_count, group, cpg)
        out = data - mean[batch_id]
        var = adjust(segsum(out ** 2, batch_id, batch_size) * inv_count, group, cpg)
        inv_std = 1.0 / jnp.sqrt(var + EPS)
        return out * inv_std[batch_id] * gamma + beta

    def silu(v):
        return v * jax.nn.sigmoid(v)

    def gconv(xx, w):
        cin = xx.shape[1]
        row, col = edge_index[0], edge_index[1]
        idx = row * n_edge_type + edge_type
        colsum = segsum(xx[col], idx, n * n_edge_type)
        cnt = segsum(jnp.ones((row.shape[0], 1), jnp.float32), idx, n * n_edge_type)
        colm = colsum / jnp.maximum(cnt, 1.0)
        return colm.reshape(n, n_edge_type * cin) @ w

    h = silu(gn(x, params["norm1_w"], params["norm1_b"]))
    h = gconv(h, params["conv1_w"])
    emb_out = silu(emb) @ params["emb_w"] + params["emb_b"]
    h = h + emb_out[batch_id]
    h = silu(gn(h, params["norm2_w"], params["norm2_b"]))
    h = gconv(h, params["conv2_w"])
    return x @ params["skip_w"] + h


# --------------------------------------------------------------------------

if __name__ == "__main__":
    key = jax.random.PRNGKey(0)
    N, C, COUT, CEMB, B, ETYPES, NEDGES = 200, 32, 64, 32, 2, 7, 1024
    ks = jax.random.split(key, 8)

    x = jax.random.normal(ks[0], (N, C), jnp.float32)
    emb = jax.random.normal(ks[1], (B, CEMB), jnp.float32)
    batch_id = jnp.concatenate([jnp.zeros((90,), jnp.int32),
                                jnp.ones((N - 90,), jnp.int32)])
    row = jax.random.randint(ks[2], (NEDGES,), 0, N)
    col = jax.random.randint(ks[3], (NEDGES,), 0, N)
    edge_type = jax.random.randint(ks[4], (NEDGES,), 0, ETYPES)
    edge_index = jnp.stack([row, col])

    params = init_params(ks[5], C, COUT, CEMB, ETYPES)

    fwd = jax.jit(graph_res_block_embed_forward,
                  static_argnames=("batch_size", "n_edge_type"))
    out = jax.block_until_ready(
        fwd(x, emb, edge_index, edge_type, batch_id, params,
            batch_size=B, n_edge_type=ETYPES))

    ref = jax.block_until_ready(
        reference_forward(x, emb, edge_index, edge_type, batch_id, B, params,
                          ETYPES))

    assert out.shape == (N, COUT), out.shape
    assert bool(jnp.all(jnp.isfinite(out)))
    max_err = float(jnp.max(jnp.abs(out - ref)))
    mean_err = float(jnp.mean(jnp.abs(out - ref)))
    # Matmul operands AND intermediate activations are bf16 (per perf review)
    # while the reference is pure f32, so the tolerance is correspondingly loose.
    assert max_err < 2e-1 and mean_err < 4e-2, (max_err, mean_err)
    print("KERNEL_OK")
</pallas_src>

<mosaic_0001>
module attributes {stable_mosaic.version = 11 : i64} {
  func.func private @main(%arg0: i32) attributes {dimension_semantics = [#tpu.dimension_semantics<core_parallel>], iteration_bounds = array<i64: 2>, tpu.core_type = #tpu.core_type<sc_scalar_subcore>, window_params = []} {
    return
  }
}

module attributes {stable_mosaic.version = 11 : i64} {
  func.func private @main(%arg0: i32) attributes {dimension_semantics = [#tpu.dimension_semantics<core_parallel>], iteration_bounds = array<i64: 2>, tpu.core_type = #tpu.core_type<sc_scalar_subcore>, window_params = []} {
    return
  }
}

module attributes {stable_mosaic.version = 11 : i64} {
  func.func @_gn_stats_kernel(%arg0: i32, %arg1: i32, %arg2: memref<256x32xf32, #tpu.memory_space<vmem>>, %arg3: memref<1x256xi32, #tpu.memory_space<vmem>>, %arg4: memref<1x2x64xf32, #tpu.memory_space<vmem>>) attributes {dimension_semantics = [#tpu.dimension_semantics<parallel>, #tpu.dimension_semantics<arbitrary>], iteration_bounds = array<i64: 2, 1>, scalar_prefetch = 0 : i64, scratch_operands = 0 : i64, tpu.core_type = #tpu.core_type<tc>, window_params = [{transform_indices = @transform_0, window_bounds = array<i64: 256, 32>}, {transform_indices = @transform_1, window_bounds = array<i64: 1, 256>}, {transform_indices = @transform_2, window_bounds = array<i64: 1, 2, 64>}]} {
    %c0_i32 = arith.constant 0 : i32
    %0 = arith.cmpi eq, %arg1, %c0_i32 : i32
    %1 = arith.extui %0 : i1 to i32
    %c0_i32_0 = arith.constant 0 : i32
    %2 = arith.cmpi ne, %1, %c0_i32_0 : i32
    scf.if %2 {
      %cst_10 = arith.constant 0.000000e+00 : f32
      %17 = vector.broadcast %cst_10 : f32 to vector<1x2x64xf32>
      %c0_11 = arith.constant 0 : index
      %c0_12 = arith.constant 0 : index
      %c0_13 = arith.constant 0 : index
      %18 = vector.load %arg4[%c0_11, %c0_12, %c0_13] : memref<1x2x64xf32, #tpu.memory_space<vmem>>, vector<1x2x64xf32>
      tpu.vector_store %arg4[%c0_11, %c0_12, %c0_13], %17 {strides = array<i32>} : memref<1x2x64xf32, #tpu.memory_space<vmem>>, vector<1x2x64xf32>,
    } else {
    }
    %c0 = arith.constant 0 : index
    %c0_1 = arith.constant 0 : index
    %3 = vector.load %arg2[%c0, %c0_1] : memref<256x32xf32, #tpu.memory_space<vmem>>, vector<256x32xf32>
    %c0_2 = arith.constant 0 : index
    %c0_3 = arith.constant 0 : index
    %4 = vector.load %arg3[%c0_2, %c0_3] : memref<1x256xi32, #tpu.memory_space<vmem>>, vector<1x256xi32>
    %5 = tpu.iota {dimensions = array<i32: 0>} : vector<2x256xi32>
    %6 = vector.broadcast %4 : vector<1x256xi32> to vector<2x256xi32>
    %7 = arith.cmpi eq, %6, %5 : vector<2x256xi32>
    %8 = arith.extui %7 : vector<2x256xi1> to vector<2x256xi32>
    %9 = arith.sitofp %8 : vector<2x256xi32> to vector<2x256xf32>
    %10 = arith.mulf %3, %3 : vector<256x32xf32>
    %11 = tpu.concatenate %3, %10 in 1 : vector<256x32xf32>, vector<256x32xf32> -> vector<256x64xf32>
    %c0_4 = arith.constant 0 : index
    %c0_5 = arith.constant 0 : index
    %c0_6 = arith.constant 0 : index
    %12 = vector.load %arg4[%c0_4, %c0_5, %c0_6] : memref<1x2x64xf32, #tpu.memory_space<vmem>>, vector<1x2x64xf32>
    %cst = arith.constant dense<0.000000e+00> : vector<2x64xf32>
    %13 = tpu.matmul %9, %11, %cst {dimension_numbers = #tpu.dot_dimension_numbers<[1], [0], [0], [1], [0, 0, 1, 1], [], []>} : vector<2x256xf32>, vector<256x64xf32>, vector<2x64xf32> -> vector<2x64xf32>
    %14 = vector.shape_cast %13 : vector<2x64xf32> to vector<1x2x64xf32>
    %15 = arith.addf %12, %14 : vector<1x2x64xf32>
    %c0_7 = arith.constant 0 : index
    %c0_8 = arith.constant 0 : index
    %c0_9 = arith.constant 0 : index
    %16 = vector.load %arg4[%c0_7, %c0_8, %c0_9] : memref<1x2x64xf32, #tpu.memory_space<vmem>>, vector<1x2x64xf32>
    tpu.vector_store %arg4[%c0_7, %c0_8, %c0_9], %15 {strides = array<i32>} : memref<1x2x64xf32, #tpu.memory_space<vmem>>, vector<1x2x64xf32>,
    return
  }
  func.func @transform_0(%arg0: i32, %arg1: i32) -> (i32, i32) {
    %c1_i32 = arith.constant 1 : i32
    %0 = arith.muli %arg0, %c1_i32 : i32
    %1 = arith.addi %0, %arg1 : i32
    %c0_i32 = arith.constant 0 : i32
    %c0_i32_0 = arith.constant 0 : i32
    return %1, %c0_i32 : i32, i32
  }
  func.func @transform_1(%arg0: i32, %arg1: i32) -> (i32, i32) {
    %c1_i32 = arith.constant 1 : i32
    %0 = arith.muli %arg0, %c1_i32 : i32
    %1 = arith.addi %0, %arg1 : i32
    %c0_i32 = arith.constant 0 : i32
    %c0_i32_0 = arith.constant 0 : i32
    return %c0_i32, %1 : i32, i32
  }
  func.func @transform_2(%arg0: i32, %arg1: i32) -> (i32, i32, i32) {
    %c0_i32 = arith.constant 0 : i32
    %c0_i32_0 = arith.constant 0 : i32
    %c0_i32_1 = arith.constant 0 : i32
    return %arg0, %c0_i32, %c0_i32_0 : i32, i32, i32
  }
}

module attributes {stable_mosaic.version = 11 : i64} {
  func.func @_gn_norm_silu_kernel(%arg0: i32, %arg1: memref<64x128xf32, #tpu.memory_space<vmem>>, %arg2: memref<64x8xf32, #tpu.memory_space<vmem>>, %arg3: memref<8x256xf32, #tpu.memory_space<vmem>>, %arg4: memref<64x128xbf16, #tpu.memory_space<vmem>>) attributes {dimension_semantics = [#tpu.dimension_semantics<parallel>], iteration_bounds = array<i64: 2>, scalar_prefetch = 0 : i64, scratch_operands = 0 : i64, tpu.core_type = #tpu.core_type<tc>, window_params = [{transform_indices = @transform_0, window_bounds = array<i64: 64, 128>}, {transform_indices = @transform_1, window_bounds = array<i64: 64, 8>}, {pipeline_mode = #tpu.pipeline_mode<synchronous>, transform_indices = @transform_2, window_bounds = array<i64: 8, 256>}, {transform_indices = @transform_3, window_bounds = array<i64: 64, 128>}]} {
    %c0 = arith.constant 0 : index
    %c0_0 = arith.constant 0 : index
    %0 = vector.load %arg1[%c0, %c0_0] : memref<64x128xf32, #tpu.memory_space<vmem>>, vector<64x128xf32>
    %c0_1 = arith.constant 0 : index
    %c0_2 = arith.constant 0 : index
    %1 = vector.load %arg2[%c0_1, %c0_2] : memref<64x8xf32, #tpu.memory_space<vmem>>, vector<64x8xf32>
    %c0_3 = arith.constant 0 : index
    %c0_4 = arith.constant 0 : index
    %2 = vector.load %arg3[%c0_3, %c0_4] : memref<8x256xf32, #tpu.memory_space<vmem>>, vector<8x256xf32>
    %cst = arith.constant dense<0.000000e+00> : vector<64x256xf32>
    %3 = tpu.matmul %1, %2, %cst {dimension_numbers = #tpu.dot_dimension_numbers<[1], [0], [0], [1], [0, 0, 1, 1], [], []>} : vector<64x8xf32>, vector<8x256xf32>, vector<64x256xf32> -> vector<64x256xf32>
    %4 = vector.extract_strided_slice %3 {offsets = [0, 0], sizes = [64, 128], strides = [1, 1]} : vector<64x256xf32> to vector<64x128xf32>
    %5 = arith.mulf %0, %4 : vector<64x128xf32>
    %6 = vector.extract_strided_slice %3 {offsets = [0, 128], sizes = [64, 128], strides = [1, 1]} : vector<64x256xf32> to vector<64x128xf32>
    %7 = arith.addf %5, %6 : vector<64x128xf32>
    %8 = arith.negf %7 : vector<64x128xf32>
    %9 = math.exp %8 : vector<64x128xf32>
    %cst_5 = arith.constant 1.000000e+00 : f32
    %10 = vector.broadcast %cst_5 : f32 to vector<64x128xf32>
    %11 = arith.addf %10, %9 : vector<64x128xf32>
    %12 = arith.divf %10, %11 : vector<64x128xf32>
    %13 = arith.mulf %7, %12 : vector<64x128xf32>
    %14 = arith.truncf %13 : vector<64x128xf32> to vector<64x128xbf16>
    %c0_6 = arith.constant 0 : index
    %c0_7 = arith.constant 0 : index
    %15 = vector.load %arg4[%c0_6, %c0_7] : memref<64x128xbf16, #tpu.memory_space<vmem>>, vector<64x128xbf16>
    tpu.vector_store %arg4[%c0_6, %c0_7], %14 {strides = array<i32>} : memref<64x128xbf16, #tpu.memory_space<vmem>>, vector<64x128xbf16>,
    return
  }
  func.func @transform_0(%arg0: i32) -> (i32, i32) {
    %c0_i32 = arith.constant 0 : i32
    %c0_i32_0 = arith.constant 0 : i32
    return %arg0, %c0_i32 : i32, i32
  }
  func.func @transform_1(%arg0: i32) -> (i32, i32) {
    %c0_i32 = arith.constant 0 : i32
    %c0_i32_0 = arith.constant 0 : i32
    return %arg0, %c0_i32 : i32, i32
  }
  func.func @transform_2(%arg0: i32) -> (i32, i32) {
    %c0_i32 = arith.constant 0 : i32
    %c0_i32_0 = arith.constant 0 : i32
    %c0_i32_1 = arith.constant 0 : i32
    return %c0_i32, %c0_i32_0 : i32, i32
  }
  func.func @transform_3(%arg0: i32) -> (i32, i32) {
    %c0_i32 = arith.constant 0 : i32
    %c0_i32_0 = arith.constant 0 : i32
    return %arg0, %c0_i32 : i32, i32
  }
}

module attributes {stable_mosaic.version = 11 : i64} {
  func.func @_conv_emb_stats_kernel(%arg0: i32, %arg1: i32, %arg2: memref<256x224xbf16, #tpu.memory_space<vmem>>, %arg3: memref<224x64xbf16, #tpu.memory_space<vmem>>, %arg4: memref<2x64xf32, #tpu.memory_space<vmem>>, %arg5: memref<256x1xi32, #tpu.memory_space<vmem>>, %arg6: memref<1x256xi32, #tpu.memory_space<vmem>>, %arg7: memref<256x64xbf16, #tpu.memory_space<vmem>>, %arg8: memref<1x2x128xf32, #tpu.memory_space<vmem>>) attributes {dimension_semantics = [#tpu.dimension_semantics<parallel>, #tpu.dimension_semantics<arbitrary>], iteration_bounds = array<i64: 2, 1>, scalar_prefetch = 0 : i64, scratch_operands = 0 : i64, tpu.core_type = #tpu.core_type<tc>, window_params = [{transform_indices = @transform_0, window_bounds = array<i64: 256, 224>}, {pipeline_mode = #tpu.pipeline_mode<synchronous>, transform_indices = @transform_1, window_bounds = array<i64: 224, 64>}, {pipeline_mode = #tpu.pipeline_mode<synchronous>, transform_indices = @transform_2, window_bounds = array<i64: 2, 64>}, {transform_indices = @transform_3, window_bounds = array<i64: 256, 1>}, {transform_indices = @transform_4, window_bounds = array<i64: 1, 256>}, {transform_indices = @transform_5, window_bounds = array<i64: 256, 64>}, {transform_indices = @transform_6, window_bounds = array<i64: 1, 2, 128>}]} {
    %c0_i32 = arith.constant 0 : i32
    %0 = arith.cmpi eq, %arg1, %c0_i32 : i32
    %1 = arith.extui %0 : i1 to i32
    %c0_i32_0 = arith.constant 0 : i32
    %2 = arith.cmpi ne, %1, %c0_i32_0 : i32
    scf.if %2 {
      %cst_20 = arith.constant 0.000000e+00 : f32
      %30 = vector.broadcast %cst_20 : f32 to vector<1x2x128xf32>
      %c0_21 = arith.constant 0 : index
      %c0_22 = arith.constant 0 : index
      %c0_23 = arith.constant 0 : index
      %31 = vector.load %arg8[%c0_21, %c0_22, %c0_23] : memref<1x2x128xf32, #tpu.memory_space<vmem>>, vector<1x2x128xf32>
      tpu.vector_store %arg8[%c0_21, %c0_22, %c0_23], %30 {strides = array<i32>} : memref<1x2x128xf32, #tpu.memory_space<vmem>>, vector<1x2x128xf32>,
    } else {
    }
    %c0 = arith.constant 0 : index
    %c0_1 = arith.constant 0 : index
    %3 = vector.load %arg2[%c0, %c0_1] : memref<256x224xbf16, #tpu.memory_space<vmem>>, vector<256x224xbf16>
    %c0_2 = arith.constant 0 : index
    %c0_3 = arith.constant 0 : index
    %4 = vector.load %arg3[%c0_2, %c0_3] : memref<224x64xbf16, #tpu.memory_space<vmem>>, vector<224x64xbf16>
    %cst = arith.constant dense<0.000000e+00> : vector<256x64xf32>
    %5 = tpu.matmul %3, %4, %cst {dimension_numbers = #tpu.dot_dimension_numbers<[1], [0], [0], [1], [0, 0, 1, 1], [], []>} : vector<256x224xbf16>, vector<224x64xbf16>, vector<256x64xf32> -> vector<256x64xf32>
    %c0_4 = arith.constant 0 : index
    %c0_5 = arith.constant 0 : index
    %6 = vector.load %arg5[%c0_4, %c0_5] : memref<256x1xi32, #tpu.memory_space<vmem>>, vector<256x1xi32>
    %7 = tpu.iota {dimensions = array<i32: 1>} : vector<256x2xi32>
    %8 = vector.broadcast %6 : vector<256x1xi32> to vector<256x2xi32>
    %9 = arith.cmpi eq, %8, %7 : vector<256x2xi32>
    %10 = arith.extui %9 : vector<256x2xi1> to vector<256x2xi32>
    %11 = arith.sitofp %10 : vector<256x2xi32> to vector<256x2xf32>
    %c0_6 = arith.constant 0 : index
    %c0_7 = arith.constant 0 : index
    %12 = vector.load %arg4[%c0_6, %c0_7] : memref<2x64xf32, #tpu.memory_space<vmem>>, vector<2x64xf32>
    %cst_8 = arith.constant dense<0.000000e+00> : vector<256x64xf32>
    %13 = tpu.matmul %11, %12, %cst_8 {dimension_numbers = #tpu.dot_dimension_numbers<[1], [0], [0], [1], [0, 0, 1, 1], [], []>} : vector<256x2xf32>, vector<2x64xf32>, vector<256x64xf32> -> vector<256x64xf32>
    %14 = arith.addf %5, %13 : vector<256x64xf32>
    %15 = arith.truncf %14 : vector<256x64xf32> to vector<256x64xbf16>
    %c0_9 = arith.constant 0 : index
    %c0_10 = arith.constant 0 : index
    %16 = vector.load %arg7[%c0_9, %c0_10] : memref<256x64xbf16, #tpu.memory_space<vmem>>, vector<256x64xbf16>
    tpu.vector_store %arg7[%c0_9, %c0_10], %15 {strides = array<i32>} : memref<256x64xbf16, #tpu.memory_space<vmem>>, vector<256x64xbf16>,
    %c0_11 = arith.constant 0 : index
    %c0_12 = arith.constant 0 : index
    %17 = vector.load %arg6[%c0_11, %c0_12] : memref<1x256xi32, #tpu.memory_space<vmem>>, vector<1x256xi32>
    %18 = tpu.iota {dimensions = array<i32: 0>} : vector<2x256xi32>
    %19 = vector.broadcast %17 : vector<1x256xi32> to vector<2x256xi32>
    %20 = arith.cmpi eq, %19, %18 : vector<2x256xi32>
    %21 = arith.extui %20 : vector<2x256xi1> to vector<2x256xi32>
    %22 = arith.sitofp %21 : vector<2x256xi32> to vector<2x256xf32>
    %23 = arith.mulf %14, %14 : vector<256x64xf32>
    %24 = tpu.concatenate %14, %23 in 1 : vector<256x64xf32>, vector<256x64xf32> -> vector<256x128xf32>
    %c0_13 = arith.constant 0 : index
    %c0_14 = arith.constant 0 : index
    %c0_15 = arith.constant 0 : index
    %25 = vector.load %arg8[%c0_13, %c0_14, %c0_15] : memref<1x2x128xf32, #tpu.memory_space<vmem>>, vector<1x2x128xf32>
    %cst_16 = arith.constant dense<0.000000e+00> : vector<2x128xf32>
    %26 = tpu.matmul %22, %24, %cst_16 {dimension_numbers = #tpu.dot_dimension_numbers<[1], [0], [0], [1], [0, 0, 1, 1], [], []>} : vector<2x256xf32>, vector<256x128xf32>, vector<2x128xf32> -> vector<2x128xf32>
    %27 = vector.shape_cast %26 : vector<2x128xf32> to vector<1x2x128xf32>
    %28 = arith.addf %25, %27 : vector<1x2x128xf32>
    %c0_17 = arith.constant 0 : index
    %c0_18 = arith.constant 0 : index
    %c0_19 = arith.constant 0 : index
    %29 = vector.load %arg8[%c0_17, %c0_18, %c0_19] : memref<1x2x128xf32, #tpu.memory_space<vmem>>, vector<1x2x128xf32>
    tpu.vector_store %arg8[%c0_17, %c0_18, %c0_19], %28 {strides = array<i32>} : memref<1x2x128xf32, #tpu.memory_space<vmem>>, vector<1x2x128xf32>,
    return
  }
  func.func @transform_0(%arg0: i32, %arg1: i32) -> (i32, i32) {
    %c1_i32 = arith.constant 1 : i32
    %0 = arith.muli %arg0, %c1_i32 : i32
    %1 = arith.addi %0, %arg1 : i32
    %c0_i32 = arith.constant 0 : i32
    %c0_i32_0 = arith.constant 0 : i32
    return %1, %c0_i32 : i32, i32
  }
  func.func @transform_1(%arg0: i32, %arg1: i32) -> (i32, i32) {
    %c0_i32 = arith.constant 0 : i32
    %c0_i32_0 = arith.constant 0 : i32
    %c0_i32_1 = arith.constant 0 : i32
    return %c0_i32, %c0_i32_0 : i32, i32
  }
  func.func @transform_2(%arg0: i32, %arg1: i32) -> (i32, i32) {
    %c0_i32 = arith.constant 0 : i32
    %c0_i32_0 = arith.constant 0 : i32
    %c0_i32_1 = arith.constant 0 : i32
    return %c0_i32, %c0_i32_0 : i32, i32
  }
  func.func @transform_3(%arg0: i32, %arg1: i32) -> (i32, i32) {
    %c1_i32 = arith.constant 1 : i32
    %0 = arith.muli %arg0, %c1_i32 : i32
    %1 = arith.addi %0, %arg1 : i32
    %c0_i32 = arith.constant 0 : i32
    %c0_i32_0 = arith.constant 0 : i32
    return %1, %c0_i32 : i32, i32
  }
  func.func @transform_4(%arg0: i32, %arg1: i32) -> (i32, i32) {
    %c1_i32 = arith.constant 1 : i32
    %0 = arith.muli %arg0, %c1_i32 : i32
    %1 = arith.addi %0, %arg1 : i32
    %c0_i32 = arith.constant 0 : i32
    %c0_i32_0 = arith.constant 0 : i32
    return %c0_i32, %1 : i32, i32
  }
  func.func @transform_5(%arg0: i32, %arg1: i32) -> (i32, i32) {
    %c1_i32 = arith.constant 1 : i32
    %0 = arith.muli %arg0, %c1_i32 : i32
    %1 = arith.addi %0, %arg1 : i32
    %c0_i32 = arith.constant 0 : i32
    %c0_i32_0 = arith.constant 0 : i32
    return %1, %c0_i32 : i32, i32
  }
  func.func @transform_6(%arg0: i32, %arg1: i32) -> (i32, i32, i32) {
    %c0_i32 = arith.constant 0 : i32
    %c0_i32_0 = arith.constant 0 : i32
    %c0_i32_1 = arith.constant 0 : i32
    return %arg0, %c0_i32, %c0_i32_0 : i32, i32, i32
  }
}

module attributes {stable_mosaic.version = 11 : i64} {
  func.func @_gn_norm_silu_kernel(%arg0: i32, %arg1: memref<128x128xbf16, #tpu.memory_space<vmem>>, %arg2: memref<128x4xf32, #tpu.memory_space<vmem>>, %arg3: memref<4x256xf32, #tpu.memory_space<vmem>>, %arg4: memref<128x128xbf16, #tpu.memory_space<vmem>>) attributes {dimension_semantics = [#tpu.dimension_semantics<parallel>], iteration_bounds = array<i64: 2>, scalar_prefetch = 0 : i64, scratch_operands = 0 : i64, tpu.core_type = #tpu.core_type<tc>, window_params = [{transform_indices = @transform_0, window_bounds = array<i64: 128, 128>}, {transform_indices = @transform_1, window_bounds = array<i64: 128, 4>}, {pipeline_mode = #tpu.pipeline_mode<synchronous>, transform_indices = @transform_2, window_bounds = array<i64: 4, 256>}, {transform_indices = @transform_3, window_bounds = array<i64: 128, 128>}]} {
    %c0 = arith.constant 0 : index
    %c0_0 = arith.constant 0 : index
    %0 = vector.load %arg1[%c0, %c0_0] : memref<128x128xbf16, #tpu.memory_space<vmem>>, vector<128x128xbf16>
    %1 = arith.extf %0 : vector<128x128xbf16> to vector<128x128xf32>
    %c0_1 = arith.constant 0 : index
    %c0_2 = arith.constant 0 : index
    %2 = vector.load %arg2[%c0_1, %c0_2] : memref<128x4xf32, #tpu.memory_space<vmem>>, vector<128x4xf32>
    %c0_3 = arith.constant 0 : index
    %c0_4 = arith.constant 0 : index
    %3 = vector.load %arg3[%c0_3, %c0_4] : memref<4x256xf32, #tpu.memory_space<vmem>>, vector<4x256xf32>
    %cst = arith.constant dense<0.000000e+00> : vector<128x256xf32>
    %4 = tpu.matmul %2, %3, %cst {dimension_numbers = #tpu.dot_dimension_numbers<[1], [0], [0], [1], [0, 0, 1, 1], [], []>} : vector<128x4xf32>, vector<4x256xf32>, vector<128x256xf32> -> vector<128x256xf32>
    %5 = vector.extract_strided_slice %4 {offsets = [0, 0], sizes = [128, 128], strides = [1, 1]} : vector<128x256xf32> to vector<128x128xf32>
    %6 = arith.mulf %1, %5 : vector<128x128xf32>
    %7 = vector.extract_strided_slice %4 {offsets = [0, 128], sizes = [128, 128], strides = [1, 1]} : vector<128x256xf32> to vector<128x128xf32>
    %8 = arith.addf %6, %7 : vector<128x128xf32>
    %9 = arith.negf %8 : vector<128x128xf32>
    %10 = math.exp %9 : vector<128x128xf32>
    %cst_5 = arith.constant 1.000000e+00 : f32
    %11 = vector.broadcast %cst_5 : f32 to vector<128x128xf32>
    %12 = arith.addf %11, %10 : vector<128x128xf32>
    %13 = arith.divf %11, %12 : vector<128x128xf32>
    %14 = arith.mulf %8, %13 : vector<128x128xf32>
    %15 = arith.truncf %14 : vector<128x128xf32> to vector<128x128xbf16>
    %c0_6 = arith.constant 0 : index
    %c0_7 = arith.constant 0 : index
    %16 = vector.load %arg4[%c0_6, %c0_7] : memref<128x128xbf16, #tpu.memory_space<vmem>>, vector<128x128xbf16>
    tpu.vector_store %arg4[%c0_6, %c0_7], %15 {strides = array<i32>} : memref<128x128xbf16, #tpu.memory_space<vmem>>, vector<128x128xbf16>,
    return
  }
  func.func @transform_0(%arg0: i32) -> (i32, i32) {
    %c0_i32 = arith.constant 0 : i32
    %c0_i32_0 = arith.constant 0 : i32
    return %arg0, %c0_i32 : i32, i32
  }
  func.func @transform_1(%arg0: i32) -> (i32, i32) {
    %c0_i32 = arith.constant 0 : i32
    %c0_i32_0 = arith.constant 0 : i32
    return %arg0, %c0_i32 : i32, i32
  }
  func.func @transform_2(%arg0: i32) -> (i32, i32) {
    %c0_i32 = arith.constant 0 : i32
    %c0_i32_0 = arith.constant 0 : i32
    %c0_i32_1 = arith.constant 0 : i32
    return %c0_i32, %c0_i32_0 : i32, i32
  }
  func.func @transform_3(%arg0: i32) -> (i32, i32) {
    %c0_i32 = arith.constant 0 : i32
    %c0_i32_0 = arith.constant 0 : i32
    return %arg0, %c0_i32 : i32, i32
  }
}

module attributes {stable_mosaic.version = 11 : i64} {
  func.func @_conv_skip_kernel(%arg0: i32, %arg1: memref<256x480xbf16, #tpu.memory_space<vmem>>, %arg2: memref<480x64xbf16, #tpu.memory_space<vmem>>, %arg3: memref<256x64xf32, #tpu.memory_space<vmem>>) attributes {dimension_semantics = [#tpu.dimension_semantics<parallel>], iteration_bounds = array<i64: 2>, scalar_prefetch = 0 : i64, scratch_operands = 0 : i64, tpu.core_type = #tpu.core_type<tc>, window_params = [{transform_indices = @transform_0, window_bounds = array<i64: 256, 480>}, {pipeline_mode = #tpu.pipeline_mode<synchronous>, transform_indices = @transform_1, window_bounds = array<i64: 480, 64>}, {transform_indices = @transform_2, window_bounds = array<i64: 256, 64>}]} {
    %c0 = arith.constant 0 : index
    %c0_0 = arith.constant 0 : index
    %0 = vector.load %arg1[%c0, %c0_0] : memref<256x480xbf16, #tpu.memory_space<vmem>>, vector<256x480xbf16>
    %c0_1 = arith.constant 0 : index
    %c0_2 = arith.constant 0 : index
    %1 = vector.load %arg2[%c0_1, %c0_2] : memref<480x64xbf16, #tpu.memory_space<vmem>>, vector<480x64xbf16>
    %cst = arith.constant dense<0.000000e+00> : vector<256x64xf32>
    %2 = tpu.matmul %0, %1, %cst {dimension_numbers = #tpu.dot_dimension_numbers<[1], [0], [0], [1], [0, 0, 1, 1], [], []>} : vector<256x480xbf16>, vector<480x64xbf16>, vector<256x64xf32> -> vector<256x64xf32>
    %c0_3 = arith.constant 0 : index
    %c0_4 = arith.constant 0 : index
    %3 = vector.load %arg3[%c0_3, %c0_4] : memref<256x64xf32, #tpu.memory_space<vmem>>, vector<256x64xf32>
    tpu.vector_store %arg3[%c0_3, %c0_4], %2 {strides = array<i32>} : memref<256x64xf32, #tpu.memory_space<vmem>>, vector<256x64xf32>,
    return
  }
  func.func @transform_0(%arg0: i32) -> (i32, i32) {
    %c0_i32 = arith.constant 0 : i32
    %c0_i32_0 = arith.constant 0 : i32
    return %arg0, %c0_i32 : i32, i32
  }
  func.func @transform_1(%arg0: i32) -> (i32, i32) {
    %c0_i32 = arith.constant 0 : i32
    %c0_i32_0 = arith.constant 0 : i32
    %c0_i32_1 = arith.constant 0 : i32
    return %c0_i32, %c0_i32_0 : i32, i32
  }
  func.func @transform_2(%arg0: i32) -> (i32, i32) {
    %c0_i32 = arith.constant 0 : i32
    %c0_i32_0 = arith.constant 0 : i32
    return %arg0, %c0_i32 : i32, i32
  }
}

</mosaic_0001>

<bundles_post_ra>
// kernel: eq.31
= control target key start
LH: loop header
LB: loop body
LE: loop exit
PB: predicated region body
PF: predicated region fallthrough
CT: control target
= control target key end

     0   :  { %s547_s8 = smov 116   ;;  %s548_s9 = smov 120   ;;  %vm8_vm0 = vcmask 31744   ;;  %s1102_s0 = inlined_call_operand.vmem [shape: s32[512], index: 0, kind: input, shape index: {}]   ;;  %s1103_s1 = inlined_call_operand.vmem [shape: s32[128,4], index: 1, kind: output, shape index: {}]  }
   0x1   :  { %v5_v0 = vld [vmem:[%s1102_s0] sm:$0xf]  ;;  %s546_s0 = smov 124   ;;  %s549_s10 = smov 112  }
   0x2   :  { %6 = vst [vmem:[#allocation0] sm:$0xf] %v5_v0  ;;  %s550_s11 = smov 108   ;;  %s551_s12 = smov 104  }
   0x3   :  { %s552_s13 = smov 100   ;;  %s553_s14 = smov 96  }
   0x4   :  { %s554_s15 = smov 92   ;;  %s555_s16 = smov 88  }
   0x5   :  { %s556_s17 = smov 84   ;;  %s557_s18 = smov 80  }
   0x6   :  { %s558_s19 = smov 76   ;;  %s559_s20 = smov 72  }
   0x7   :  { %s560_s21 = smov 68   ;;  %s561_s22 = smov 64  }
   0x8   :  { %s562_s23 = smov 60   ;;  %s563_s24 = smov 56  }
   0x9   :  { %v16_v1 = vld [vmem:[#allocation0] sm:$0xf]   ;;  %s564_s25 = smov 52   ;;  %s565_s26 = smov 48  }
   0xa   :  { %v40_v2 = vld [vmem:[#allocation0] sm:$0xf]   ;;  %17 = vrot.lane.b32.xlu0 %v16_v1, %s546_s0  ;;  %s566_s27 = smov 44   ;;  %s567_s28 = smov 40  }
   0xb   :  { %41 = vrot.lane.b32.xlu1 %v40_v2, %s547_s8  ;;  %v28_v3 = vld [vmem:[#allocation0] sm:$0xf]   ;;  %s568_s29 = smov 36   ;;  %s569_s30 = smov 32  }
   0xc   :  { %v52_v4 = vld [vmem:[#allocation0] sm:$0xf]  }
   0xd   :  { %v64_v5 = vld [vmem:[#allocation0] sm:$0xf]  }
   0xe   :  { %29 = vrot.lane.b32.xlu0 %v28_v3, %s548_s9  ;;  %v76_v6 = vld [vmem:[#allocation0] sm:$0xf]   ;;  %s570_s9 = smov 28  }
   0xf   :  { %53 = vrot.lane.b32.xlu1 %v52_v4, %s549_s10  ;;  %v88_v7 = vld [vmem:[#allocation0] sm:$0xf]   ;;  %s571_s10 = smov 24  }
  0x10   :  { %v100_v8 = vld [vmem:[#allocation0] sm:$0xf]  }
  0x11   :  { %v112_v9 = vld [vmem:[#allocation0] sm:$0xf]  }
  0x12   :  { %65 = vrot.lane.b32.xlu0 %v64_v5, %s550_s11  ;;  %v124_v10 = vld [vmem:[#allocation0] sm:$0xf]   ;;  %s572_s11 = smov 20  }
  0x13   :  { %77 = vrot.lane.b32.xlu1 %v76_v6, %s551_s12  ;;  %v136_v11 = vld [vmem:[#allocation0] sm:$0xf]   ;;  %s573_s12 = smov 16  }
  0x14   :  { %v148_v12 = vld [vmem:[#allocation0] sm:$0xf]  }
  0x15   :  { %v160_v13 = vld [vmem:[#allocation0] sm:$0xf]  }
  0x16   :  { %89 = vrot.lane.b32.xlu0 %v88_v7, %s552_s13  ;;  %v172_v14 = vld [vmem:[#allocation0] sm:$0xf]   ;;  %s574_s13 = smov 12  }
  0x17   :  { %101 = vrot.lane.b32.xlu1 %v100_v8, %s553_s14  ;;  %v184_v15 = vld [vmem:[#allocation0] sm:$0xf]   ;;  %s575_s14 = smov 8  }
  0x18   :  { %v196_v16 = vld [vmem:[#allocation0] sm:$0xf]  }
  0x19   :  { %v208_v17 = vld [vmem:[#allocation0] sm:$0xf]  }
  0x1a   :  { %113 = vrot.lane.b32.xlu0 %v112_v9, %s554_s15  ;;  %v220_v18 = vld [vmem:[#allocation0] sm:$0xf]   ;;  %s576_s15 = smov 4  }
  0x1b   :  { %125 = vrot.lane.b32.xlu1 %v124_v10, %s555_s16  ;;  %v232_v19 = vld [vmem:[#allocation0] sm:$0xf]  }
  0x1c   :  { %v244_v20 = vld [vmem:[#allocation0] sm:$0xf]  }
  0x1d   :  { %v256_v21 = vld [vmem:[#allocation0] sm:$0xf]  }
  0x1e   :  { %137 = vrot.lane.b32.xlu0 %v136_v11, %s556_s17  ;;  %v268_v22 = vld [vmem:[#allocation0] sm:$0xf]  }
  0x1f   :  { %149 = vrot.lane.b32.xlu1 %v148_v12, %s557_s18  ;;  %v280_v23 = vld [vmem:[#allocation0] sm:$0xf]  }
  0x20   :  { %v292_v24 = vld [vmem:[#allocation0] sm:$0xf]  }
  0x21   :  { %v304_v25 = vld [vmem:[#allocation0] sm:$0xf]  }
  0x22   :  { %161 = vrot.lane.b32.xlu0 %v160_v13, %s558_s19  ;;  %v316_v26 = vld [vmem:[#allocation0] sm:$0xf]  }
  0x23   :  { %173 = vrot.lane.b32.xlu1 %v172_v14, %s559_s20  ;;  %v7_v27 = vld [vmem:[#allocation0] sm:$0xf]  }
  0x24   :  { %9 = vst.msk [vmem:[%s1103_s1] sm:$0x1] %vm8_vm0, %v7_v27   ;;  %388 = vst.msk [vmem:[%s1103_s1 + $0x1f] sm:$0x2] %vm8_vm0, %v7_v27   ;;  %v328_v28 = vld [vmem:[#allocation0] sm:$0xf]  }
  0x25   :  { %389 = vst.msk [vmem:[%s1103_s1 + $0x3e] sm:$0x4] %vm8_vm0, %v7_v27   ;;  %390 = vst.msk [vmem:[%s1103_s1 + $0x5d] sm:$0x8] %vm8_vm0, %v7_v27   ;;  %v340_v29 = vld [vmem:[#allocation0] sm:$0xf]  }
  0x26   :  { %185 = vrot.lane.b32.xlu0 %v184_v15, %s560_s21  ;;  %v352_v30 = vld [vmem:[#allocation0] sm:$0xf]  }
  0x27   :  { %197 = vrot.lane.b32.xlu1 %v196_v16, %s561_s22  ;;  %v364_v31 = vld [vmem:[#allocation0] sm:$0xf]  }
  0x28   :  { %v376_v32 = vld [vmem:[#allocation0] sm:$0xf]  }
  0x2a   :  { %209 = vrot.lane.b32.xlu0 %v208_v17, %s562_s23 }
  0x2b   :  { %221 = vrot.lane.b32.xlu1 %v220_v18, %s563_s24 }
  0x2e   :  { %233 = vrot.lane.b32.xlu0 %v232_v19, %s564_s25 }
  0x2f   :  { %245 = vrot.lane.b32.xlu1 %v244_v20, %s565_s26 }
  0x32   :  { %257 = vrot.lane.b32.xlu0 %v256_v21, %s566_s27 }
  0x33   :  { %269 = vrot.lane.b32.xlu1 %v268_v22, %s567_s28 }
  0x36   :  { %281 = vrot.lane.b32.xlu0 %v280_v23, %s568_s29 }
  0x37   :  { %293 = vrot.lane.b32.xlu1 %v292_v24, %s569_s30 }
  0x3a   :  { %305 = vrot.lane.b32.xlu0 %v304_v25, %s570_s9 }
  0x3b   :  { %317 = vrot.lane.b32.xlu1 %v316_v26, %s571_s10 }
  0x3e   :  { %329 = vrot.lane.b32.xlu0 %v328_v28, %s572_s11 }
  0x3f   :  { %341 = vrot.lane.b32.xlu1 %v340_v29, %s573_s12 }
  0x42   :  { %353 = vrot.lane.b32.xlu0 %v352_v30, %s574_s13 }
  0x43   :  { %365 = vrot.lane.b32.xlu1 %v364_v31, %s575_s14 }
  0x46   :  { %377 = vrot.lane.b32.xlu0 %v376_v32, %s576_s15 }
  0x7c   :  { %v18_v33 = vpop.permute.xlu0 %17  }
  0x7d   :  { %v42_v34 = vpop.permute.xlu1 %41   ;;  %391 = vst.msk [vmem:[%s1103_s1 + $0x1] sm:$0x1] %vm8_vm0, %v18_v33   ;;  %392 = vst.msk [vmem:[%s1103_s1 + $0x20] sm:$0x2] %vm8_vm0, %v18_v33  }
  0x7e   :  { %393 = vst.msk [vmem:[%s1103_s1 + $0x3f] sm:$0x4] %vm8_vm0, %v18_v33   ;;  %394 = vst.msk [vmem:[%s1103_s1 + $0x5e] sm:$0x8] %vm8_vm0, %v18_v33  }
  0x7f   :  { %399 = vst.msk [vmem:[%s1103_s1 + $0x3] sm:$0x1] %vm8_vm0, %v42_v34   ;;  %400 = vst.msk [vmem:[%s1103_s1 + $0x22] sm:$0x2] %vm8_vm0, %v42_v34  }
  0x80   :  { %401 = vst.msk [vmem:[%s1103_s1 + $0x41] sm:$0x4] %vm8_vm0, %v42_v34   ;;  %402 = vst.msk [vmem:[%s1103_s1 + $0x60] sm:$0x8] %vm8_vm0, %v42_v34   ;;  %v30_v35 = vpop.permute.xlu0 %29  }
  0x81   :  { %v54_v36 = vpop.permute.xlu1 %53   ;;  %395 = vst.msk [vmem:[%s1103_s1 + $0x2] sm:$0x1] %vm8_vm0, %v30_v35   ;;  %396 = vst.msk [vmem:[%s1103_s1 + $0x21] sm:$0x2] %vm8_vm0, %v30_v35  }
  0x82   :  { %397 = vst.msk [vmem:[%s1103_s1 + $0x40] sm:$0x4] %vm8_vm0, %v30_v35   ;;  %398 = vst.msk [vmem:[%s1103_s1 + $0x5f] sm:$0x8] %vm8_vm0, %v30_v35  }
  0x83   :  { %403 = vst.msk [vmem:[%s1103_s1 + $0x4] sm:$0x1] %vm8_vm0, %v54_v36   ;;  %404 = vst.msk [vmem:[%s1103_s1 + $0x23] sm:$0x2] %vm8_vm0, %v54_v36  }
  0x84   :  { %405 = vst.msk [vmem:[%s1103_s1 + $0x42] sm:$0x4] %vm8_vm0, %v54_v36   ;;  %406 = vst.msk [vmem:[%s1103_s1 + $0x61] sm:$0x8] %vm8_vm0, %v54_v36   ;;  %v66_v37 = vpop.permute.xlu0 %65  }
  0x85   :  { %v78_v38 = vpop.permute.xlu1 %77   ;;  %407 = vst.msk [vmem:[%s1103_s1 + $0x5] sm:$0x1] %vm8_vm0, %v66_v37   ;;  %408 = vst.msk [vmem:[%s1103_s1 + $0x24] sm:$0x2] %vm8_vm0, %v66_v37  }
  0x86   :  { %409 = vst.msk [vmem:[%s1103_s1 + $0x43] sm:$0x4] %vm8_vm0, %v66_v37   ;;  %410 = vst.msk [vmem:[%s1103_s1 + $0x62] sm:$0x8] %vm8_vm0, %v66_v37  }
  0x87   :  { %411 = vst.msk [vmem:[%s1103_s1 + $0x6] sm:$0x1] %vm8_vm0, %v78_v38   ;;  %412 = vst.msk [vmem:[%s1103_s1 + $0x25] sm:$0x2] %vm8_vm0, %v78_v38  }
  0x88   :  { %413 = vst.msk [vmem:[%s1103_s1 + $0x44] sm:$0x4] %vm8_vm0, %v78_v38   ;;  %414 = vst.msk [vmem:[%s1103_s1 + $0x63] sm:$0x8] %vm8_vm0, %v78_v38   ;;  %v90_v39 = vpop.permute.xlu0 %89  }
  0x89   :  { %v102_v40 = vpop.permute.xlu1 %101   ;;  %415 = vst.msk [vmem:[%s1103_s1 + $0x7] sm:$0x1] %vm8_vm0, %v90_v39   ;;  %416 = vst.msk [vmem:[%s1103_s1 + $0x26] sm:$0x2] %vm8_vm0, %v90_v39  }
  0x8a   :  { %417 = vst.msk [vmem:[%s1103_s1 + $0x45] sm:$0x4] %vm8_vm0, %v90_v39   ;;  %418 = vst.msk [vmem:[%s1103_s1 + $0x64] sm:$0x8] %vm8_vm0, %v90_v39  }
  0x8b   :  { %419 = vst.msk [vmem:[%s1103_s1 + $0x8] sm:$0x1] %vm8_vm0, %v102_v40   ;;  %420 = vst.msk [vmem:[%s1103_s1 + $0x27] sm:$0x2] %vm8_vm0, %v102_v40  }
  0x8c   :  { %421 = vst.msk [vmem:[%s1103_s1 + $0x46] sm:$0x4] %vm8_vm0, %v102_v40   ;;  %422 = vst.msk [vmem:[%s1103_s1 + $0x65] sm:$0x8] %vm8_vm0, %v102_v40   ;;  %v114_v41 = vpop.permute.xlu0 %113  }
  0x8d   :  { %v126_v42 = vpop.permute.xlu1 %125   ;;  %423 = vst.msk [vmem:[%s1103_s1 + $0x9] sm:$0x1] %vm8_vm0, %v114_v41   ;;  %424 = vst.msk [vmem:[%s1103_s1 + $0x28] sm:$0x2] %vm8_vm0, %v114_v41  }
  0x8e   :  { %425 = vst.msk [vmem:[%s1103_s1 + $0x47] sm:$0x4] %vm8_vm0, %v114_v41   ;;  %426 = vst.msk [vmem:[%s1103_s1 + $0x66] sm:$0x8] %vm8_vm0, %v114_v41  }
  0x8f   :  { %427 = vst.msk [vmem:[%s1103_s1 + $0xa] sm:$0x1] %vm8_vm0, %v126_v42   ;;  %428 = vst.msk [vmem:[%s1103_s1 + $0x29] sm:$0x2] %vm8_vm0, %v126_v42  }
  0x90   :  { %429 = vst.msk [vmem:[%s1103_s1 + $0x48] sm:$0x4] %vm8_vm0, %v126_v42   ;;  %430 = vst.msk [vmem:[%s1103_s1 + $0x67] sm:$0x8] %vm8_vm0, %v126_v42   ;;  %v138_v43 = vpop.permute.xlu0 %137  }
  0x91   :  { %v150_v44 = vpop.permute.xlu1 %149   ;;  %431 = vst.msk [vmem:[%s1103_s1 + $0xb] sm:$0x1] %vm8_vm0, %v138_v43   ;;  %432 = vst.msk [vmem:[%s1103_s1 + $0x2a] sm:$0x2] %vm8_vm0, %v138_v43  }
  0x92   :  { %433 = vst.msk [vmem:[%s1103_s1 + $0x49] sm:$0x4] %vm8_vm0, %v138_v43   ;;  %434 = vst.msk [vmem:[%s1103_s1 + $0x68] sm:$0x8] %vm8_vm0, %v138_v43  }
  0x93   :  { %435 = vst.msk [vmem:[%s1103_s1 + $0xc] sm:$0x1] %vm8_vm0, %v150_v44   ;;  %436 = vst.msk [vmem:[%s1103_s1 + $0x2b] sm:$0x2] %vm8_vm0, %v150_v44  }
  0x94   :  { %437 = vst.msk [vmem:[%s1103_s1 + $0x4a] sm:$0x4] %vm8_vm0, %v150_v44   ;;  %438 = vst.msk [vmem:[%s1103_s1 + $0x69] sm:$0x8] %vm8_vm0, %v150_v44   ;;  %v162_v45 = vpop.permute.xlu0 %161  }
  0x95   :  { %v174_v46 = vpop.permute.xlu1 %173   ;;  %439 = vst.msk [vmem:[%s1103_s1 + $0xd] sm:$0x1] %vm8_vm0, %v162_v45   ;;  %440 = vst.msk [vmem:[%s1103_s1 + $0x2c] sm:$0x2] %vm8_vm0, %v162_v45  }
  0x96   :  { %441 = vst.msk [vmem:[%s1103_s1 + $0x4b] sm:$0x4] %vm8_vm0, %v162_v45   ;;  %442 = vst.msk [vmem:[%s1103_s1 + $0x6a] sm:$0x8] %vm8_vm0, %v162_v45  }
  0x97   :  { %443 = vst.msk [vmem:[%s1103_s1 + $0xe] sm:$0x1] %vm8_vm0, %v174_v46   ;;  %444 = vst.msk [vmem:[%s1103_s1 + $0x2d] sm:$0x2] %vm8_vm0, %v174_v46  }
  0x98   :  { %445 = vst.msk [vmem:[%s1103_s1 + $0x4c] sm:$0x4] %vm8_vm0, %v174_v46   ;;  %446 = vst.msk [vmem:[%s1103_s1 + $0x6b] sm:$0x8] %vm8_vm0, %v174_v46   ;;  %v186_v47 = vpop.permute.xlu0 %185  }
  0x99   :  { %v198_v48 = vpop.permute.xlu1 %197   ;;  %447 = vst.msk [vmem:[%s1103_s1 + $0xf] sm:$0x1] %vm8_vm0, %v186_v47   ;;  %448 = vst.msk [vmem:[%s1103_s1 + $0x2e] sm:$0x2] %vm8_vm0, %v186_v47  }
  0x9a   :  { %449 = vst.msk [vmem:[%s1103_s1 + $0x4d] sm:$0x4] %vm8_vm0, %v186_v47   ;;  %450 = vst.msk [vmem:[%s1103_s1 + $0x6c] sm:$0x8] %vm8_vm0, %v186_v47  }
  0x9b   :  { %451 = vst.msk [vmem:[%s1103_s1 + $0x10] sm:$0x1] %vm8_vm0, %v198_v48   ;;  %452 = vst.msk [vmem:[%s1103_s1 + $0x2f] sm:$0x2] %vm8_vm0, %v198_v48  }
  0x9c   :  { %453 = vst.msk [vmem:[%s1103_s1 + $0x4e] sm:$0x4] %vm8_vm0, %v198_v48   ;;  %454 = vst.msk [vmem:[%s1103_s1 + $0x6d] sm:$0x8] %vm8_vm0, %v198_v48   ;;  %v210_v49 = vpop.permute.xlu0 %209  }
  0x9d   :  { %v222_v50 = vpop.permute.xlu1 %221   ;;  %455 = vst.msk [vmem:[%s1103_s1 + $0x11] sm:$0x1] %vm8_vm0, %v210_v49   ;;  %456 = vst.msk [vmem:[%s1103_s1 + $0x30] sm:$0x2] %vm8_vm0, %v210_v49  }
  0x9e   :  { %457 = vst.msk [vmem:[%s1103_s1 + $0x4f] sm:$0x4] %vm8_vm0, %v210_v49   ;;  %458 = vst.msk [vmem:[%s1103_s1 + $0x6e] sm:$0x8] %vm8_vm0, %v210_v49  }
  0x9f   :  { %459 = vst.msk [vmem:[%s1103_s1 + $0x12] sm:$0x1] %vm8_vm0, %v222_v50   ;;  %460 = vst.msk [vmem:[%s1103_s1 + $0x31] sm:$0x2] %vm8_vm0, %v222_v50  }
  0xa0   :  { %461 = vst.msk [vmem:[%s1103_s1 + $0x50] sm:$0x4] %vm8_vm0, %v222_v50   ;;  %462 = vst.msk [vmem:[%s1103_s1 + $0x6f] sm:$0x8] %vm8_vm0, %v222_v50   ;;  %v234_v51 = vpop.permute.xlu0 %233  }
  0xa1   :  { %v246_v52 = vpop.permute.xlu1 %245   ;;  %463 = vst.msk [vmem:[%s1103_s1 + $0x13] sm:$0x1] %vm8_vm0, %v234_v51   ;;  %464 = vst.msk [vmem:[%s1103_s1 + $0x32] sm:$0x2] %vm8_vm0, %v234_v51  }
  0xa2   :  { %465 = vst.msk [vmem:[%s1103_s1 + $0x51] sm:$0x4] %vm8_vm0, %v234_v51   ;;  %466 = vst.msk [vmem:[%s1103_s1 + $0x70] sm:$0x8] %vm8_vm0, %v234_v51  }
  0xa3   :  { %467 = vst.msk [vmem:[%s1103_s1 + $0x14] sm:$0x1] %vm8_vm0, %v246_v52   ;;  %468 = vst.msk [vmem:[%s1103_s1 + $0x33] sm:$0x2] %vm8_vm0, %v246_v52  }
  0xa4   :  { %469 = vst.msk [vmem:[%s1103_s1 + $0x52] sm:$0x4] %vm8_vm0, %v246_v52   ;;  %470 = vst.msk [vmem:[%s1103_s1 + $0x71] sm:$0x8] %vm8_vm0, %v246_v52   ;;  %v258_v53 = vpop.permute.xlu0 %257  }
  0xa5   :  { %v270_v54 = vpop.permute.xlu1 %269   ;;  %471 = vst.msk [vmem:[%s1103_s1 + $0x15] sm:$0x1] %vm8_vm0, %v258_v53   ;;  %472 = vst.msk [vmem:[%s1103_s1 + $0x34] sm:$0x2] %vm8_vm0, %v258_v53  }
  0xa6   :  { %473 = vst.msk [vmem:[%s1103_s1 + $0x53] sm:$0x4] %vm8_vm0, %v258_v53   ;;  %474 = vst.msk [vmem:[%s1103_s1 + $0x72] sm:$0x8] %vm8_vm0, %v258_v53  }
  0xa7   :  { %475 = vst.msk [vmem:[%s1103_s1 + $0x16] sm:$0x1] %vm8_vm0, %v270_v54   ;;  %476 = vst.msk [vmem:[%s1103_s1 + $0x35] sm:$0x2] %vm8_vm0, %v270_v54  }
  0xa8   :  { %477 = vst.msk [vmem:[%s1103_s1 + $0x54] sm:$0x4] %vm8_vm0, %v270_v54   ;;  %478 = vst.msk [vmem:[%s1103_s1 + $0x73] sm:$0x8] %vm8_vm0, %v270_v54   ;;  %v282_v55 = vpop.permute.xlu0 %281  }
  0xa9   :  { %v294_v56 = vpop.permute.xlu1 %293   ;;  %479 = vst.msk [vmem:[%s1103_s1 + $0x17] sm:$0x1] %vm8_vm0, %v282_v55   ;;  %480 = vst.msk [vmem:[%s1103_s1 + $0x36] sm:$0x2] %vm8_vm0, %v282_v55  }
  0xaa   :  { %481 = vst.msk [vmem:[%s1103_s1 + $0x55] sm:$0x4] %vm8_vm0, %v282_v55   ;;  %482 = vst.msk [vmem:[%s1103_s1 + $0x74] sm:$0x8] %vm8_vm0, %v282_v55  }
  0xab   :  { %483 = vst.msk [vmem:[%s1103_s1 + $0x18] sm:$0x1] %vm8_vm0, %v294_v56   ;;  %484 = vst.msk [vmem:[%s1103_s1 + $0x37] sm:$0x2] %vm8_vm0, %v294_v56  }
  0xac   :  { %485 = vst.msk [vmem:[%s1103_s1 + $0x56] sm:$0x4] %vm8_vm0, %v294_v56   ;;  %486 = vst.msk [vmem:[%s1103_s1 + $0x75] sm:$0x8] %vm8_vm0, %v294_v56   ;;  %v306_v57 = vpop.permute.xlu0 %305  }
  0xad   :  { %v318_v58 = vpop.permute.xlu1 %317   ;;  %487 = vst.msk [vmem:[%s1103_s1 + $0x19] sm:$0x1] %vm8_vm0, %v306_v57   ;;  %488 = vst.msk [vmem:[%s1103_s1 + $0x38] sm:$0x2] %vm8_vm0, %v306_v57  }
  0xae   :  { %489 = vst.msk [vmem:[%s1103_s1 + $0x57] sm:$0x4] %vm8_vm0, %v306_v57   ;;  %490 = vst.msk [vmem:[%s1103_s1 + $0x76] sm:$0x8] %vm8_vm0, %v306_v57  }
  0xaf   :  { %491 = vst.msk [vmem:[%s1103_s1 + $0x1a] sm:$0x1] %vm8_vm0, %v318_v58   ;;  %492 = vst.msk [vmem:[%s1103_s1 + $0x39] sm:$0x2] %vm8_vm0, %v318_v58  }
  0xb0   :  { %493 = vst.msk [vmem:[%s1103_s1 + $0x58] sm:$0x4] %vm8_vm0, %v318_v58   ;;  %494 = vst.msk [vmem:[%s1103_s1 + $0x77] sm:$0x8] %vm8_vm0, %v318_v58   ;;  %v330_v59 = vpop.permute.xlu0 %329  }
  0xb1   :  { %v342_v60 = vpop.permute.xlu1 %341   ;;  %495 = vst.msk [vmem:[%s1103_s1 + $0x1b] sm:$0x1] %vm8_vm0, %v330_v59   ;;  %496 = vst.msk [vmem:[%s1103_s1 + $0x3a] sm:$0x2] %vm8_vm0, %v330_v59  }
  0xb2   :  { %497 = vst.msk [vmem:[%s1103_s1 + $0x59] sm:$0x4] %vm8_vm0, %v330_v59   ;;  %498 = vst.msk [vmem:[%s1103_s1 + $0x78] sm:$0x8] %vm8_vm0, %v330_v59  }
  0xb3   :  { %499 = vst.msk [vmem:[%s1103_s1 + $0x1c] sm:$0x1] %vm8_vm0, %v342_v60   ;;  %500 = vst.msk [vmem:[%s1103_s1 + $0x3b] sm:$0x2] %vm8_vm0, %v342_v60  }
  0xb4   :  { %501 = vst.msk [vmem:[%s1103_s1 + $0x5a] sm:$0x4] %vm8_vm0, %v342_v60   ;;  %502 = vst.msk [vmem:[%s1103_s1 + $0x79] sm:$0x8] %vm8_vm0, %v342_v60   ;;  %v354_v61 = vpop.permute.xlu0 %353  }
  0xb5   :  { %v366_v62 = vpop.permute.xlu1 %365   ;;  %503 = vst.msk [vmem:[%s1103_s1 + $0x1d] sm:$0x1] %vm8_vm0, %v354_v61   ;;  %504 = vst.msk [vmem:[%s1103_s1 + $0x3c] sm:$0x2] %vm8_vm0, %v354_v61  }
  0xb6   :  { %505 = vst.msk [vmem:[%s1103_s1 + $0x5b] sm:$0x4] %vm8_vm0, %v354_v61   ;;  %506 = vst.msk [vmem:[%s1103_s1 + $0x7a] sm:$0x8] %vm8_vm0, %v354_v61  }
  0xb7   :  { %507 = vst.msk [vmem:[%s1103_s1 + $0x1e] sm:$0x1] %vm8_vm0, %v366_v62   ;;  %508 = vst.msk [vmem:[%s1103_s1 + $0x3d] sm:$0x2] %vm8_vm0, %v366_v62  }
  0xb8   :  { %509 = vst.msk [vmem:[%s1103_s1 + $0x5c] sm:$0x4] %vm8_vm0, %v366_v62   ;;  %510 = vst.msk [vmem:[%s1103_s1 + $0x7b] sm:$0x8] %vm8_vm0, %v366_v62   ;;  %v378_v63 = vpop.permute.xlu0 %377  }
  0xb9   :  { %511 = vst.msk [vmem:[%s1103_s1 + $0x1f] sm:$0x1] %vm8_vm0, %v378_v63   ;;  %512 = vst.msk [vmem:[%s1103_s1 + $0x3e] sm:$0x2] %vm8_vm0, %v378_v63  }
  0xba   :  { %513 = vst.msk [vmem:[%s1103_s1 + $0x5d] sm:$0x4] %vm8_vm0, %v378_v63   ;;  %514 = vst.msk [vmem:[%s1103_s1 + $0x7c] sm:$0x8] %vm8_vm0, %v378_v63  }

// kernel: eq.38
= control target key start
LH: loop header
LB: loop body
LE: loop exit
PB: predicated region body
PF: predicated region fallthrough
CT: control target
= control target key end

     0   :  { %s1091_s8 = smov 122   ;;  %s1092_s9 = smov 124   ;;  %vm8_vm0 = vcmask 15360   ;;  %s2190_s0 = inlined_call_operand.vmem [shape: s32[512], index: 0, kind: input, shape index: {}]   ;;  %s2191_s1 = inlined_call_operand.vmem [shape: s32[256,2], index: 1, kind: output, shape index: {}]  }
   0x1   :  { %v5_v0 = vld [vmem:[%s2190_s0] sm:$0xf]  ;;  %s1090_s0 = smov 126   ;;  %s1093_s10 = smov 120  }
   0x2   :  { %6 = vst [vmem:[#allocation0] sm:$0xf] %v5_v0  ;;  %s1094_s11 = smov 118   ;;  %s1095_s12 = smov 116  }
   0x3   :  { %s1096_s13 = smov 114   ;;  %s1097_s14 = smov 112  }
   0x4   :  { %s1098_s15 = smov 110   ;;  %s1099_s16 = smov 108  }
   0x5   :  { %s1100_s17 = smov 106   ;;  %s1101_s18 = smov 104  }
   0x6   :  { %s1102_s19 = smov 102   ;;  %s1103_s20 = smov 100  }
   0x7   :  { %s1104_s21 = smov 98   ;;  %s1105_s22 = smov 96  }
   0x8   :  { %s1106_s23 = smov 94   ;;  %s1107_s24 = smov 92  }
   0x9   :  { %v16_v1 = vld [vmem:[#allocation0] sm:$0xf]   ;;  %s1108_s25 = smov 90   ;;  %s1109_s26 = smov 88  }
   0xa   :  { %v40_v2 = vld [vmem:[#allocation0] sm:$0xf]   ;;  %17 = vrot.lane.b32.xlu0 %v16_v1, %s1090_s0  ;;  %s1110_s27 = smov 86   ;;  %s1111_s28 = smov 84  }
   0xb   :  { %41 = vrot.lane.b32.xlu1 %v40_v2, %s1091_s8  ;;  %v28_v3 = vld [vmem:[#allocation0] sm:$0xf]   ;;  %s1112_s29 = smov 82   ;;  %s1113_s30 = smov 80  }
   0xc   :  { %v52_v4 = vld [vmem:[#allocation0] sm:$0xf]   ;;  %s1114_s2 = smov 78   ;;  %s1115_s3 = smov 76  }
   0xd   :  { %v64_v5 = vld [vmem:[#allocation0] sm:$0xf]   ;;  %s1116_s4 = smov 74   ;;  %s1117_s5 = smov 72  }
   0xe   :  { %29 = vrot.lane.b32.xlu0 %v28_v3, %s1092_s9  ;;  %v76_v6 = vld [vmem:[#allocation0] sm:$0xf]   ;;  %s1118_s6 = smov 70   ;;  %s1119_s7 = smov 68  }
   0xf   :  { %53 = vrot.lane.b32.xlu1 %v52_v4, %s1093_s10  ;;  %v88_v7 = vld [vmem:[#allocation0] sm:$0xf]   ;;  %s1120_s0 = smov 66   ;;  %s1121_s8 = smov 64  }
  0x10   :  { %v100_v8 = vld [vmem:[#allocation0] sm:$0xf]   ;;  %s1122_s9 = smov 62   ;;  %s1123_s10 = smov 60  }
  0x11   :  { %v112_v9 = vld [vmem:[#allocation0] sm:$0xf]  }
  0x12   :  { %65 = vrot.lane.b32.xlu0 %v64_v5, %s1094_s11  ;;  %v124_v10 = vld [vmem:[#allocation0] sm:$0xf]   ;;  %s1124_s11 = smov 58  }
  0x13   :  { %77 = vrot.lane.b32.xlu1 %v76_v6, %s1095_s12  ;;  %v136_v11 = vld [vmem:[#allocation0] sm:$0xf]   ;;  %s1125_s12 = smov 56  }
  0x14   :  { %v148_v12 = vld [vmem:[#allocation0] sm:$0xf]  }
  0x15   :  { %v160_v13 = vld [vmem:[#allocation0] sm:$0xf]  }
  0x16   :  { %89 = vrot.lane.b32.xlu0 %v88_v7, %s1096_s13  ;;  %v172_v14 = vld [vmem:[#allocation0] sm:$0xf]   ;;  %s1126_s13 = smov 54  }
  0x17   :  { %101 = vrot.lane.b32.xlu1 %v100_v8, %s1097_s14  ;;  %v184_v15 = vld [vmem:[#allocation0] sm:$0xf]   ;;  %s1127_s14 = smov 52  }
  0x18   :  { %v196_v16 = vld [vmem:[#allocation0] sm:$0xf]  }
  0x19   :  { %v208_v17 = vld [vmem:[#allocation0] sm:$0xf]  }
  0x1a   :  { %113 = vrot.lane.b32.xlu0 %v112_v9, %s1098_s15  ;;  %v220_v18 = vld [vmem:[#allocation0] sm:$0xf]   ;;  %s1128_s15 = smov 50  }
  0x1b   :  { %125 = vrot.lane.b32.xlu1 %v124_v10, %s1099_s16  ;;  %v232_v19 = vld [vmem:[#allocation0] sm:$0xf]   ;;  %s1129_s16 = smov 48  }
  0x1c   :  { %v244_v20 = vld [vmem:[#allocation0] sm:$0xf]  }
  0x1d   :  { %v256_v21 = vld [vmem:[#allocation0] sm:$0xf]  }
  0x1e   :  { %137 = vrot.lane.b32.xlu0 %v136_v11, %s1100_s17  ;;  %v268_v22 = vld [vmem:[#allocation0] sm:$0xf]   ;;  %s1130_s17 = smov 46  }
  0x1f   :  { %149 = vrot.lane.b32.xlu1 %v148_v12, %s1101_s18  ;;  %v280_v23 = vld [vmem:[#allocation0] sm:$0xf]   ;;  %s1131_s18 = smov 44  }
  0x20   :  { %v292_v24 = vld [vmem:[#allocation0] sm:$0xf]  }
  0x21   :  { %v304_v25 = vld [vmem:[#allocation0] sm:$0xf]  }
  0x22   :  { %161 = vrot.lane.b32.xlu0 %v160_v13, %s1102_s19  ;;  %v316_v26 = vld [vmem:[#allocation0] sm:$0xf]   ;;  %s1132_s19 = smov 42  }
  0x23   :  { %173 = vrot.lane.b32.xlu1 %v172_v14, %s1103_s20  ;;  %v328_v27 = vld [vmem:[#allocation0] sm:$0xf]   ;;  %s1133_s20 = smov 40  }
  0x24   :  { %v340_v28 = vld [vmem:[#allocation0] sm:$0xf]  }
  0x25   :  { %v352_v29 = vld [vmem:[#allocation0] sm:$0xf]  }
  0x26   :  { %185 = vrot.lane.b32.xlu0 %v184_v15, %s1104_s21  ;;  %v364_v30 = vld [vmem:[#allocation0] sm:$0xf]   ;;  %s1134_s21 = smov 38  }
  0x27   :  { %197 = vrot.lane.b32.xlu1 %v196_v16, %s1105_s22  ;;  %v376_v31 = vld [vmem:[#allocation0] sm:$0xf]   ;;  %s1135_s22 = smov 36  }
  0x28   :  { %v388_v32 = vld [vmem:[#allocation0] sm:$0xf]  }
  0x29   :  { %v400_v33 = vld [vmem:[#allocation0] sm:$0xf]  }
  0x2a   :  { %209 = vrot.lane.b32.xlu0 %v208_v17, %s1106_s23  ;;  %v412_v34 = vld [vmem:[#allocation0] sm:$0xf]   ;;  %s1136_s23 = smov 34  }
  0x2b   :  { %221 = vrot.lane.b32.xlu1 %v220_v18, %s1107_s24  ;;  %v424_v35 = vld [vmem:[#allocation0] sm:$0xf]   ;;  %s1137_s24 = smov 32  }
  0x2c   :  { %v436_v36 = vld [vmem:[#allocation0] sm:$0xf]  }
  0x2d   :  { %v448_v37 = vld [vmem:[#allocation0] sm:$0xf]  }
  0x2e   :  { %233 = vrot.lane.b32.xlu0 %v232_v19, %s1108_s25  ;;  %v460_v38 = vld [vmem:[#allocation0] sm:$0xf]   ;;  %s1138_s25 = smov 30  }
  0x2f   :  { %245 = vrot.lane.b32.xlu1 %v244_v20, %s1109_s26  ;;  %v472_v39 = vld [vmem:[#allocation0] sm:$0xf]   ;;  %s1139_s26 = smov 28  }
  0x30   :  { %v484_v40 = vld [vmem:[#allocation0] sm:$0xf]  }
  0x31   :  { %v496_v41 = vld [vmem:[#allocation0] sm:$0xf]  }
  0x32   :  { %257 = vrot.lane.b32.xlu0 %v256_v21, %s1110_s27  ;;  %v508_v42 = vld [vmem:[#allocation0] sm:$0xf]   ;;  %s1140_s27 = smov 26  }
  0x33   :  { %269 = vrot.lane.b32.xlu1 %v268_v22, %s1111_s28  ;;  %v520_v43 = vld [vmem:[#allocation0] sm:$0xf]   ;;  %s1141_s28 = smov 24  }
  0x34   :  { %v532_v44 = vld [vmem:[#allocation0] sm:$0xf]  }
  0x35   :  { %v544_v45 = vld [vmem:[#allocation0] sm:$0xf]  }
  0x36   :  { %281 = vrot.lane.b32.xlu0 %v280_v23, %s1112_s29  ;;  %v556_v46 = vld [vmem:[#allocation0] sm:$0xf]   ;;  %s1142_s29 = smov 22  }
  0x37   :  { %293 = vrot.lane.b32.xlu1 %v292_v24, %s1113_s30  ;;  %v568_v47 = vld [vmem:[#allocation0] sm:$0xf]   ;;  %s1143_s30 = smov 20  }
  0x38   :  { %v580_v48 = vld [vmem:[#allocation0] sm:$0xf]  }
  0x39   :  { %v592_v49 = vld [vmem:[#allocation0] sm:$0xf]  }
  0x3a   :  { %305 = vrot.lane.b32.xlu0 %v304_v25, %s1114_s2  ;;  %v604_v50 = vld [vmem:[#allocation0] sm:$0xf]   ;;  %s1144_s2 = smov 18  }
  0x3b   :  { %317 = vrot.lane.b32.xlu1 %v316_v26, %s1115_s3  ;;  %v616_v51 = vld [vmem:[#allocation0] sm:$0xf]   ;;  %s1145_s3 = smov 16  }
  0x3c   :  { %v628_v52 = vld [vmem:[#allocation0] sm:$0xf]  }
  0x3d   :  { %v640_v53 = vld [vmem:[#allocation0] sm:$0xf]  }
  0x3e   :  { %329 = vrot.lane.b32.xlu0 %v328_v27, %s1116_s4  ;;  %v652_v54 = vld [vmem:[#allocation0] sm:$0xf]  }
  0x3f   :  { %341 = vrot.lane.b32.xlu1 %v340_v28, %s1117_s5  ;;  %v664_v55 = vld [vmem:[#allocation0] sm:$0xf]  }
  0x40   :  { %v676_v56 = vld [vmem:[#allocation0] sm:$0xf]  }
  0x41   :  { %v688_v57 = vld [vmem:[#allocation0] sm:$0xf]  }
  0x42   :  { %353 = vrot.lane.b32.xlu0 %v352_v29, %s1118_s6  ;;  %v700_v58 = vld [vmem:[#allocation0] sm:$0xf]   ;;  %s1152_s6 = smov 2  }
  0x43   :  { %365 = vrot.lane.b32.xlu1 %v364_v30, %s1119_s7  ;;  %v7_v59 = vld [vmem:[#allocation0] sm:$0xf]  }
  0x44   :  { %9 = vst.msk [vmem:[%s2191_s1] sm:$0x1] %vm8_vm0, %v7_v59   ;;  %772 = vst.msk [vmem:[%s2191_s1 + $0x3f] sm:$0x2] %vm8_vm0, %v7_v59   ;;  %v712_v60 = vld [vmem:[#allocation0] sm:$0xf]  }
  0x45   :  { %773 = vst.msk [vmem:[%s2191_s1 + $0x7e] sm:$0x4] %vm8_vm0, %v7_v59   ;;  %774 = vst.msk [vmem:[%s2191_s1 + $0xbd] sm:$0x8] %vm8_vm0, %v7_v59   ;;  %v724_v61 = vld [vmem:[#allocation0] sm:$0xf]  }
  0x46   :  { %377 = vrot.lane.b32.xlu0 %v376_v31, %s1120_s0  ;;  %v736_v0 = vld [vmem:[#allocation0] sm:$0xf]  }
  0x47   :  { %389 = vrot.lane.b32.xlu1 %v388_v32, %s1121_s8  ;;  %v748_v1 = vld [vmem:[#allocation0] sm:$0xf]  }
  0x48   :  { %v760_v4 = vld [vmem:[#allocation0] sm:$0xf]  }
  0x4a   :  { %401 = vrot.lane.b32.xlu0 %v400_v33, %s1122_s9 }
  0x4b   :  { %413 = vrot.lane.b32.xlu1 %v412_v34, %s1123_s10 }
  0x4e   :  { %425 = vrot.lane.b32.xlu0 %v424_v35, %s1124_s11  ;;  %s1146_s11 = smov 14  }
  0x4f   :  { %437 = vrot.lane.b32.xlu1 %v436_v36, %s1125_s12  ;;  %s1147_s12 = smov 12  }
  0x52   :  { %449 = vrot.lane.b32.xlu0 %v448_v37, %s1126_s13 }
  0x53   :  { %461 = vrot.lane.b32.xlu1 %v460_v38, %s1127_s14 }
  0x56   :  { %473 = vrot.lane.b32.xlu0 %v472_v39, %s1128_s15 }
  0x57   :  { %485 = vrot.lane.b32.xlu1 %v484_v40, %s1129_s16 }
  0x5a   :  { %497 = vrot.lane.b32.xlu0 %v496_v41, %s1130_s17  ;;  %s1150_s17 = smov 6  }
  0x5b   :  { %509 = vrot.lane.b32.xlu1 %v508_v42, %s1131_s18  ;;  %s1151_s18 = smov 4  }
  0x5e   :  { %521 = vrot.lane.b32.xlu0 %v520_v43, %s1132_s19 }
  0x5f   :  { %533 = vrot.lane.b32.xlu1 %v532_v44, %s1133_s20 }
  0x62   :  { %545 = vrot.lane.b32.xlu0 %v544_v45, %s1134_s21 }
  0x63   :  { %557 = vrot.lane.b32.xlu1 %v556_v46, %s1135_s22 }
  0x66   :  { %569 = vrot.lane.b32.xlu0 %v568_v47, %s1136_s23 }
  0x67   :  { %581 = vrot.lane.b32.xlu1 %v580_v48, %s1137_s24 }
  0x6a   :  { %593 = vrot.lane.b32.xlu0 %v592_v49, %s1138_s25 }
  0x6b   :  { %605 = vrot.lane.b32.xlu1 %v604_v50, %s1139_s26 }
  0x6e   :  { %617 = vrot.lane.b32.xlu0 %v616_v51, %s1140_s27 }
  0x6f   :  { %629 = vrot.lane.b32.xlu1 %v628_v52, %s1141_s28 }
  0x72   :  { %641 = vrot.lane.b32.xlu0 %v640_v53, %s1142_s29  ;;  %s1148_s29 = smov 10  }
  0x73   :  { %653 = vrot.lane.b32.xlu1 %v652_v54, %s1143_s30  ;;  %s1149_s30 = smov 8  }
  0x76   :  { %665 = vrot.lane.b32.xlu0 %v664_v55, %s1144_s2 }
  0x77   :  { %677 = vrot.lane.b32.xlu1 %v676_v56, %s1145_s3 }
  0x7a   :  { %689 = vrot.lane.b32.xlu0 %v688_v57, %s1146_s11 }
  0x7b   :  { %701 = vrot.lane.b32.xlu1 %v700_v58, %s1147_s12 }
  0x7c   :  { %v18_v62 = vpop.permute.xlu0 %17  }
  0x7d   :  { %v42_v63 = vpop.permute.xlu1 %41   ;;  %775 = vst.msk [vmem:[%s2191_s1 + $0x1] sm:$0x1] %vm8_vm0, %v18_v62   ;;  %776 = vst.msk [vmem:[%s2191_s1 + $0x40] sm:$0x2] %vm8_vm0, %v18_v62  }
  0x7e   :  { %777 = vst.msk [vmem:[%s2191_s1 + $0x7f] sm:$0x4] %vm8_vm0, %v18_v62   ;;  %778 = vst.msk [vmem:[%s2191_s1 + $0xbe] sm:$0x8] %vm8_vm0, %v18_v62   ;;  %713 = vrot.lane.b32.xlu0 %v712_v60, %s1148_s29 }
  0x7f   :  { %783 = vst.msk [vmem:[%s2191_s1 + $0x3] sm:$0x1] %vm8_vm0, %v42_v63   ;;  %784 = vst.msk [vmem:[%s2191_s1 + $0x42] sm:$0x2] %vm8_vm0, %v42_v63   ;;  %725 = vrot.lane.b32.xlu1 %v724_v61, %s1149_s30 }
  0x80   :  { %785 = vst.msk [vmem:[%s2191_s1 + $0x81] sm:$0x4] %vm8_vm0, %v42_v63   ;;  %786 = vst.msk [vmem:[%s2191_s1 + $0xc0] sm:$0x8] %vm8_vm0, %v42_v63   ;;  %v30_v2 = vpop.permute.xlu0 %29  }
  0x81   :  { %v54_v3 = vpop.permute.xlu1 %53   ;;  %779 = vst.msk [vmem:[%s2191_s1 + $0x2] sm:$0x1] %vm8_vm0, %v30_v2   ;;  %780 = vst.msk [vmem:[%s2191_s1 + $0x41] sm:$0x2] %vm8_vm0, %v30_v2  }
  0x82   :  { %781 = vst.msk [vmem:[%s2191_s1 + $0x80] sm:$0x4] %vm8_vm0, %v30_v2   ;;  %782 = vst.msk [vmem:[%s2191_s1 + $0xbf] sm:$0x8] %vm8_vm0, %v30_v2   ;;  %737 = vrot.lane.b32.xlu0 %v736_v0, %s1150_s17 }
  0x83   :  { %787 = vst.msk [vmem:[%s2191_s1 + $0x4] sm:$0x1] %vm8_vm0, %v54_v3   ;;  %788 = vst.msk [vmem:[%s2191_s1 + $0x43] sm:$0x2] %vm8_vm0, %v54_v3   ;;  %749 = vrot.lane.b32.xlu1 %v748_v1, %s1151_s18 }
  0x84   :  { %789 = vst.msk [vmem:[%s2191_s1 + $0x82] sm:$0x4] %vm8_vm0, %v54_v3   ;;  %790 = vst.msk [vmem:[%s2191_s1 + $0xc1] sm:$0x8] %vm8_vm0, %v54_v3   ;;  %v66_v5 = vpop.permute.xlu0 %65  }
  0x85   :  { %v78_v6 = vpop.permute.xlu1 %77   ;;  %791 = vst.msk [vmem:[%s2191_s1 + $0x5] sm:$0x1] %vm8_vm0, %v66_v5   ;;  %792 = vst.msk [vmem:[%s2191_s1 + $0x44] sm:$0x2] %vm8_vm0, %v66_v5  }
  0x86   :  { %793 = vst.msk [vmem:[%s2191_s1 + $0x83] sm:$0x4] %vm8_vm0, %v66_v5   ;;  %794 = vst.msk [vmem:[%s2191_s1 + $0xc2] sm:$0x8] %vm8_vm0, %v66_v5   ;;  %761 = vrot.lane.b32.xlu0 %v760_v4, %s1152_s6 }
  0x87   :  { %795 = vst.msk [vmem:[%s2191_s1 + $0x6] sm:$0x1] %vm8_vm0, %v78_v6   ;;  %796 = vst.msk [vmem:[%s2191_s1 + $0x45] sm:$0x2] %vm8_vm0, %v78_v6  }
  0x88   :  { %797 = vst.msk [vmem:[%s2191_s1 + $0x84] sm:$0x4] %vm8_vm0, %v78_v6   ;;  %798 = vst.msk [vmem:[%s2191_s1 + $0xc3] sm:$0x8] %vm8_vm0, %v78_v6   ;;  %v90_v7 = vpop.permute.xlu0 %89  }
  0x89   :  { %v102_v8 = vpop.permute.xlu1 %101   ;;  %799 = vst.msk [vmem:[%s2191_s1 + $0x7] sm:$0x1] %vm8_vm0, %v90_v7   ;;  %800 = vst.msk [vmem:[%s2191_s1 + $0x46] sm:$0x2] %vm8_vm0, %v90_v7  }
  0x8a   :  { %801 = vst.msk [vmem:[%s2191_s1 + $0x85] sm:$0x4] %vm8_vm0, %v90_v7   ;;  %802 = vst.msk [vmem:[%s2191_s1 + $0xc4] sm:$0x8] %vm8_vm0, %v90_v7  }
  0x8b   :  { %803 = vst.msk [vmem:[%s2191_s1 + $0x8] sm:$0x1] %vm8_vm0, %v102_v8   ;;  %804 = vst.msk [vmem:[%s2191_s1 + $0x47] sm:$0x2] %vm8_vm0, %v102_v8  }
  0x8c   :  { %805 = vst.msk [vmem:[%s2191_s1 + $0x86] sm:$0x4] %vm8_vm0, %v102_v8   ;;  %806 = vst.msk [vmem:[%s2191_s1 + $0xc5] sm:$0x8] %vm8_vm0, %v102_v8   ;;  %v114_v9 = vpop.permute.xlu0 %113  }
  0x8d   :  { %v126_v10 = vpop.permute.xlu1 %125   ;;  %807 = vst.msk [vmem:[%s2191_s1 + $0x9] sm:$0x1] %vm8_vm0, %v114_v9   ;;  %808 = vst.msk [vmem:[%s2191_s1 + $0x48] sm:$0x2] %vm8_vm0, %v114_v9  }
  0x8e   :  { %809 = vst.msk [vmem:[%s2191_s1 + $0x87] sm:$0x4] %vm8_vm0, %v114_v9   ;;  %810 = vst.msk [vmem:[%s2191_s1 + $0xc6] sm:$0x8] %vm8_vm0, %v114_v9  }
  0x8f   :  { %811 = vst.msk [vmem:[%s2191_s1 + $0xa] sm:$0x1] %vm8_vm0, %v126_v10   ;;  %812 = vst.msk [vmem:[%s2191_s1 + $0x49] sm:$0x2] %vm8_vm0, %v126_v10  }
  0x90   :  { %813 = vst.msk [vmem:[%s2191_s1 + $0x88] sm:$0x4] %vm8_vm0, %v126_v10   ;;  %814 = vst.msk [vmem:[%s2191_s1 + $0xc7] sm:$0x8] %vm8_vm0, %v126_v10   ;;  %v138_v11 = vpop.permute.xlu0 %137  }
  0x91   :  { %v150_v12 = vpop.permute.xlu1 %149   ;;  %815 = vst.msk [vmem:[%s2191_s1 + $0xb] sm:$0x1] %vm8_vm0, %v138_v11   ;;  %816 = vst.msk [vmem:[%s2191_s1 + $0x4a] sm:$0x2] %vm8_vm0, %v138_v11  }
  0x92   :  { %817 = vst.msk [vmem:[%s2191_s1 + $0x89] sm:$0x4] %vm8_vm0, %v138_v11   ;;  %818 = vst.msk [vmem:[%s2191_s1 + $0xc8] sm:$0x8] %vm8_vm0, %v138_v11  }
  0x93   :  { %819 = vst.msk [vmem:[%s2191_s1 + $0xc] sm:$0x1] %vm8_vm0, %v150_v12   ;;  %820 = vst.msk [vmem:[%s2191_s1 + $0x4b] sm:$0x2] %vm8_vm0, %v150_v12  }
  0x94   :  { %821 = vst.msk [vmem:[%s2191_s1 + $0x8a] sm:$0x4] %vm8_vm0, %v150_v12   ;;  %822 = vst.msk [vmem:[%s2191_s1 + $0xc9] sm:$0x8] %vm8_vm0, %v150_v12   ;;  %v162_v13 = vpop.permute.xlu0 %161  }
  0x95   :  { %v174_v14 = vpop.permute.xlu1 %173   ;;  %823 = vst.msk [vmem:[%s2191_s1 + $0xd] sm:$0x1] %vm8_vm0, %v162_v13   ;;  %824 = vst.msk [vmem:[%s2191_s1 + $0x4c] sm:$0x2] %vm8_vm0, %v162_v13  }
  0x96   :  { %825 = vst.msk [vmem:[%s2191_s1 + $0x8b] sm:$0x4] %vm8_vm0, %v162_v13   ;;  %826 = vst.msk [vmem:[%s2191_s1 + $0xca] sm:$0x8] %vm8_vm0, %v162_v13  }
  0x97   :  { %827 = vst.msk [vmem:[%s2191_s1 + $0xe] sm:$0x1] %vm8_vm0, %v174_v14   ;;  %828 = vst.msk [vmem:[%s2191_s1 + $0x4d] sm:$0x2] %vm8_vm0, %v174_v14  }
  0x98   :  { %829 = vst.msk [vmem:[%s2191_s1 + $0x8c] sm:$0x4] %vm8_vm0, %v174_v14   ;;  %830 = vst.msk [vmem:[%s2191_s1 + $0xcb] sm:$0x8] %vm8_vm0, %v174_v14   ;;  %v186_v15 = vpop.permute.xlu0 %185  }
  0x99   :  { %v198_v16 = vpop.permute.xlu1 %197   ;;  %831 = vst.msk [vmem:[%s2191_s1 + $0xf] sm:$0x1] %vm8_vm0, %v186_v15   ;;  %832 = vst.msk [vmem:[%s2191_s1 + $0x4e] sm:$0x2] %vm8_vm0, %v186_v15  }
  0x9a   :  { %833 = vst.msk [vmem:[%s2191_s1 + $0x8d] sm:$0x4] %vm8_vm0, %v186_v15   ;;  %834 = vst.msk [vmem:[%s2191_s1 + $0xcc] sm:$0x8] %vm8_vm0, %v186_v15  }
  0x9b   :  { %835 = vst.msk [vmem:[%s2191_s1 + $0x10] sm:$0x1] %vm8_vm0, %v198_v16   ;;  %836 = vst.msk [vmem:[%s2191_s1 + $0x4f] sm:$0x2] %vm8_vm0, %v198_v16  }
  0x9c   :  { %837 = vst.msk [vmem:[%s2191_s1 + $0x8e] sm:$0x4] %vm8_vm0, %v198_v16   ;;  %838 = vst.msk [vmem:[%s2191_s1 + $0xcd] sm:$0x8] %vm8_vm0, %v198_v16   ;;  %v210_v17 = vpop.permute.xlu0 %209  }
  0x9d   :  { %v222_v18 = vpop.permute.xlu1 %221   ;;  %839 = vst.msk [vmem:[%s2191_s1 + $0x11] sm:$0x1] %vm8_vm0, %v210_v17   ;;  %840 = vst.msk [vmem:[%s2191_s1 + $0x50] sm:$0x2] %vm8_vm0, %v210_v17  }
  0x9e   :  { %841 = vst.msk [vmem:[%s2191_s1 + $0x8f] sm:$0x4] %vm8_vm0, %v210_v17   ;;  %842 = vst.msk [vmem:[%s2191_s1 + $0xce] sm:$0x8] %vm8_vm0, %v210_v17  }
  0x9f   :  { %843 = vst.msk [vmem:[%s2191_s1 + $0x12] sm:$0x1] %vm8_vm0, %v222_v18   ;;  %844 = vst.msk [vmem:[%s2191_s1 + $0x51] sm:$0x2] %vm8_vm0, %v222_v18  }
  0xa0   :  { %845 = vst.msk [vmem:[%s2191_s1 + $0x90] sm:$0x4] %vm8_vm0, %v222_v18   ;;  %846 = vst.msk [vmem:[%s2191_s1 + $0xcf] sm:$0x8] %vm8_vm0, %v222_v18   ;;  %v234_v19 = vpop.permute.xlu0 %233  }
  0xa1   :  { %v246_v20 = vpop.permute.xlu1 %245   ;;  %847 = vst.msk [vmem:[%s2191_s1 + $0x13] sm:$0x1] %vm8_vm0, %v234_v19   ;;  %848 = vst.msk [vmem:[%s2191_s1 + $0x52] sm:$0x2] %vm8_vm0, %v234_v19  }
  0xa2   :  { %849 = vst.msk [vmem:[%s2191_s1 + $0x91] sm:$0x4] %vm8_vm0, %v234_v19   ;;  %850 = vst.msk [vmem:[%s2191_s1 + $0xd0] sm:$0x8] %vm8_vm0, %v234_v19  }
  0xa3   :  { %851 = vst.msk [vmem:[%s2191_s1 + $0x14] sm:$0x1] %vm8_vm0, %v246_v20   ;;  %852 = vst.msk [vmem:[%s2191_s1 + $0x53] sm:$0x2] %vm8_vm0, %v246_v20  }
  0xa4   :  { %853 = vst.msk [vmem:[%s2191_s1 + $0x92] sm:$0x4] %vm8_vm0, %v246_v20   ;;  %854 = vst.msk [vmem:[%s2191_s1 + $0xd1] sm:$0x8] %vm8_vm0, %v246_v20   ;;  %v258_v21 = vpop.permute.xlu0 %257  }
  0xa5   :  { %v270_v22 = vpop.permute.xlu1 %269   ;;  %855 = vst.msk [vmem:[%s2191_s1 + $0x15] sm:$0x1] %vm8_vm0, %v258_v21   ;;  %856 = vst.msk [vmem:[%s2191_s1 + $0x54] sm:$0x2] %vm8_vm0, %v258_v21  }
  0xa6   :  { %857 = vst.msk [vmem:[%s2191_s1 + $0x93] sm:$0x4] %vm8_vm0, %v258_v21   ;;  %858 = vst.msk [vmem:[%s2191_s1 + $0xd2] sm:$0x8] %vm8_vm0, %v258_v21  }
  0xa7   :  { %859 = vst.msk [vmem:[%s2191_s1 + $0x16] sm:$0x1] %vm8_vm0, %v270_v22   ;;  %860 = vst.msk [vmem:[%s2191_s1 + $0x55] sm:$0x2] %vm8_vm0, %v270_v22  }
  0xa8   :  { %861 = vst.msk [vmem:[%s2191_s1 + $0x94] sm:$0x4] %vm8_vm0, %v270_v22   ;;  %862 = vst.msk [vmem:[%s2191_s1 + $0xd3] sm:$0x8] %vm8_vm0, %v270_v22   ;;  %v282_v23 = vpop.permute.xlu0 %281  }
  0xa9   :  { %v294_v24 = vpop.permute.xlu1 %293   ;;  %863 = vst.msk [vmem:[%s2191_s1 + $0x17] sm:$0x1] %vm8_vm0, %v282_v23   ;;  %864 = vst.msk [vmem:[%s2191_s1 + $0x56] sm:$0x2] %vm8_vm0, %v282_v23  }
  0xaa   :  { %865 = vst.msk [vmem:[%s2191_s1 + $0x95] sm:$0x4] %vm8_vm0, %v282_v23   ;;  %866 = vst.msk [vmem:[%s2191_s1 + $0xd4] sm:$0x8] %vm8_vm0, %v282_v23  }
  0xab   :  { %867 = vst.msk [vmem:[%s2191_s1 + $0x18] sm:$0x1] %vm8_vm0, %v294_v24   ;;  %868 = vst.msk [vmem:[%s2191_s1 + $0x57] sm:$0x2] %vm8_vm0, %v294_v24  }
  0xac   :  { %869 = vst.msk [vmem:[%s2191_s1 + $0x96] sm:$0x4] %vm8_vm0, %v294_v24   ;;  %870 = vst.msk [vmem:[%s2191_s1 + $0xd5] sm:$0x8] %vm8_vm0, %v294_v24   ;;  %v306_v25 = vpop.permute.xlu0 %305  }
  0xad   :  { %v318_v26 = vpop.permute.xlu1 %317   ;;  %871 = vst.msk [vmem:[%s2191_s1 + $0x19] sm:$0x1] %vm8_vm0, %v306_v25   ;;  %872 = vst.msk [vmem:[%s2191_s1 + $0x58] sm:$0x2] %vm8_vm0, %v306_v25  }
  0xae   :  { %873 = vst.msk [vmem:[%s2191_s1 + $0x97] sm:$0x4] %vm8_vm0, %v306_v25   ;;  %874 = vst.msk [vmem:[%s2191_s1 + $0xd6] sm:$0x8] %vm8_vm0, %v306_v25  }
  0xaf   :  { %875 = vst.msk [vmem:[%s2191_s1 + $0x1a] sm:$0x1] %vm8_vm0, %v318_v26   ;;  %876 = vst.msk [vmem:[%s2191_s1 + $0x59] sm:$0x2] %vm8_vm0, %v318_v26  }
  0xb0   :  { %877 = vst.msk [vmem:[%s2191_s1 + $0x98] sm:$0x4] %vm8_vm0, %v318_v26   ;;  %878 = vst.msk [vmem:[%s2191_s1 + $0xd7] sm:$0x8] %vm8_vm0, %v318_v26   ;;  %v330_v27 = vpop.permute.xlu0 %329  }
  0xb1   :  { %v342_v28 = vpop.permute.xlu1 %341   ;;  %879 = vst.msk [vmem:[%s2191_s1 + $0x1b] sm:$0x1] %vm8_vm0, %v330_v27   ;;  %880 = vst.msk [vmem:[%s2191_s1 + $0x5a] sm:$0x2] %vm8_vm0, %v330_v27  }
  0xb2   :  { %881 = vst.msk [vmem:[%s2191_s1 + $0x99] sm:$0x4] %vm8_vm0, %v330_v27   ;;  %882 = vst.msk [vmem:[%s2191_s1 + $0xd8] sm:$0x8] %vm8_vm0, %v330_v27  }
  0xb3   :  { %883 = vst.msk [vmem:[%s2191_s1 + $0x1c] sm:$0x1] %vm8_vm0, %v342_v28   ;;  %884 = vst.msk [vmem:[%s2191_s1 + $0x5b] sm:$0x2] %vm8_vm0, %v342_v28  }
  0xb4   :  { %885 = vst.msk [vmem:[%s2191_s1 + $0x9a] sm:$0x4] %vm8_vm0, %v342_v28   ;;  %886 = vst.msk [vmem:[%s2191_s1 + $0xd9] sm:$0x8] %vm8_vm0, %v342_v28   ;;  %v354_v29 = vpop.permute.xlu0 %353  }
  0xb5   :  { %v366_v30 = vpop.permute.xlu1 %365   ;;  %887 = vst.msk [vmem:[%s2191_s1 + $0x1d] sm:$0x1] %vm8_vm0, %v354_v29   ;;  %888 = vst.msk [vmem:[%s2191_s1 + $0x5c] sm:$0x2] %vm8_vm0, %v354_v29  }
  0xb6   :  { %889 = vst.msk [vmem:[%s2191_s1 + $0x9b] sm:$0x4] %vm8_vm0, %v354_v29   ;;  %890 = vst.msk [vmem:[%s2191_s1 + $0xda] sm:$0x8] %vm8_vm0, %v354_v29  }
  0xb7   :  { %891 = vst.msk [vmem:[%s2191_s1 + $0x1e] sm:$0x1] %vm8_vm0, %v366_v30   ;;  %892 = vst.msk [vmem:[%s2191_s1 + $0x5d] sm:$0x2] %vm8_vm0, %v366_v30  }
  0xb8   :  { %893 = vst.msk [vmem:[%s2191_s1 + $0x9c] sm:$0x4] %vm8_vm0, %v366_v30   ;;  %894 = vst.msk [vmem:[%s2191_s1 + $0xdb] sm:$0x8] %vm8_vm0, %v366_v30   ;;  %v378_v31 = vpop.permute.xlu0 %377  }
  0xb9   :  { %v390_v32 = vpop.permute.xlu1 %389   ;;  %895 = vst.msk [vmem:[%s2191_s1 + $0x1f] sm:$0x1] %vm8_vm0, %v378_v31   ;;  %896 = vst.msk [vmem:[%s2191_s1 + $0x5e] sm:$0x2] %vm8_vm0, %v378_v31  }
  0xba   :  { %897 = vst.msk [vmem:[%s2191_s1 + $0x9d] sm:$0x4] %vm8_vm0, %v378_v31   ;;  %898 = vst.msk [vmem:[%s2191_s1 + $0xdc] sm:$0x8] %vm8_vm0, %v378_v31  }
  0xbb   :  { %899 = vst.msk [vmem:[%s2191_s1 + $0x20] sm:$0x1] %vm8_vm0, %v390_v32   ;;  %900 = vst.msk [vmem:[%s2191_s1 + $0x5f] sm:$0x2] %vm8_vm0, %v390_v32  }
  0xbc   :  { %901 = vst.msk [vmem:[%s2191_s1 + $0x9e] sm:$0x4] %vm8_vm0, %v390_v32   ;;  %902 = vst.msk [vmem:[%s2191_s1 + $0xdd] sm:$0x8] %vm8_vm0, %v390_v32   ;;  %v402_v33 = vpop.permute.xlu0 %401  }
  0xbd   :  { %v414_v34 = vpop.permute.xlu1 %413   ;;  %903 = vst.msk [vmem:[%s2191_s1 + $0x21] sm:$0x1] %vm8_vm0, %v402_v33   ;;  %904 = vst.msk [vmem:[%s2191_s1 + $0x60] sm:$0x2] %vm8_vm0, %v402_v33  }
  0xbe   :  { %905 = vst.msk [vmem:[%s2191_s1 + $0x9f] sm:$0x4] %vm8_vm0, %v402_v33   ;;  %906 = vst.msk [vmem:[%s2191_s1 + $0xde] sm:$0x8] %vm8_vm0, %v402_v33  }
  0xbf   :  { %907 = vst.msk [vmem:[%s2191_s1 + $0x22] sm:$0x1] %vm8_vm0, %v414_v34   ;;  %908 = vst.msk [vmem:[%s2191_s1 + $0x61] sm:$0x2] %vm8_vm0, %v414_v34  }
  0xc0   :  { %909 = vst.msk [vmem:[%s2191_s1 + $0xa0] sm:$0x4] %vm8_vm0, %v414_v34   ;;  %910 = vst.msk [vmem:[%s2191_s1 + $0xdf] sm:$0x8] %vm8_vm0, %v414_v34   ;;  %v426_v35 = vpop.permute.xlu0 %425  }
  0xc1   :  { %v438_v36 = vpop.permute.xlu1 %437   ;;  %911 = vst.msk [vmem:[%s2191_s1 + $0x23] sm:$0x1] %vm8_vm0, %v426_v35   ;;  %912 = vst.msk [vmem:[%s2191_s1 + $0x62] sm:$0x2] %vm8_vm0, %v426_v35  }
  0xc2   :  { %913 = vst.msk [vmem:[%s2191_s1 + $0xa1] sm:$0x4] %vm8_vm0, %v426_v35   ;;  %914 = vst.msk [vmem:[%s2191_s1 + $0xe0] sm:$0x8] %vm8_vm0, %v426_v35  }
  0xc3   :  { %915 = vst.msk [vmem:[%s2191_s1 + $0x24] sm:$0x1] %vm8_vm0, %v438_v36   ;;  %916 = vst.msk [vmem:[%s2191_s1 + $0x63] sm:$0x2] %vm8_vm0, %v438_v36  }
  0xc4   :  { %917 = vst.msk [vmem:[%s2191_s1 + $0xa2] sm:$0x4] %vm8_vm0, %v438_v36   ;;  %918 = vst.msk [vmem:[%s2191_s1 + $0xe1] sm:$0x8] %vm8_vm0, %v438_v36   ;;  %v450_v37 = vpop.permute.xlu0 %449  }
  0xc5   :  { %v462_v38 = vpop.permute.xlu1 %461   ;;  %919 = vst.msk [vmem:[%s2191_s1 + $0x25] sm:$0x1] %vm8_vm0, %v450_v37   ;;  %920 = vst.msk [vmem:[%s2191_s1 + $0x64] sm:$0x2] %vm8_vm0, %v450_v37  }
  0xc6   :  { %921 = vst.msk [vmem:[%s2191_s1 + $0xa3] sm:$0x4] %vm8_vm0, %v450_v37   ;;  %922 = vst.msk [vmem:[%s2191_s1 + $0xe2] sm:$0x8] %vm8_vm0, %v450_v37  }
  0xc7   :  { %923 = vst.msk [vmem:[%s2191_s1 + $0x26] sm:$0x1] %vm8_vm0, %v462_v38   ;;  %924 = vst.msk [vmem:[%s2191_s1 + $0x65] sm:$0x2] %vm8_vm0, %v462_v38  }
  0xc8   :  { %925 = vst.msk [vmem:[%s2191_s1 + $0xa4] sm:$0x4] %vm8_vm0, %v462_v38   ;;  %926 = vst.msk [vmem:[%s2191_s1 + $0xe3] sm:$0x8] %vm8_vm0, %v462_v38   ;;  %v474_v39 = vpop.permute.xlu0 %473  }
  0xc9   :  { %v486_v40 = vpop.permute.xlu1 %485   ;;  %927 = vst.msk [vmem:[%s2191_s1 + $0x27] sm:$0x1] %vm8_vm0, %v474_v39   ;;  %928 = vst.msk [vmem:[%s2191_s1 + $0x66] sm:$0x2] %vm8_vm0, %v474_v39  }
  0xca   :  { %929 = vst.msk [vmem:[%s2191_s1 + $0xa5] sm:$0x4] %vm8_vm0, %v474_v39   ;;  %930 = vst.msk [vmem:[%s2191_s1 + $0xe4] sm:$0x8] %vm8_vm0, %v474_v39  }
  0xcb   :  { %931 = vst.msk [vmem:[%s2191_s1 + $0x28] sm:$0x1] %vm8_vm0, %v486_v40   ;;  %932 = vst.msk [vmem:[%s2191_s1 + $0x67] sm:$0x2] %vm8_vm0, %v486_v40  }
  0xcc   :  { %933 = vst.msk [vmem:[%s2191_s1 + $0xa6] sm:$0x4] %vm8_vm0, %v486_v40   ;;  %934 = vst.msk [vmem:[%s2191_s1 + $0xe5] sm:$0x8] %vm8_vm0, %v486_v40   ;;  %v498_v41 = vpop.permute.xlu0 %497  }
  0xcd   :  { %v510_v42 = vpop.permute.xlu1 %509   ;;  %935 = vst.msk [vmem:[%s2191_s1 + $0x29] sm:$0x1] %vm8_vm0, %v498_v41   ;;  %936 = vst.msk [vmem:[%s2191_s1 + $0x68] sm:$0x2] %vm8_vm0, %v498_v41  }
  0xce   :  { %937 = vst.msk [vmem:[%s2191_s1 + $0xa7] sm:$0x4] %vm8_vm0, %v498_v41   ;;  %938 = vst.msk [vmem:[%s2191_s1 + $0xe6] sm:$0x8] %vm8_vm0, %v498_v41  }
  0xcf   :  { %939 = vst.msk [vmem:[%s2191_s1 + $0x2a] sm:$0x1] %vm8_vm0, %v510_v42   ;;  %940 = vst.msk [vmem:[%s2191_s1 + $0x69] sm:$0x2] %vm8_vm0, %v510_v42  }
  0xd0   :  { %941 = vst.msk [vmem:[%s2191_s1 + $0xa8] sm:$0x4] %vm8_vm0, %v510_v42   ;;  %942 = vst.msk [vmem:[%s2191_s1 + $0xe7] sm:$0x8] %vm8_vm0, %v510_v42   ;;  %v522_v43 = vpop.permute.xlu0 %521  }
  0xd1   :  { %v534_v44 = vpop.permute.xlu1 %533   ;;  %943 = vst.msk [vmem:[%s2191_s1 + $0x2b] sm:$0x1] %vm8_vm0, %v522_v43   ;;  %944 = vst.msk [vmem:[%s2191_s1 + $0x6a] sm:$0x2] %vm8_vm0, %v522_v43  }
  0xd2   :  { %945 = vst.msk [vmem:[%s2191_s1 + $0xa9] sm:$0x4] %vm8_vm0, %v522_v43   ;;  %946 = vst.msk [vmem:[%s2191_s1 + $0xe8] sm:$0x8] %vm8_vm0, %v522_v43  }
  0xd3   :  { %947 = vst.msk [vmem:[%s2191_s1 + $0x2c] sm:$0x1] %vm8_vm0, %v534_v44   ;;  %948 = vst.msk [vmem:[%s2191_s1 + $0x6b] sm:$0x2] %vm8_vm0, %v534_v44  }
  0xd4   :  { %949 = vst.msk [vmem:[%s2191_s1 + $0xaa] sm:$0x4] %vm8_vm0, %v534_v44   ;;  %950 = vst.msk [vmem:[%s2191_s1 + $0xe9] sm:$0x8] %vm8_vm0, %v534_v44   ;;  %v546_v45 = vpop.permute.xlu0 %545  }
  0xd5   :  { %v558_v46 = vpop.permute.xlu1 %557   ;;  %951 = vst.msk [vmem:[%s2191_s1 + $0x2d] sm:$0x1] %vm8_vm0, %v546_v45   ;;  %952 = vst.msk [vmem:[%s2191_s1 + $0x6c] sm:$0x2] %vm8_vm0, %v546_v45  }
  0xd6   :  { %953 = vst.msk [vmem:[%s2191_s1 + $0xab] sm:$0x4] %vm8_vm0, %v546_v45   ;;  %954 = vst.msk [vmem:[%s2191_s1 + $0xea] sm:$0x8] %vm8_vm0, %v546_v45  }
  0xd7   :  { %955 = vst.msk [vmem:[%s2191_s1 + $0x2e] sm:$0x1] %vm8_vm0, %v558_v46   ;;  %956 = vst.msk [vmem:[%s2191_s1 + $0x6d] sm:$0x2] %vm8_vm0, %v558_v46  }
  0xd8   :  { %957 = vst.msk [vmem:[%s2191_s1 + $0xac] sm:$0x4] %vm8_vm0, %v558_v46   ;;  %958 = vst.msk [vmem:[%s2191_s1 + $0xeb] sm:$0x8] %vm8_vm0, %v558_v46   ;;  %v570_v47 = vpop.permute.xlu0 %569  }
  0xd9   :  { %v582_v48 = vpop.permute.xlu1 %581   ;;  %959 = vst.msk [vmem:[%s2191_s1 + $0x2f] sm:$0x1] %vm8_vm0, %v570_v47   ;;  %960 = vst.msk [vmem:[%s2191_s1 + $0x6e] sm:$0x2] %vm8_vm0, %v570_v47  }
  0xda   :  { %961 = vst.msk [vmem:[%s2191_s1 + $0xad] sm:$0x4] %vm8_vm0, %v570_v47   ;;  %962 = vst.msk [vmem:[%s2191_s1 + $0xec] sm:$0x8] %vm8_vm0, %v570_v47  }
  0xdb   :  { %963 = vst.msk [vmem:[%s2191_s1 + $0x30] sm:$0x1] %vm8_vm0, %v582_v48   ;;  %964 = vst.msk [vmem:[%s2191_s1 + $0x6f] sm:$0x2] %vm8_vm0, %v582_v48  }
  0xdc   :  { %965 = vst.msk [vmem:[%s2191_s1 + $0xae] sm:$0x4] %vm8_vm0, %v582_v48   ;;  %966 = vst.msk [vmem:[%s2191_s1 + $0xed] sm:$0x8] %vm8_vm0, %v582_v48   ;;  %v594_v49 = vpop.permute.xlu0 %593  }
  0xdd   :  { %v606_v50 = vpop.permute.xlu1 %605   ;;  %967 = vst.msk [vmem:[%s2191_s1 + $0x31] sm:$0x1] %vm8_vm0, %v594_v49   ;;  %968 = vst.msk [vmem:[%s2191_s1 + $0x70] sm:$0x2] %vm8_vm0, %v594_v49  }
  0xde   :  { %969 = vst.msk [vmem:[%s2191_s1 + $0xaf] sm:$0x4] %vm8_vm0, %v594_v49   ;;  %970 = vst.msk [vmem:[%s2191_s1 + $0xee] sm:$0x8] %vm8_vm0, %v594_v49  }
  0xdf   :  { %971 = vst.msk [vmem:[%s2191_s1 + $0x32] sm:$0x1] %vm8_vm0, %v606_v50   ;;  %972 = vst.msk [vmem:[%s2191_s1 + $0x71] sm:$0x2] %vm8_vm0, %v606_v50  }
  0xe0   :  { %973 = vst.msk [vmem:[%s2191_s1 + $0xb0] sm:$0x4] %vm8_vm0, %v606_v50   ;;  %974 = vst.msk [vmem:[%s2191_s1 + $0xef] sm:$0x8] %vm8_vm0, %v606_v50   ;;  %v618_v51 = vpop.permute.xlu0 %617  }
  0xe1   :  { %v630_v52 = vpop.permute.xlu1 %629   ;;  %975 = vst.msk [vmem:[%s2191_s1 + $0x33] sm:$0x1] %vm8_vm0, %v618_v51   ;;  %976 = vst.msk [vmem:[%s2191_s1 + $0x72] sm:$0x2] %vm8_vm0, %v618_v51  }
  0xe2   :  { %977 = vst.msk [vmem:[%s2191_s1 + $0xb1] sm:$0x4] %vm8_vm0, %v618_v51   ;;  %978 = vst.msk [vmem:[%s2191_s1 + $0xf0] sm:$0x8] %vm8_vm0, %v618_v51  }
  0xe3   :  { %979 = vst.msk [vmem:[%s2191_s1 + $0x34] sm:$0x1] %vm8_vm0, %v630_v52   ;;  %980 = vst.msk [vmem:[%s2191_s1 + $0x73] sm:$0x2] %vm8_vm0, %v630_v52  }
  0xe4   :  { %981 = vst.msk [vmem:[%s2191_s1 + $0xb2] sm:$0x4] %vm8_vm0, %v630_v52   ;;  %982 = vst.msk [vmem:[%s2191_s1 + $0xf1] sm:$0x8] %vm8_vm0, %v630_v52   ;;  %v642_v53 = vpop.permute.xlu0 %641  }
  0xe5   :  { %v654_v54 = vpop.permute.xlu1 %653   ;;  %983 = vst.msk [vmem:[%s2191_s1 + $0x35] sm:$0x1] %vm8_vm0, %v642_v53   ;;  %984 = vst.msk [vmem:[%s2191_s1 + $0x74] sm:$0x2] %vm8_vm0, %v642_v53  }
  0xe6   :  { %985 = vst.msk [vmem:[%s2191_s1 + $0xb3] sm:$0x4] %vm8_vm0, %v642_v53   ;;  %986 = vst.msk [vmem:[%s2191_s1 + $0xf2] sm:$0x8] %vm8_vm0, %v642_v53  }
  0xe7   :  { %987 = vst.msk [vmem:[%s2191_s1 + $0x36] sm:$0x1] %vm8_vm0, %v654_v54   ;;  %988 = vst.msk [vmem:[%s2191_s1 + $0x75] sm:$0x2] %vm8_vm0, %v654_v54  }
  0xe8   :  { %989 = vst.msk [vmem:[%s2191_s1 + $0xb4] sm:$0x4] %vm8_vm0, %v654_v54   ;;  %990 = vst.msk [vmem:[%s2191_s1 + $0xf3] sm:$0x8] %vm8_vm0, %v654_v54   ;;  %v666_v55 = vpop.permute.xlu0 %665  }
  0xe9   :  { %v678_v56 = vpop.permute.xlu1 %677   ;;  %991 = vst.msk [vmem:[%s2191_s1 + $0x37] sm:$0x1] %vm8_vm0, %v666_v55   ;;  %992 = vst.msk [vmem:[%s2191_s1 + $0x76] sm:$0x2] %vm8_vm0, %v666_v55  }
  0xea   :  { %993 = vst.msk [vmem:[%s2191_s1 + $0xb5] sm:$0x4] %vm8_vm0, %v666_v55   ;;  %994 = vst.msk [vmem:[%s2191_s1 + $0xf4] sm:$0x8] %vm8_vm0, %v666_v55  }
  0xeb   :  { %995 = vst.msk [vmem:[%s2191_s1 + $0x38] sm:$0x1] %vm8_vm0, %v678_v56   ;;  %996 = vst.msk [vmem:[%s2191_s1 + $0x77] sm:$0x2] %vm8_vm0, %v678_v56  }
  0xec   :  { %997 = vst.msk [vmem:[%s2191_s1 + $0xb6] sm:$0x4] %vm8_vm0, %v678_v56   ;;  %998 = vst.msk [vmem:[%s2191_s1 + $0xf5] sm:$0x8] %vm8_vm0, %v678_v56   ;;  %v690_v57 = vpop.permute.xlu0 %689  }
  0xed   :  { %v702_v58 = vpop.permute.xlu1 %701   ;;  %999 = vst.msk [vmem:[%s2191_s1 + $0x39] sm:$0x1] %vm8_vm0, %v690_v57   ;;  %1000 = vst.msk [vmem:[%s2191_s1 + $0x78] sm:$0x2] %vm8_vm0, %v690_v57  }
  0xee   :  { %1001 = vst.msk [vmem:[%s2191_s1 + $0xb7] sm:$0x4] %vm8_vm0, %v690_v57   ;;  %1002 = vst.msk [vmem:[%s2191_s1 + $0xf6] sm:$0x8] %vm8_vm0, %v690_v57  }
  0xef   :  { %1003 = vst.msk [vmem:[%s2191_s1 + $0x3a] sm:$0x1] %vm8_vm0, %v702_v58   ;;  %1004 = vst.msk [vmem:[%s2191_s1 + $0x79] sm:$0x2] %vm8_vm0, %v702_v58  }
  0xf0   :  { %1005 = vst.msk [vmem:[%s2191_s1 + $0xb8] sm:$0x4] %vm8_vm0, %v702_v58   ;;  %1006 = vst.msk [vmem:[%s2191_s1 + $0xf7] sm:$0x8] %vm8_vm0, %v702_v58   ;;  %v714_v59 = vpop.permute.xlu0 %713  }
  0xf1   :  { %v726_v60 = vpop.permute.xlu1 %725   ;;  %1007 = vst.msk [vmem:[%s2191_s1 + $0x3b] sm:$0x1] %vm8_vm0, %v714_v59   ;;  %1008 = vst.msk [vmem:[%s2191_s1 + $0x7a] sm:$0x2] %vm8_vm0, %v714_v59  }
  0xf2   :  { %1009 = vst.msk [vmem:[%s2191_s1 + $0xb9] sm:$0x4] %vm8_vm0, %v714_v59   ;;  %1010 = vst.msk [vmem:[%s2191_s1 + $0xf8] sm:$0x8] %vm8_vm0, %v714_v59  }
  0xf3   :  { %1011 = vst.msk [vmem:[%s2191_s1 + $0x3c] sm:$0x1] %vm8_vm0, %v726_v60   ;;  %1012 = vst.msk [vmem:[%s2191_s1 + $0x7b] sm:$0x2] %vm8_vm0, %v726_v60  }
  0xf4   :  { %1013 = vst.msk [vmem:[%s2191_s1 + $0xba] sm:$0x4] %vm8_vm0, %v726_v60   ;;  %1014 = vst.msk [vmem:[%s2191_s1 + $0xf9] sm:$0x8] %vm8_vm0, %v726_v60   ;;  %v738_v61 = vpop.permute.xlu0 %737  }
  0xf5   :  { %v750_v62 = vpop.permute.xlu1 %749   ;;  %1015 = vst.msk [vmem:[%s2191_s1 + $0x3d] sm:$0x1] %vm8_vm0, %v738_v61   ;;  %1016 = vst.msk [vmem:[%s2191_s1 + $0x7c] sm:$0x2] %vm8_vm0, %v738_v61  }
  0xf6   :  { %1017 = vst.msk [vmem:[%s2191_s1 + $0xbb] sm:$0x4] %vm8_vm0, %v738_v61   ;;  %1018 = vst.msk [vmem:[%s2191_s1 + $0xfa] sm:$0x8] %vm8_vm0, %v738_v61  }
  0xf7   :  { %1019 = vst.msk [vmem:[%s2191_s1 + $0x3e] sm:$0x1] %vm8_vm0, %v750_v62   ;;  %1020 = vst.msk [vmem:[%s2191_s1 + $0x7d] sm:$0x2] %vm8_vm0, %v750_v62  }
  0xf8   :  { %1021 = vst.msk [vmem:[%s2191_s1 + $0xbc] sm:$0x4] %vm8_vm0, %v750_v62   ;;  %1022 = vst.msk [vmem:[%s2191_s1 + $0xfb] sm:$0x8] %vm8_vm0, %v750_v62   ;;  %v762_v63 = vpop.permute.xlu0 %761  }
  0xf9   :  { %1023 = vst.msk [vmem:[%s2191_s1 + $0x3f] sm:$0x1] %vm8_vm0, %v762_v63   ;;  %1024 = vst.msk [vmem:[%s2191_s1 + $0x7e] sm:$0x2] %vm8_vm0, %v762_v63  }
  0xfa   :  { %1025 = vst.msk [vmem:[%s2191_s1 + $0xbd] sm:$0x4] %vm8_vm0, %v762_v63   ;;  %1026 = vst.msk [vmem:[%s2191_s1 + $0xfc] sm:$0x8] %vm8_vm0, %v762_v63  }

// kernel: graph_res_block_embed_forward.5
= control target key start
LH: loop header
LB: loop body
LE: loop exit
PB: predicated region body
PF: predicated region fallthrough
CT: control target
= control target key end

     0   :  { %s700_s9 = smov 0   ;;  %s702_s10 = smov 0   ;;  %s1014_s0 = inlined_call_operand.vmem [shape: f32[512,32], index: 0, kind: input, shape index: {}]   ;;  %s1015_s1 = inlined_call_operand.vmem [shape: s32[1,512], index: 1, kind: input, shape index: {}]   ;;  %s1016_s2 = inlined_call_operand.vmem [shape: f32[2,2,64], index: 2, kind: output, shape index: {}]  }
   0x1   :  { %s704_s11 = smov 0  }
   0x2 LB: > { %s24_s12 = sadd.s32 1, %s676_s10  ;;  %p585_p0 = scmp.ge.s32.totalorder %s680_s11, 1  ;;  %s680_s11 = sphi %s704_s11, %s12_s11   ;;  %s676_s10 = sphi %s702_s10, %s1018_s10   ;;  %s672_s9 = sphi %s700_s9, %s1017_s9  }
   0x3   : > { %p26_p1 = scmp.ge.s32.totalorder %s24_s12, 2  ;;  %p143_p2 = scmp.lt.s32.totalorder %s680_s11, 3 }
   0x5   : > { %s1020_s12 = smov (%p26_p1, %s24_s12), 0  ;;  %p144_p3 = pnand %p585_p0, %p143_p2 }
   0x6   : > { %s586_s13 = sshll.u32 (!%p144_p3), %s672_s9, 5  ;;  %s682_s18 = smov (!%p144_p3), 32  }
   0x7   : > { %147 = sbr.rel (%p144_p3) target bundleno = 396 (0x18c), region = 28  ;;  %p172_p4 = scmp.lt.s32.totalorder (!%p144_p3), %s586_s13, 63 }
   0x8   : > { %s588_s19 = sshll.u32 (!%p144_p3), %s672_s9, 1  ;;  %p185_p6 = scmp.lt.s32.totalorder (!%p144_p3), %s672_s9, 1 }
   0x9   : > { %p180_p5 = scmp.lt.s32.totalorder (!%p144_p3), %s588_s19, 3 }
   0xc   : > { %s1022_s13 = smov (!%p172_p4, %s586_s13), 63  ;;  %v228_v48 = vlaneseq  ;;  %s1024_s19 = smov (!%p180_p5, %s588_s19), 3  ;;  %vm404_vm2 = vcmask 261120   ;;  %vm193_vm3 = vcmask 517120  }
   0xd   : > { %s587_s14 = sshll.u32 %s1022_s13, 3  ;;  %s182_s22 = scalar_lea.vmem %s1015_s1, %s1024_s19 }
   0xe   : > { %s724_s17 = scalar_lea.vmem %s1014_s0, %s587_s14  ;;  %v875_v51 = vshrl.u32 %v228_v48, 7  ;;  %v227_v57 = vld [vmem:[%s182_s22] sm:$0x3]  ;;  %s1026_s9 = smov (!%p185_p6, %s672_s9), 1 }
   0xf   : > { %v727_v0 = vld [vmem:[%s724_s17 + $0xf8] sm:$0xff]  ;;  %v730_v1 = vld [vmem:[%s724_s17 + $0xf0] sm:$0xff]  ;;  %v749_v8 = vld [vmem:[%s724_s17 + $0xe8] sm:$0xff]  ;;  %s589_s23 = sshll.u32 %s1026_s9, 1 }
  0x10   : > { %v733_v2 = vld [vmem:[%s724_s17 + $0x78] sm:$0xff]  ;;  %v275_v3 = vmul.f32 %v727_v0, %v727_v0  ;;  %v274_v4 = vmul.f32 %v730_v1, %v730_v1  ;;  %v740_v5 = vld [vmem:[%s724_s17 + $0x70] sm:$0xff]  ;;  %v752_v9 = vld [vmem:[%s724_s17 + $0x68] sm:$0xff]  ;;  %v273_v10 = vmul.f32 %v749_v8, %v749_v8  ;;  %v236_v54 = vsub.s32 1, %v875_v51  ;;  %s188_s26 = scalar_lea.vmem %s1016_s2, %s589_s23 }
  0x11   : > { %v259_v6 = vmul.f32 %v733_v2, %v733_v2  ;;  %v258_v7 = vmul.f32 %v740_v5, %v740_v5  ;;  %v257_v11 = vmul.f32 %v752_v9, %v752_v9  ;;  %v761_v12 = vld [vmem:[%s724_s17 + $0xe0] sm:$0xff]  ;;  %v773_v16 = vld [vmem:[%s724_s17 + $0xd8] sm:$0xff]  ;;  %v785_v20 = vld [vmem:[%s724_s17 + $0xd0] sm:$0xff]  ;;  %v232_v58 = vsub.s32 0, %v875_v51 }
  0x12   : > { %370 = vrot.lane.b32.xlu0 %v275_v3, %s682_s18  ;;  %368 = vrot.lane.b32.xlu1 %v274_v4, %s682_s18  ;;  %v764_v13 = vld [vmem:[%s724_s17 + $0x60] sm:$0xff]  ;;  %v272_v14 = vmul.f32 %v761_v12, %v761_v12  ;;  %v776_v17 = vld [vmem:[%s724_s17 + $0x58] sm:$0xff]  ;;  %v271_v18 = vmul.f32 %v773_v16, %v773_v16  ;;  %v270_v22 = vmul.f32 %v785_v20, %v785_v20  ;;  %v683_v4 = vmov 1.0  }
  0x13   : > { %v256_v15 = vmul.f32 %v764_v13, %v764_v13  ;;  %v255_v19 = vmul.f32 %v776_v17, %v776_v17  ;;  %v788_v21 = vld [vmem:[%s724_s17 + $0x50] sm:$0xff]  ;;  %v797_v24 = vld [vmem:[%s724_s17 + $0xc8] sm:$0xff]  ;;  %v809_v28 = vld [vmem:[%s724_s17 + $0xc0] sm:$0xff]  ;;  %v237_v59 = vrot.slane %v227_v57, %v236_v54  ;;  %v894_v60 = vrot.slane %v227_v57, %v232_v58 }
  0x14   : > { %v254_v23 = vmul.f32 %v788_v21, %v788_v21  ;;  %v800_v25 = vld [vmem:[%s724_s17 + $0x48] sm:$0xff]  ;;  %v269_v26 = vmul.f32 %v797_v24, %v797_v24  ;;  %v812_v29 = vld [vmem:[%s724_s17 + $0x40] sm:$0xff]  ;;  %v268_v30 = vmul.f32 %v809_v28, %v809_v28  ;;  %v821_v32 = vld [vmem:[%s724_s17 + $0xb8] sm:$0xff] }
  0x15   : > { %v253_v27 = vmul.f32 %v800_v25, %v800_v25  ;;  %v252_v31 = vmul.f32 %v812_v29, %v812_v29  ;;  %v824_v33 = vld [vmem:[%s724_s17 + $0x38] sm:$0xff]  ;;  %v267_v34 = vmul.f32 %v821_v32, %v821_v32  ;;  %v833_v36 = vld [vmem:[%s724_s17 + $0xb0] sm:$0xff]  ;;  %v845_v40 = vld [vmem:[%s724_s17 + $0xa8] sm:$0xff]  ;;  %vm239_vm0 = vcmp.eq.s32.totalorder %v237_v59, %v875_v51 }
  0x16   : > { %338 = vrot.lane.b32.xlu0 %v259_v6, %s682_s18  ;;  %336 = vrot.lane.b32.xlu1 %v258_v7, %s682_s18  ;;  %v251_v35 = vmul.f32 %v824_v33, %v824_v33  ;;  %v836_v37 = vld [vmem:[%s724_s17 + $0x30] sm:$0xff]  ;;  %v266_v38 = vmul.f32 %v833_v36, %v833_v36  ;;  %v848_v41 = vld [vmem:[%s724_s17 + $0x28] sm:$0xff]  ;;  %v265_v42 = vmul.f32 %v845_v40, %v845_v40 }
  0x17   : > { %v250_v39 = vmul.f32 %v836_v37, %v836_v37  ;;  %v249_v43 = vmul.f32 %v848_v41, %v848_v41  ;;  %v857_v44 = vld [vmem:[%s724_s17 + $0xa0] sm:$0xff]  ;;  %v870_v49 = vld [vmem:[%s724_s17 + $0x98] sm:$0xff]  ;;  %v888_v55 = vld [vmem:[%s724_s17 + $0x90] sm:$0xff]  ;;  %592 = vmatprep.mubr.msk.f32.mxu0 %vm239_vm0, %v683_v4  ;;  %vm238_vm1 = vcmp.eq.s32.totalorder %v894_v60, %v875_v51 }
  0x18   : > { %v860_v45 = vld [vmem:[%s724_s17 + $0x20] sm:$0xff]  ;;  %v264_v46 = vmul.f32 %v857_v44, %v857_v44  ;;  %v873_v50 = vld [vmem:[%s724_s17 + $0x18] sm:$0xff]  ;;  %v263_v52 = vmul.f32 %v870_v49, %v870_v49  ;;  %v891_v56 = vld [vmem:[%s724_s17 + $0x10] sm:$0xff]  ;;  %v262_v61 = vmul.f32 %v888_v55, %v888_v55 }
  0x19   : > { %v248_v47 = vmul.f32 %v860_v45, %v860_v45  ;;  %v247_v53 = vmul.f32 %v873_v50, %v873_v50  ;;  %v246_v62 = vmul.f32 %v891_v56, %v891_v56  ;;  %v904_v63 = vld [vmem:[%s724_s17 + $0x88] sm:$0xff] }
  0x1a   : > { %366 = vrot.lane.b32.xlu0 %v273_v10, %s682_s18  ;;  %334 = vrot.lane.b32.xlu1 %v257_v11, %s682_s18  ;;  %v907_v3 = vld [vmem:[%s724_s17 + $0x8] sm:$0xff]  ;;  %v261_v6 = vmul.f32 %v904_v63, %v904_v63  ;;  %v919_v10 = vld [vmem:[%s724_s17 + $0x80] sm:$0xff] }
  0x1b   : > { %v245_v7 = vmul.f32 %v907_v3, %v907_v3  ;;  %v922_v11 = vld [vmem:[%s724_s17] sm:$0xff] }
  0x1e   : > { %364 = vrot.lane.b32.xlu0 %v272_v14, %s682_s18  ;;  %332 = vrot.lane.b32.xlu1 %v256_v15, %s682_s18  ;;  %v260_v14 = vmul.f32 %v919_v10, %v919_v10  ;;  %v244_v15 = vmul.f32 %v922_v11, %v922_v11 }
  0x22   : > { %362 = vrot.lane.b32.xlu0 %v271_v18, %s682_s18  ;;  %330 = vrot.lane.b32.xlu1 %v255_v19, %s682_s18 }
  0x26   : > { %360 = vrot.lane.b32.xlu0 %v270_v22, %s682_s18  ;;  %328 = vrot.lane.b32.xlu1 %v254_v23, %s682_s18 }
  0x2a   : > { %358 = vrot.lane.b32.xlu0 %v269_v26, %s682_s18  ;;  %326 = vrot.lane.b32.xlu1 %v253_v27, %s682_s18 }
  0x2e   : > { %356 = vrot.lane.b32.xlu0 %v268_v30, %s682_s18  ;;  %324 = vrot.lane.b32.xlu1 %v252_v31, %s682_s18 }
  0x32   : > { %354 = vrot.lane.b32.xlu0 %v267_v34, %s682_s18  ;;  %322 = vrot.lane.b32.xlu1 %v251_v35, %s682_s18 }
  0x36   : > { %352 = vrot.lane.b32.xlu0 %v266_v38, %s682_s18  ;;  %320 = vrot.lane.b32.xlu1 %v250_v39, %s682_s18 }
  0x3a   : > { %350 = vrot.lane.b32.xlu0 %v265_v42, %s682_s18  ;;  %318 = vrot.lane.b32.xlu1 %v249_v43, %s682_s18 }
  0x3e   : > { %348 = vrot.lane.b32.xlu0 %v264_v46, %s682_s18  ;;  %316 = vrot.lane.b32.xlu1 %v248_v47, %s682_s18 }
  0x42   : > { %346 = vrot.lane.b32.xlu0 %v263_v52, %s682_s18  ;;  %314 = vrot.lane.b32.xlu1 %v247_v53, %s682_s18 }
  0x46   : > { %344 = vrot.lane.b32.xlu0 %v262_v61, %s682_s18  ;;  %312 = vrot.lane.b32.xlu1 %v246_v62, %s682_s18 }
  0x4a   : > { %342 = vrot.lane.b32.xlu0 %v261_v6, %s682_s18  ;;  %310 = vrot.lane.b32.xlu1 %v245_v7, %s682_s18 }
  0x4e   : > { %340 = vrot.lane.b32.xlu0 %v260_v14, %s682_s18  ;;  %308 = vrot.lane.b32.xlu1 %v244_v15, %s682_s18 }
  0x84   : > { %v371_v18 = vpop.permute.xlu0 %370  ;;  %v369_v19 = vpop.permute.xlu1 %368 }
  0x85   : > { %v436_v22 = vsel %vm404_vm2, %v727_v0, %v371_v18  ;;  %v435_v31 = vsel %vm404_vm2, %v730_v1, %v369_v19 }
  0x86   : > { %596 = vmatprep.subr.mxu0 %v436_v22 }
  0x88   : > { %v339_v23 = vpop.permute.xlu0 %338  ;;  %v337_v26 = vpop.permute.xlu1 %336 }
  0x89   : > { %v420_v27 = vsel %vm404_vm2, %v733_v2, %v339_v23  ;;  %v419_v30 = vsel %vm404_vm2, %v740_v5, %v337_v26 }
  0x8a   : > { %597 = vmatpush3.msra.mxu0 %v420_v27 }
  0x8b   : > { %598 = vmatprep.subr.mxu0 %v435_v31 }
  0x8c   : > { %v367_v34 = vpop.permute.xlu0 %366  ;;  %599 = vmatpush3.msra.mxu0 %v419_v30  ;;  %v335_v35 = vpop.permute.xlu1 %334 }
  0x8d   : > { %v434_v0 = vsel %vm404_vm2, %v749_v8, %v367_v34  ;;  %v418_v38 = vsel %vm404_vm2, %v752_v9, %v335_v35 }
  0x8e   : > { %600 = vmatprep.subr.mxu0 %v434_v0 }
  0x8f   : > { %601 = vmatpush3.msra.mxu0 %v418_v38 }
  0x90   : > { %v365_v2 = vpop.permute.xlu0 %364  ;;  %v333_v39 = vpop.permute.xlu1 %332 }
  0x91   : > { %v433_v5 = vsel %vm404_vm2, %v761_v12, %v365_v2  ;;  %v417_v1 = vsel %vm404_vm2, %v764_v13, %v333_v39 }
  0x92   : > { %602 = vmatprep.subr.mxu0 %v433_v5 }
  0x93   : > { %603 = vmatpush3.msra.mxu0 %v417_v1 }
  0x94   : > { %v363_v42 = vpop.permute.xlu0 %362  ;;  %v331_v43 = vpop.permute.xlu1 %330 }
  0x95   : > { %v432_v8 = vsel %vm404_vm2, %v773_v16, %v363_v42  ;;  %v416_v9 = vsel %vm404_vm2, %v776_v17, %v331_v43 }
  0x96   : > { %604 = vmatprep.subr.mxu0 %v432_v8 }
  0x97   : > { %605 = vmatpush3.msra.mxu0 %v416_v9 }
  0x98   : > { %v361_v46 = vpop.permute.xlu0 %360  ;;  %v329_v47 = vpop.permute.xlu1 %328 }
  0x99   : > { %v431_v12 = vsel %vm404_vm2, %v785_v20, %v361_v46  ;;  %v415_v13 = vsel %vm404_vm2, %v788_v21, %v329_v47 }
  0x9a   : > { %606 = vmatprep.subr.mxu0 %v431_v12 }
  0x9b   : > { %607 = vmatpush3.msra.mxu0 %v415_v13 }
  0x9c   : > { %v359_v48 = vpop.permute.xlu0 %358  ;;  %v327_v52 = vpop.permute.xlu1 %326 }
  0x9d   : > { %v430_v16 = vsel %vm404_vm2, %v797_v24, %v359_v48  ;;  %v414_v17 = vsel %vm404_vm2, %v800_v25, %v327_v52 }
  0x9e   : > { %608 = vmatprep.subr.mxu0 %v430_v16 }
  0x9f   : > { %609 = vmatpush3.msra.mxu0 %v414_v17 }
  0xa0   : > { %v357_v53 = vpop.permute.xlu0 %356  ;;  %v325_v54 = vpop.permute.xlu1 %324 }
  0xa1   : > { %v429_v20 = vsel %vm404_vm2, %v809_v28, %v357_v53  ;;  %v413_v21 = vsel %vm404_vm2, %v812_v29, %v325_v54 }
  0xa2   : > { %610 = vmatprep.subr.mxu0 %v429_v20 }
  0xa3   : > { %611 = vmatpush3.msra.mxu0 %v413_v21 }
  0xa4   : > { %v355_v57 = vpop.permute.xlu0 %354  ;;  %v323_v58 = vpop.permute.xlu1 %322 }
  0xa5   : > { %v428_v24 = vsel %vm404_vm2, %v821_v32, %v355_v57  ;;  %v412_v25 = vsel %vm404_vm2, %v824_v33, %v323_v58 }
  0xa6   : > { %612 = vmatprep.subr.mxu0 %v428_v24 }
  0xa7   : > { %613 = vmatpush3.msra.mxu0 %v412_v25 }
  0xa8   : > { %v353_v59 = vpop.permute.xlu0 %352  ;;  %v321_v61 = vpop.permute.xlu1 %320 }
  0xa9   : > { %v427_v28 = vsel %vm404_vm2, %v833_v36, %v353_v59  ;;  %v411_v29 = vsel %vm404_vm2, %v836_v37, %v321_v61 }
  0xaa   : > { %614 = vmatprep.subr.mxu0 %v427_v28 }
  0xab   : > { %615 = vmatpush3.msra.mxu0 %v411_v29 }
  0xac   : > { %v351_v62 = vpop.permute.xlu0 %350  ;;  %v319_v6 = vpop.permute.xlu1 %318 }
  0xad   : > { %v426_v32 = vsel %vm404_vm2, %v845_v40, %v351_v62  ;;  %v410_v33 = vsel %vm404_vm2, %v848_v41, %v319_v6 }
  0xae   : > { %616 = vmatprep.subr.mxu0 %v426_v32 }
  0xaf   : > { %617 = vmatpush3.msra.mxu0 %v410_v33 }
  0xb0   : > { %v349_v7 = vpop.permute.xlu0 %348  ;;  %v317_v14 = vpop.permute.xlu1 %316 }
  0xb1   : > { %v425_v36 = vsel %vm404_vm2, %v857_v44, %v349_v7  ;;  %v409_v37 = vsel %vm404_vm2, %v860_v45, %v317_v14 }
  0xb2   : > { %618 = vmatprep.subr.mxu0 %v425_v36 }
  0xb3   : > { %619 = vmatpush3.msra.mxu0 %v409_v37 }
  0xb4   : > { %v347_v15 = vpop.permute.xlu0 %346  ;;  %v315_v18 = vpop.permute.xlu1 %314 }
  0xb5   : > { %v424_v40 = vsel %vm404_vm2, %v870_v49, %v347_v15  ;;  %v408_v41 = vsel %vm404_vm2, %v873_v50, %v315_v18 }
  0xb6   : > { %620 = vmatprep.subr.mxu0 %v424_v40 }
  0xb7   : > { %621 = vmatpush3.msra.mxu0 %v408_v41 }
  0xb8   : > { %v345_v19 = vpop.permute.xlu0 %344  ;;  %v313_v22 = vpop.permute.xlu1 %312 }
  0xb9   : > { %v423_v44 = vsel %vm404_vm2, %v888_v55, %v345_v19  ;;  %v407_v45 = vsel %vm404_vm2, %v891_v56, %v313_v22 }
  0xba   : > { %622 = vmatprep.subr.mxu0 %v423_v44 }
  0xbb   : > { %623 = vmatpush3.msra.mxu0 %v407_v45 }
  0xbc   : > { %v343_v23 = vpop.permute.xlu0 %342  ;;  %v311_v26 = vpop.permute.xlu1 %310 }
  0xbd   : > { %v422_v49 = vsel %vm404_vm2, %v904_v63, %v343_v23  ;;  %v406_v50 = vsel %vm404_vm2, %v907_v3, %v311_v26  ;;  %v684_v63 = vmov 0.0  }
  0xbe   : > { %624 = vmatprep.subr.mxu0 %v422_v49  ;;  %194 = vst.msk [vmem:[%s188_s26] sm:$0x3] %vm193_vm3, %v684_v63 }
  0xbf   : > { %625 = vmatpush3.msra.mxu0 %v406_v50 }
  0xc0   : > { %v341_v27 = vpop.permute.xlu0 %340  ;;  %v309_v30 = vpop.permute.xlu1 %308 }
  0xc1   : > { %v421_v55 = vsel %vm404_vm2, %v919_v10, %v341_v27  ;;  %v405_v56 = vsel %vm404_vm2, %v922_v11, %v309_v30 }
  0xc2   : > { %626 = vmatprep.subr.mxu0 %v421_v55 }
  0xc3   : > { %627 = vmatpush3.msra.mxu0 %v405_v56 }
  0xc4   : > { %593 = vmatmul.mubr.msk.f32.vlgmr.msra.gmra.mxu0 %vm238_vm1, %v683_v4 }
  0xc5   : > { %v437_v10 = vld [vmem:[%s188_s26] sm:$0x3] }
 0x184   : > { %v628_v3 = vpop.f32.mrf.mxu0 }
 0x186   : > { %v629_v11 = vpop.f32.mrf.mxu0 }
 0x187   : > { %v630_v31 = vadd.f32 %v629_v11, %v628_v3 }
 0x189   : > { %v508_v34 = vadd.f32 %v630_v31, %v437_v10 }
 0x18b   : > { %510 = vst.msk [vmem:[%s188_s26] sm:$0x3] %vm193_vm3, %v508_v34 }
 0x18c PF: > { %s12_s11 = sadd.s32 1, %s680_s11   ;;  %s1017_s9 = smov %s676_s10 }
 0x18d   : > { %p9_p7 = scmp.ge.s32.totalorder %s12_s11, 4   ;;  %s1018_s10 = smov %s1020_s12 }
 0x18f   :  { %11 = sbr.rel (!%p9_p7) target bundleno = 2 (0x2), region = 65 }

// kernel: graph_res_block_embed_forward.6
= control target key start
LH: loop header
LB: loop body
LE: loop exit
PB: predicated region body
PF: predicated region fallthrough
CT: control target
= control target key end

     0   :  { %s672_s12 = smov 0   ;;  %s736_s0 = inlined_call_operand.vmem [shape: f32[128,128], index: 0, kind: input, shape index: {}]   ;;  %s737_s1 = inlined_call_operand.vmem [shape: f32[128,8], index: 1, kind: input, shape index: {}]   ;;  %s738_s2 = inlined_call_operand.vmem [shape: f32[8,256], index: 2, kind: input, shape index: {}]   ;;  %s739_s3 = inlined_call_operand.vmem [shape: bf16[128,128], index: 3, kind: output, shape index: {}]  }
   0x1 LB: > { %s532_s13 = sadd.s32 4294967295, %s649_s12   ;;  %p536_p0 = scmp.ge.s32.totalorder %s649_s12, 1  ;;  %s649_s12 = sphi %s672_s12, %s13_s12  }
   0x2   : > { %p149_p1 = scmp.lt.s32.totalorder %s649_s12, 3 }
   0x4   : > { %p150_p2 = pnand %p536_p0, %p149_p1 }
   0x5   : > { %s537_s18 = sshll.u32 (!%p150_p2), %s532_s13, 3 }
   0x6   : > { %153 = sbr.rel (%p150_p2) target bundleno = 262 (0x106), region = 32  ;;  %p179_p3 = scmp.lt.s32.totalorder (!%p150_p2), %s537_s18, 15 }
   0xb   : > { %v213_v0 = vld [vmem:[%s738_s2 + $0x8] sm:$0xff]  ;;  %v212_v1 = vld [vmem:[%s738_s2] sm:$0xff]  ;;  %v651_v2 = vmov 0.0   ;;  %s741_s18 = smov (!%p179_p3, %s537_s18), 15  ;;  %vm214_vm0 = vcmask 64512  }
   0xc   : > { %269 = vmatprep.subr.mxu0 %v213_v0  ;;  %600 = vmatprep.subr.mxu1 %v213_v0  ;;  %s538_s19 = sshll.u32 %s741_s18, 3  ;;  %s542_s26 = sshll.u32 %s741_s18, 2 }
   0xd   : > { %270 = vmatpush1.msra.mxu0 %v212_v1  ;;  %601 = vmatpush1.msra.mxu1 %v212_v1  ;;  %s188_s22 = scalar_lea.vmem %s737_s1, %s538_s19  ;;  %s703_s25 = scalar_lea.vmem %s736_s0, %s538_s19 }
   0xe   : > { %303 = vmatprep.mubr.f32.mxu0 %v651_v2  ;;  %327 = vmatprep.mubr.f32.mxu1 %v651_v2  ;;  %v204_v3 = vld [vmem:[%s188_s22] sm:$0xff]  ;;  %v205_v5 = vld [vmem:[%s188_s22 + $0x8] sm:$0xff]  ;;  %v206_v7 = vld [vmem:[%s188_s22 + $0x10] sm:$0xff]  ;;  %s194_s29 = scalar_lea.vmem %s739_s3, %s542_s26 }
   0xf   : > { %v208_v4 = vld [vmem:[%s188_s22 + $0x20] sm:$0xff]  ;;  %543 = vmatmul.mubr.msk.f32.vlgmr.msra.gmra.mxu0 %vm214_vm0, %v204_v3  ;;  %v209_v6 = vld [vmem:[%s188_s22 + $0x28] sm:$0xff]  ;;  %v210_v8 = vld [vmem:[%s188_s22 + $0x30] sm:$0xff] }
  0x10   : > { %547 = vmatmul.mubr.msk.f32.vlgmr.msra.gmra.mxu1 %vm214_vm0, %v208_v4  ;;  %309 = vmatprep.mubr.f32.mxu0 %v651_v2  ;;  %v207_v9 = vld [vmem:[%s188_s22 + $0x18] sm:$0xff]  ;;  %v196_v11 = vld [vmem:[%s703_s25] sm:$0xff]  ;;  %v197_v19 = vld [vmem:[%s703_s25 + $0x8] sm:$0xff] }
  0x11   : > { %333 = vmatprep.mubr.f32.mxu1 %v651_v2  ;;  %v211_v10 = vld [vmem:[%s188_s22 + $0x38] sm:$0xff]  ;;  %v200_v12 = vld [vmem:[%s703_s25 + $0x20] sm:$0xff]  ;;  %v201_v20 = vld [vmem:[%s703_s25 + $0x28] sm:$0xff] }
  0x12   : > { %v198_v31 = vld [vmem:[%s703_s25 + $0x10] sm:$0xff]  ;;  %v199_v43 = vld [vmem:[%s703_s25 + $0x18] sm:$0xff] }
  0x13   : > { %544 = vmatmul.mubr.msk.f32.gmra.mxu0 %vm214_vm0, %v205_v5  ;;  %v202_v32 = vld [vmem:[%s703_s25 + $0x30] sm:$0xff]  ;;  %v203_v44 = vld [vmem:[%s703_s25 + $0x38] sm:$0xff] }
  0x14   : > { %548 = vmatmul.mubr.msk.f32.gmra.mxu1 %vm214_vm0, %v209_v6  ;;  %315 = vmatprep.mubr.f32.mxu0 %v651_v2 }
  0x15   : > { %339 = vmatprep.mubr.f32.mxu1 %v651_v2 }
  0x17   : > { %545 = vmatmul.mubr.msk.f32.gmra.mxu0 %vm214_vm0, %v206_v7 }
  0x18   : > { %549 = vmatmul.mubr.msk.f32.gmra.mxu1 %vm214_vm0, %v210_v8  ;;  %321 = vmatprep.mubr.f32.mxu0 %v651_v2 }
  0x19   : > { %345 = vmatprep.mubr.f32.mxu1 %v651_v2 }
  0x1b   : > { %546 = vmatmul.mubr.msk.f32.gmra.mxu0 %vm214_vm0, %v207_v9 }
  0x1c   : > { %550 = vmatmul.mubr.msk.f32.gmra.mxu1 %vm214_vm0, %v211_v10 }
  0xcf   : > { %v305_v13 = vpop.f32.mrf.mxu0 }
  0xd0   : > { %v329_v14 = vpop.f32.mrf.mxu1  ;;  %v352_v15 = vmul.f32 %v305_v13, %v196_v11 }
  0xd1   : > { %v356_v16 = vmul.f32 %v329_v14, %v200_v12  ;;  %v307_v17 = vpop.f32.mrf.mxu0 }
  0xd2   : > { %v331_v18 = vpop.f32.mrf.mxu1  ;;  %v709_v21 = vadd.f32 %v352_v15, %v307_v17 }
  0xd3   : > { %v711_v22 = vadd.f32 %v356_v16, %v331_v18  ;;  %v311_v23 = vpop.f32.mrf.mxu0 }
  0xd4   : > { %v335_v24 = vpop.f32.mrf.mxu1  ;;  %v551_v25 = vmul.f32 -1.442695, %v709_v21  ;;  %v353_v27 = vmul.f32 %v311_v23, %v197_v19 }
  0xd5   : > { %v555_v26 = vmul.f32 -1.442695, %v711_v22  ;;  %v357_v28 = vmul.f32 %v335_v24, %v201_v20  ;;  %v313_v29 = vpop.f32.mrf.mxu0 }
  0xd6   : > { %v337_v30 = vpop.f32.mrf.mxu1  ;;  %611 = vpow2.f32 %v551_v25  ;;  %v717_v33 = vadd.f32 %v353_v27, %v313_v29 }
  0xd7   : > { %v719_v34 = vadd.f32 %v357_v28, %v337_v30  ;;  %613 = vpow2.f32 %v555_v26  ;;  %v317_v35 = vpop.f32.mrf.mxu0 }
  0xd8   : > { %v341_v36 = vpop.f32.mrf.mxu1  ;;  %v552_v37 = vmul.f32 -1.442695, %v717_v33  ;;  %v354_v39 = vmul.f32 %v317_v35, %v198_v31 }
  0xd9   : > { %v556_v38 = vmul.f32 -1.442695, %v719_v34  ;;  %v358_v40 = vmul.f32 %v341_v36, %v202_v32  ;;  %v319_v41 = vpop.f32.mrf.mxu0 }
  0xda   : > { %v343_v42 = vpop.f32.mrf.mxu1  ;;  %615 = vpow2.f32 %v552_v37  ;;  %v362_v45 = vadd.f32 %v354_v39, %v319_v41 }
  0xdb   : > { %v366_v46 = vadd.f32 %v358_v40, %v343_v42  ;;  %617 = vpow2.f32 %v556_v38  ;;  %v323_v47 = vpop.f32.mrf.mxu0 }
  0xdc   : > { %v347_v48 = vpop.f32.mrf.mxu1  ;;  %v553_v49 = vmul.f32 -1.442695, %v362_v45  ;;  %v355_v51 = vmul.f32 %v323_v47, %v199_v43 }
  0xdd   : > { %v557_v50 = vmul.f32 -1.442695, %v366_v46  ;;  %v359_v52 = vmul.f32 %v347_v48, %v203_v44  ;;  %v325_v53 = vpop.f32.mrf.mxu0 }
  0xde   : > { %v349_v54 = vpop.f32.mrf.mxu1  ;;  %619 = vpow2.f32 %v553_v49  ;;  %v363_v55 = vadd.f32 %v355_v51, %v325_v53 }
  0xdf   : > { %v367_v56 = vadd.f32 %v359_v52, %v349_v54  ;;  %621 = vpow2.f32 %v557_v50 }
  0xe0   : > { %v554_v57 = vmul.f32 -1.442695, %v363_v55 }
  0xe1   : > { %v558_v58 = vmul.f32 -1.442695, %v367_v56 }
  0xe2   : > { %623 = vpow2.f32 %v554_v57 }
  0xe3   : > { %v612_v59 = vpop.eup %611  ;;  %625 = vpow2.f32 %v558_v58 }
  0xe4   : > { %v614_v60 = vpop.eup %613  ;;  %v392_v61 = vadd.f32 1.0, %v612_v59 }
  0xe5   : > { %v396_v62 = vadd.f32 1.0, %v614_v60 }
  0xe6   : > { %627 = vrcp.f32 %v392_v61 }
  0xe7   : > { %v616_v63 = vpop.eup %615  ;;  %629 = vrcp.f32 %v396_v62 }
  0xe8   : > { %v618_v0 = vpop.eup %617  ;;  %v393_v1 = vadd.f32 1.0, %v616_v63 }
  0xe9   : > { %v397_v2 = vadd.f32 1.0, %v618_v0 }
  0xea   : > { %631 = vrcp.f32 %v393_v1 }
  0xeb   : > { %v620_v3 = vpop.eup %619  ;;  %633 = vrcp.f32 %v397_v2 }
  0xec   : > { %v622_v4 = vpop.eup %621  ;;  %v394_v5 = vadd.f32 1.0, %v620_v3 }
  0xed   : > { %v398_v6 = vadd.f32 1.0, %v622_v4 }
  0xee   : > { %635 = vrcp.f32 %v394_v5 }
  0xef   : > { %v624_v7 = vpop.eup %623  ;;  %637 = vrcp.f32 %v398_v6 }
  0xf0   : > { %v626_v8 = vpop.eup %625  ;;  %v395_v9 = vadd.f32 1.0, %v624_v7 }
  0xf1   : > { %v399_v10 = vadd.f32 1.0, %v626_v8 }
  0xf2   : > { %639 = vrcp.f32 %v395_v9 }
  0xf3   : > { %641 = vrcp.f32 %v399_v10  ;;  %v628_v11 = vpop.eup %627 }
  0xf4   : > { %v630_v12 = vpop.eup %629  ;;  %v416_v15 = vmul.f32 %v628_v11, %v709_v21 }
  0xf5   : > { %v420_v17 = vmul.f32 %v630_v12, %v711_v22 }
  0xf7   : > { %v632_v13 = vpop.eup %631 }
  0xf8   : > { %v634_v14 = vpop.eup %633  ;;  %v417_v16 = vmul.f32 %v632_v13, %v717_v33 }
  0xf9   : > { %v421_v18 = vmul.f32 %v634_v14, %v719_v34 }
  0xfa   : > { %v580_v19 = vpack.c.bf16 %v417_v16, %v416_v15 }
  0xfb   : > { %v590_v20 = vpack.c.bf16 %v421_v18, %v420_v17  ;;  %v636_v23 = vpop.eup %635 }
  0xfc   : > { %581 = vst [vmem:[%s194_s29] sm:$0xff] %v580_v19   ;;  %v638_v24 = vpop.eup %637  ;;  %v418_v27 = vmul.f32 %v636_v23, %v362_v45 }
  0xfd   : > { %598 = vst [vmem:[%s194_s29 + $0x10] sm:$0xff] %v590_v20   ;;  %v422_v28 = vmul.f32 %v638_v24, %v366_v46 }
  0xff   : > { %v640_v25 = vpop.eup %639 }
 0x100   : > { %v642_v26 = vpop.eup %641  ;;  %v419_v21 = vmul.f32 %v640_v25, %v363_v55 }
 0x101   : > { %v423_v29 = vmul.f32 %v642_v26, %v367_v56 }
 0x102   : > { %v585_v30 = vpack.c.bf16 %v419_v21, %v418_v27 }
 0x103   : > { %v595_v22 = vpack.c.bf16 %v423_v29, %v422_v28 }
 0x104   : > { %597 = vst [vmem:[%s194_s29 + $0x8] sm:$0xff] %v585_v30  }
 0x105   : > { %599 = vst [vmem:[%s194_s29 + $0x18] sm:$0xff] %v595_v22  }
 0x106 PF: > { %s13_s12 = sadd.s32 1, %s649_s12  }
 0x107   : > { %p10_p4 = scmp.ge.s32.totalorder %s13_s12, 4  }
 0x109   :  { %12 = sbr.rel (!%p10_p4) target bundleno = 1 (0x1), region = 65 }

// kernel: graph_res_block_embed_forward.7
= control target key start
LH: loop header
LB: loop body
LE: loop exit
PB: predicated region body
PF: predicated region fallthrough
CT: control target
= control target key end

     0   :  { %s2482_s21 = smov 0   ;;  %s2484_s22 = smov 0   ;;  %s3309_s0 = inlined_call_operand.vmem [shape: bf16[512,224], index: 0, kind: input, shape index: {}]   ;;  %s3310_s1 = inlined_call_operand.vmem [shape: bf16[224,64], index: 1, kind: input, shape index: {}]   ;;  %s3311_s2 = inlined_call_operand.vmem [shape: f32[2,64], index: 2, kind: input, shape index: {}]   ;;  %s3312_s3 = inlined_call_operand.vmem [shape: s32[512,1], index: 3, kind: input, shape index: {}]   ;;  %s3313_s4 = inlined_call_operand.vmem [shape: s32[1,512], index: 4, kind: input, shape index: {}]   ;;  %s3314_s5 = inlined_call_operand.vmem [shape: bf16[512,64], index: 5, kind: output, shape index: {0}]   ;;  %s3315_s6 = inlined_call_operand.vmem [shape: f32[2,2,128], index: 6, kind: output, shape index: {1}]  }
   0x1   :  { %s2486_s23 = smov 0  }
   0x2 LB: > { %s29_s24 = sadd.s32 1, %s2437_s22  ;;  %p1973_p0 = scmp.ge.s32.totalorder %s2441_s23, 1  ;;  %s2441_s23 = sphi %s2486_s23, %s17_s23   ;;  %s2437_s22 = sphi %s2484_s22, %s3317_s22   ;;  %s2433_s21 = sphi %s2482_s21, %s3316_s21  }
   0x3   : > { %p31_p1 = scmp.ge.s32.totalorder %s29_s24, 2  ;;  %p264_p2 = scmp.lt.s32.totalorder %s2441_s23, 3 }
   0x5   : > { %s3319_s24 = smov (%p31_p1, %s29_s24), 0  ;;  %p265_p3 = pnand %p1973_p0, %p264_p2 }
   0x6   : > { %s1974_s25 = sshll.u32 (!%p265_p3), %s2433_s21, 5  ;;  %s1979_s29 = sshll.u32 (!%p265_p3), %s2433_s21, 1 }
   0x7   : > { %268 = sbr.rel (%p265_p3) target bundleno = 805 (0x325), region = 40  ;;  %p314_p4 = scmp.lt.s32.totalorder (!%p265_p3), %s1974_s25, 63 }
   0x8   : > { %p331_p5 = scmp.lt.s32.totalorder (!%p265_p3), %s1979_s29, 3  ;;  %p344_p6 = scmp.lt.s32.totalorder (!%p265_p3), %s2433_s21, 1 }
   0xc   : > { %v2443_v0 = vmov 0   ;;  %v2508_v1 = vld [vmem:[%s3310_s1 + $0x38] sm:$0xff]   ;;  %s3321_s25 = smov (!%p314_p4, %s1974_s25), 63  ;;  %v2517_v2 = vld [vmem:[%s3310_s1 + $0x30] sm:$0xff]   ;;  %v2534_v5 = vld [vmem:[%s3310_s1 + $0x28] sm:$0xff]   ;;  %vm738_vm0 = vcmask 1041408  }
   0xd   : > { %2356 = vset.pattern.permute.xlu1 %v2443_v0  ;;  %2355 = vset.pattern.permute.xlu0 %v2443_v0  ;;  %s2148_s30 = sshll.u32 %s3321_s25, 3  ;;  %v2543_v8 = vld [vmem:[%s3310_s1 + $0x20] sm:$0xff]   ;;  %v2552_v11 = vld [vmem:[%s3310_s1 + $0x18] sm:$0xff]   ;;  %v2561_v14 = vld [vmem:[%s3310_s1 + $0x10] sm:$0xff]   ;;  %vm1195_vm1 = vcmask 785408   ;;  %vm641_vm2 = vcmask 15360  }
   0xe   : > { %2299 = vmatprep.subr.bf16.mxu1 %v2443_v0  ;;  %s2526_s9 = scalar_lea.vmem %s3312_s3, %s2148_s30  ;;  %v2570_v17 = vld [vmem:[%s3310_s1 + $0x8] sm:$0xff]   ;;  %s2577_s27 = scalar_lea.vmem %s3309_s0, %s2148_s30  ;;  %v640_v21 = vld [vmem:[%s3311_s2] sm:$0x3]  ;;  %v2619_v31 = vld [vmem:[%s3310_s1 + $0x58] sm:$0xff]  }
   0xf   : > { %2313 = vmatpush1.bf16.msra.mxu1 %v2508_v1  ;;  %v416_v3 = vld [vmem:[%s2526_s9 + $0x10] sm:$0xff]  ;;  %v414_v4 = vld [vmem:[%s2526_s9] sm:$0xff]  ;;  %v417_v6 = vld [vmem:[%s2526_s9 + $0x18] sm:$0xff]  ;;  %2249 = vmatprep.subr.msk.mxu0 %vm738_vm0, %v640_v21  ;;  %s3323_s29 = smov (!%p331_p5, %s1979_s29), 3  ;;  %s3325_s21 = smov (!%p344_p6, %s2433_s21), 1 }
  0x10   : > { %2300 = vmatprep.subr.bf16.mxu1 %v2443_v0  ;;  %455 = vperm.xlu1 %2356, %v416_v3   ;;  %v415_v7 = vld [vmem:[%s2526_s9 + $0x8] sm:$0xff]  ;;  %v418_v10 = vld [vmem:[%s2526_s9 + $0x20] sm:$0xff]  ;;  %v421_v12 = vld [vmem:[%s2526_s9 + $0x38] sm:$0xff]  ;;  %s333_s8 = scalar_lea.vmem %s3313_s4, %s3323_s29  ;;  %s1982_s10 = sshll.u32 %s3325_s21, 1 }
  0x11   : > { %449 = vperm.xlu0 %2355, %v414_v4   ;;  %v419_v9 = vld [vmem:[%s2526_s9 + $0x28] sm:$0xff]  ;;  %v420_v13 = vld [vmem:[%s2526_s9 + $0x30] sm:$0xff]  ;;  %v422_v16 = vld [vmem:[%s2526_s9 + $0x40] sm:$0xff]  ;;  %2250 = vmatpush3.msk.msra.mxu0 %vm738_vm0, %v640_v21  ;;  %s347_s13 = scalar_lea.vmem %s3315_s6, %s1982_s10 }
  0x12   : > { %v423_v15 = vld [vmem:[%s2526_s9 + $0x48] sm:$0xff]  ;;  %v425_v18 = vld [vmem:[%s2526_s9 + $0x58] sm:$0xff]  ;;  %v424_v19 = vld [vmem:[%s2526_s9 + $0x50] sm:$0xff]  ;;  %1244 = vmatprep.subr.bf16.mxu0 %v2443_v0 }
  0x13   : > { %2314 = vmatpush1.bf16.msra.mxu1 %v2517_v2  ;;  %v2373_v20 = vld [vmem:[%s2577_s27 + $0x74] ss:$8 sps:$4 sm:$0xff]   ;;  %v2590_v22 = vld [vmem:[%s3310_s1] sm:$0xff]   ;;  %v427_v23 = vld [vmem:[%s2526_s9 + $0x68] sm:$0xff] }
  0x14   : > { %2301 = vmatprep.subr.bf16.mxu1 %v2443_v0  ;;  %458 = vperm.xlu1 %2356, %v417_v6   ;;  %v426_v24 = vld [vmem:[%s2526_s9 + $0x60] sm:$0xff]  ;;  %v429_v25 = vld [vmem:[%s2526_s9 + $0x78] sm:$0xff]  ;;  %v2601_v26 = vld [vmem:[%s3310_s1 + $0x68] sm:$0xff]   ;;  %v446_v6 = vlaneseq }
  0x15   : > { %452 = vperm.xlu0 %2355, %v415_v7   ;;  %2101 = vmatprep.mubr.msk.bf16.mxu1 %vm1195_vm1, %v2373_v20  ;;  %v428_v27 = vld [vmem:[%s2526_s9 + $0x70] sm:$0xff]  ;;  %v2609_v28 = vld [vmem:[%s3310_s1 + $0x60] sm:$0xff]   ;;  %v431_v29 = vld [vmem:[%s2526_s9 + $0x88] sm:$0xff] }
  0x16   : > { %v430_v30 = vld [vmem:[%s2526_s9 + $0x80] sm:$0xff]  ;;  %v433_v32 = vld [vmem:[%s2526_s9 + $0x98] sm:$0xff]  ;;  %v432_v33 = vld [vmem:[%s2526_s9 + $0x90] sm:$0xff]  ;;  %v2684_v7 = vand.u32 127, %v446_v6 }
  0x17   : > { %2315 = vmatpush1.bf16.msra.mxu1 %v2534_v5  ;;  %v2628_v34 = vld [vmem:[%s3310_s1 + $0x50] sm:$0xff]   ;;  %v435_v35 = vld [vmem:[%s2526_s9 + $0xa8] sm:$0xff]  ;;  %v434_v36 = vld [vmem:[%s2526_s9 + $0xa0] sm:$0xff] }
  0x18   : > { %2302 = vmatprep.subr.bf16.mxu1 %v2443_v0  ;;  %464 = vperm.xlu1 %2356, %v419_v9   ;;  %v2637_v37 = vld [vmem:[%s3310_s1 + $0x48] sm:$0xff]   ;;  %v437_v38 = vld [vmem:[%s2526_s9 + $0xb8] sm:$0xff]  ;;  %v436_v39 = vld [vmem:[%s2526_s9 + $0xb0] sm:$0xff] }
  0x19   : > { %461 = vperm.xlu0 %2355, %v418_v10   ;;  %v2646_v40 = vld [vmem:[%s3310_s1 + $0x40] sm:$0xff]   ;;  %v439_v41 = vld [vmem:[%s2526_s9 + $0xc8] sm:$0xff]  ;;  %v2371_v43 = vld [vmem:[%s2577_s27 + $0x70] ss:$8 sps:$4 sm:$0xff]  }
  0x1a   : > { %v438_v42 = vld [vmem:[%s2526_s9 + $0xc0] sm:$0xff]  ;;  %v441_v45 = vld [vmem:[%s2526_s9 + $0xd8] sm:$0xff]  ;;  %v440_v46 = vld [vmem:[%s2526_s9 + $0xd0] sm:$0xff] }
  0x1b   : > { %2316 = vmatpush1.bf16.msra.mxu1 %v2543_v8  ;;  %v2374_v44 = vld [vmem:[%s2577_s27 + $0x84] ss:$8 sps:$4 sm:$0xff]   ;;  %v2376_v49 = vld [vmem:[%s2577_s27 + $0x80] ss:$8 sps:$4 sm:$0xff]   ;;  %v2377_v50 = vld [vmem:[%s2577_s27 + $0x94] ss:$8 sps:$4 sm:$0xff]  }
  0x1c   : > { %2303 = vmatprep.subr.bf16.mxu1 %v2443_v0  ;;  %470 = vperm.xlu1 %2356, %v421_v12   ;;  %v443_v47 = vld [vmem:[%s2526_s9 + $0xe8] sm:$0xff]  ;;  %v442_v48 = vld [vmem:[%s2526_s9 + $0xe0] sm:$0xff]  ;;  %v445_v51 = vld [vmem:[%s2526_s9 + $0xf8] sm:$0xff]  ;;  %v2444_v12 = vmov 0.0  }
  0x1d   : > { %467 = vperm.xlu0 %2355, %v420_v13   ;;  %v444_v52 = vld [vmem:[%s2526_s9 + $0xf0] sm:$0xff]  ;;  %v2380_v54 = vld [vmem:[%s2577_s27 + $0xa4] ss:$8 sps:$4 sm:$0xff]   ;;  %v2382_v55 = vld [vmem:[%s2577_s27 + $0xa0] ss:$8 sps:$4 sm:$0xff]   ;;  %s1981_s9 = sshll.u32 %s3321_s25, 2 }
  0x1e   : > { %v2379_v53 = vld [vmem:[%s2577_s27 + $0x90] ss:$8 sps:$4 sm:$0xff]   ;;  %v2383_v56 = vld [vmem:[%s2577_s27 + $0xb4] ss:$8 sps:$4 sm:$0xff]   ;;  %v2386_v58 = vld [vmem:[%s2577_s27 + $0xc4] ss:$8 sps:$4 sm:$0xff]   ;;  %s2894_s28 = scalar_lea.vmem %s3314_s5, %s1981_s9 }
  0x1f   : > { %2317 = vmatpush1.bf16.msra.mxu1 %v2552_v11  ;;  %v2385_v57 = vld [vmem:[%s2577_s27 + $0xb0] ss:$8 sps:$4 sm:$0xff]   ;;  %v2388_v59 = vld [vmem:[%s2577_s27 + $0xc0] ss:$8 sps:$4 sm:$0xff]   ;;  %v2389_v60 = vld [vmem:[%s2577_s27 + $0xd4] ss:$8 sps:$4 sm:$0xff]  }
  0x20   : > { %2304 = vmatprep.subr.bf16.mxu1 %v2443_v0  ;;  %476 = vperm.xlu1 %2356, %v423_v15   ;;  %v2391_v61 = vld [vmem:[%s2577_s27 + $0xd0] ss:$8 sps:$4 sm:$0xff]   ;;  %v2392_v62 = vld [vmem:[%s2577_s27 + $0xe4] ss:$8 sps:$4 sm:$0xff]   ;;  %v2394_v63 = vld [vmem:[%s2577_s27 + $0xe0] ss:$8 sps:$4 sm:$0xff]  }
  0x21   : > { %473 = vperm.xlu0 %2355, %v422_v16   ;;  %v2395_v3 = vld [vmem:[%s2577_s27 + $0xf4] ss:$8 sps:$4 sm:$0xff]   ;;  %v2397_v4 = vld [vmem:[%s2577_s27 + $0xf0] ss:$8 sps:$4 sm:$0xff]   ;;  %s2445_s25 = smov 64   ;;  %353 = vst [vmem:[%s347_s13] sm:$0x3] %v2444_v12 }
  0x23   : > { %2318 = vmatpush1.bf16.msra.mxu1 %v2561_v14 }
  0x24   : > { %2305 = vmatprep.subr.bf16.mxu1 %v2443_v0  ;;  %482 = vperm.xlu1 %2356, %v425_v18  }
  0x25   : > { %479 = vperm.xlu0 %2355, %v424_v19  }
  0x27   : > { %2319 = vmatpush1.bf16.msra.mxu1 %v2570_v17 }
  0x28   : > { %2306 = vmatprep.subr.bf16.mxu1 %v2443_v0  ;;  %488 = vperm.xlu1 %2356, %v427_v23  }
  0x29   : > { %485 = vperm.xlu0 %2355, %v426_v24  }
  0x2b   : > { %2320 = vmatpush1.bf16.msra.mxu1 %v2590_v22 }
  0x2c   : > { %2307 = vmatprep.subr.bf16.mxu1 %v2443_v0  ;;  %494 = vperm.xlu1 %2356, %v429_v25  }
  0x2d   : > { %491 = vperm.xlu0 %2355, %v428_v27  }
  0x2f   : > { %2321 = vmatpush2.bf16.msra.mxu1 %v2601_v26 }
  0x30   : > { %2308 = vmatprep.subr.bf16.mxu1 %v2443_v0  ;;  %500 = vperm.xlu1 %2356, %v431_v29  }
  0x31   : > { %497 = vperm.xlu0 %2355, %v430_v30  }
  0x33   : > { %2322 = vmatpush2.bf16.msra.mxu1 %v2609_v28 }
  0x34   : > { %2309 = vmatprep.subr.bf16.mxu1 %v2443_v0  ;;  %506 = vperm.xlu1 %2356, %v433_v32  }
  0x35   : > { %503 = vperm.xlu0 %2355, %v432_v33  }
  0x37   : > { %2323 = vmatpush2.bf16.msra.mxu1 %v2619_v31 }
  0x38   : > { %2310 = vmatprep.subr.bf16.mxu1 %v2443_v0  ;;  %512 = vperm.xlu1 %2356, %v435_v35  }
  0x39   : > { %509 = vperm.xlu0 %2355, %v434_v36  }
  0x3b   : > { %2324 = vmatpush2.bf16.msra.mxu1 %v2628_v34 }
  0x3c   : > { %2311 = vmatprep.subr.bf16.mxu1 %v2443_v0  ;;  %518 = vperm.xlu1 %2356, %v437_v38  }
  0x3d   : > { %515 = vperm.xlu0 %2355, %v436_v39  }
  0x3f   : > { %2325 = vmatpush2.bf16.msra.mxu1 %v2637_v37 }
  0x40   : > { %2312 = vmatprep.subr.bf16.mxu1 %v2443_v0  ;;  %524 = vperm.xlu1 %2356, %v439_v41  }
  0x41   : > { %521 = vperm.xlu0 %2355, %v438_v42  }
  0x43   : > { %2326 = vmatpush2.bf16.msra.mxu1 %v2646_v40 }
  0x44   : > { %530 = vperm.xlu1 %2356, %v441_v45  }
  0x45   : > { %527 = vperm.xlu0 %2355, %v440_v46  }
  0x46   : > { %1333 = vmatmul.mubr.bf16.vlgmr.msra.gmra.mxu1 %v2371_v43 }
  0x47   : > { %2102 = vmatprep.mubr.msk.bf16.mxu1 %vm1195_vm1, %v2374_v44 }
  0x48   : > { %536 = vperm.xlu1 %2356, %v443_v47  }
  0x49   : > { %533 = vperm.xlu0 %2355, %v442_v48  }
  0x4c   : > { %542 = vperm.xlu1 %2356, %v445_v51  }
  0x4d   : > { %539 = vperm.xlu0 %2355, %v444_v52  }
  0x4e   : > { %1341 = vmatmul.mubr.bf16.gmra.mxu1 %v2376_v49 }
  0x4f   : > { %2103 = vmatprep.mubr.msk.bf16.mxu1 %vm1195_vm1, %v2377_v50 }
  0x56   : > { %1349 = vmatmul.mubr.bf16.gmra.mxu1 %v2379_v53 }
  0x57   : > { %2104 = vmatprep.mubr.msk.bf16.mxu1 %vm1195_vm1, %v2380_v54 }
  0x5e   : > { %1357 = vmatmul.mubr.bf16.gmra.mxu1 %v2382_v55 }
  0x5f   : > { %2105 = vmatprep.mubr.msk.bf16.mxu1 %vm1195_vm1, %v2383_v56 }
  0x66   : > { %1365 = vmatmul.mubr.bf16.gmra.mxu1 %v2385_v57 }
  0x67   : > { %2106 = vmatprep.mubr.msk.bf16.mxu1 %vm1195_vm1, %v2386_v58 }
  0x6e   : > { %1373 = vmatmul.mubr.bf16.gmra.mxu1 %v2388_v59 }
  0x6f   : > { %2107 = vmatprep.mubr.msk.bf16.mxu1 %vm1195_vm1, %v2389_v60 }
  0x76   : > { %1381 = vmatmul.mubr.bf16.gmra.mxu1 %v2391_v61 }
  0x77   : > { %2108 = vmatprep.mubr.msk.bf16.mxu1 %vm1195_vm1, %v2392_v62 }
  0x7e   : > { %1389 = vmatmul.mubr.bf16.gmra.mxu1 %v2394_v63 }
  0x7f   : > { %2109 = vmatprep.mubr.msk.bf16.mxu1 %vm1195_vm1, %v2395_v3 }
  0x86   : > { %1397 = vmatmul.mubr.bf16.gmra.mxu1 %v2397_v4 }
  0x8b   : > { %v456_v9 = vpop.permute.xlu1 %455 }
  0x8c   : > { %v450_v10 = vpop.permute.xlu0 %449  ;;  %vm546_vm4 = vcmp.eq.s32.totalorder %v456_v9, %v2684_v7 }
  0x8d   : > { %vm544_vm3 = vcmp.eq.s32.totalorder %v450_v10, %v2684_v7  ;;  %v1985_v18 = vsel %vm546_vm4, 1.0, %v2444_v12 }
  0x8e   : > { %v1983_v13 = vsel %vm544_vm3, 1.0, %v2444_v12 }
  0x8f   : > { %2251 = vmatprep.mubr.msk.f32.mxu0 %vm641_vm2, %v1983_v13  ;;  %v459_v15 = vpop.permute.xlu1 %458 }
  0x90   : > { %v453_v16 = vpop.permute.xlu0 %452  ;;  %vm547_vm6 = vcmp.eq.s32.totalorder %v459_v15, %v2684_v7  ;;  %v2400_v15 = vld [vmem:[%s2577_s27 + $0x4] ss:$8 sps:$4 sm:$0xff]  }
  0x91   : > { %vm545_vm5 = vcmp.eq.s32.totalorder %v453_v16, %v2684_v7  ;;  %v1986_v23 = vsel %vm547_vm6, 1.0, %v2444_v12 }
  0x92   : > { %v1984_v19 = vsel %vm545_vm5, 1.0, %v2444_v12 }
  0x93   : > { %2252 = vmatmul.mubr.msk.f32.vlgmr.msra.gmra.mxu0 %vm641_vm2, %v1984_v19  ;;  %v465_v20 = vpop.permute.xlu1 %464  ;;  %v2404_v19 = vld [vmem:[%s2577_s27 + $0x24] ss:$8 sps:$4 sm:$0xff]  }
  0x94   : > { %2254 = vmatprep.mubr.msk.f32.mxu0 %vm641_vm2, %v1985_v18  ;;  %v462_v21 = vpop.permute.xlu0 %461  ;;  %1245 = vmatpush1.bf16.msra.mxu0 %v2508_v1  ;;  %vm549_vm8 = vcmp.eq.s32.totalorder %v465_v20, %v2684_v7  ;;  %v2401_v18 = vld [vmem:[%s2577_s27 + $0x14] ss:$8 sps:$4 sm:$0xff]   ;;  %v2406_v20 = vld [vmem:[%s2577_s27 + $0x20] ss:$8 sps:$4 sm:$0xff]  }
  0x95   : > { %vm548_vm7 = vcmp.eq.s32.totalorder %v462_v21, %v2684_v7  ;;  %1246 = vmatprep.subr.bf16.mxu0 %v2443_v0  ;;  %v1988_v1 = vsel %vm549_vm8, 1.0, %v2444_v12  ;;  %v2407_v21 = vld [vmem:[%s2577_s27 + $0x34] ss:$8 sps:$4 sm:$0xff]  }
  0x96   : > { %v1987_v24 = vsel %vm548_vm7, 1.0, %v2444_v12 }
  0x97   : > { %2255 = vmatmul.mubr.msk.f32.gmra.mxu0 %vm641_vm2, %v1986_v23  ;;  %v471_v25 = vpop.permute.xlu1 %470  ;;  %v2409_v23 = vld [vmem:[%s2577_s27 + $0x30] ss:$8 sps:$4 sm:$0xff]  }
  0x98   : > { %2257 = vmatprep.mubr.msk.f32.mxu0 %vm641_vm2, %v1987_v24  ;;  %v468_v27 = vpop.permute.xlu0 %467  ;;  %1247 = vmatpush1.bf16.msra.mxu0 %v2517_v2  ;;  %vm551_vm10 = vcmp.eq.s32.totalorder %v471_v25, %v2684_v7  ;;  %v2410_v24 = vld [vmem:[%s2577_s27 + $0x44] ss:$8 sps:$4 sm:$0xff]   ;;  %v2412_v25 = vld [vmem:[%s2577_s27 + $0x40] ss:$8 sps:$4 sm:$0xff]  }
  0x99   : > { %vm550_vm9 = vcmp.eq.s32.totalorder %v468_v27, %v2684_v7  ;;  %1248 = vmatprep.subr.bf16.mxu0 %v2443_v0  ;;  %v1990_v2 = vsel %vm551_vm10, 1.0, %v2444_v12  ;;  %v2413_v27 = vld [vmem:[%s2577_s27 + $0x54] ss:$8 sps:$4 sm:$0xff]  }
  0x9a   : > { %v1989_v29 = vsel %vm550_vm9, 1.0, %v2444_v12 }
  0x9b   : > { %2258 = vmatmul.mubr.msk.f32.gmra.mxu0 %vm641_vm2, %v1988_v1  ;;  %v477_v30 = vpop.permute.xlu1 %476  ;;  %v2415_v1 = vld [vmem:[%s2577_s27 + $0x50] ss:$8 sps:$4 sm:$0xff]  }
  0x9c   : > { %2260 = vmatprep.mubr.msk.f32.mxu0 %vm641_vm2, %v1989_v29  ;;  %v474_v32 = vpop.permute.xlu0 %473  ;;  %1249 = vmatpush1.bf16.msra.mxu0 %v2534_v5  ;;  %vm553_vm12 = vcmp.eq.s32.totalorder %v477_v30, %v2684_v7  ;;  %v2416_v29 = vld [vmem:[%s2577_s27 + $0x64] ss:$8 sps:$4 sm:$0xff]   ;;  %v2418_v30 = vld [vmem:[%s2577_s27 + $0x60] ss:$8 sps:$4 sm:$0xff]  }
  0x9d   : > { %vm552_vm11 = vcmp.eq.s32.totalorder %v474_v32, %v2684_v7  ;;  %1250 = vmatprep.subr.bf16.mxu0 %v2443_v0  ;;  %v1992_v5 = vsel %vm553_vm12, 1.0, %v2444_v12 }
  0x9e   : > { %v1991_v33 = vsel %vm552_vm11, 1.0, %v2444_v12 }
  0x9f   : > { %2261 = vmatmul.mubr.msk.f32.gmra.mxu0 %vm641_vm2, %v1990_v2  ;;  %v483_v35 = vpop.permute.xlu1 %482 }
  0xa0   : > { %2263 = vmatprep.mubr.msk.f32.mxu0 %vm641_vm2, %v1991_v33  ;;  %v480_v36 = vpop.permute.xlu0 %479  ;;  %1251 = vmatpush1.bf16.msra.mxu0 %v2543_v8  ;;  %vm555_vm14 = vcmp.eq.s32.totalorder %v483_v35, %v2684_v7 }
  0xa1   : > { %vm554_vm13 = vcmp.eq.s32.totalorder %v480_v36, %v2684_v7  ;;  %1252 = vmatprep.subr.bf16.mxu0 %v2443_v0  ;;  %v1994_v8 = vsel %vm555_vm14, 1.0, %v2444_v12 }
  0xa2   : > { %v1993_v38 = vsel %vm554_vm13, 1.0, %v2444_v12 }
  0xa3   : > { %2264 = vmatmul.mubr.msk.f32.gmra.mxu0 %vm641_vm2, %v1992_v5  ;;  %v489_v39 = vpop.permute.xlu1 %488 }
  0xa4   : > { %2266 = vmatprep.mubr.msk.f32.mxu0 %vm641_vm2, %v1993_v38  ;;  %v486_v41 = vpop.permute.xlu0 %485  ;;  %1253 = vmatpush1.bf16.msra.mxu0 %v2552_v11  ;;  %vm557_vm0 = vcmp.eq.s32.totalorder %v489_v39, %v2684_v7 }
  0xa5   : > { %vm556_vm15 = vcmp.eq.s32.totalorder %v486_v41, %v2684_v7  ;;  %1254 = vmatprep.subr.bf16.mxu0 %v2443_v0  ;;  %v1996_v11 = vsel %vm557_vm0, 1.0, %v2444_v12 }
  0xa6   : > { %v1995_v42 = vsel %vm556_vm15, 1.0, %v2444_v12 }
  0xa7   : > { %2267 = vmatmul.mubr.msk.f32.gmra.mxu0 %vm641_vm2, %v1994_v8  ;;  %v495_v43 = vpop.permute.xlu1 %494 }
  0xa8   : > { %2269 = vmatprep.mubr.msk.f32.mxu0 %vm641_vm2, %v1995_v42  ;;  %v492_v44 = vpop.permute.xlu0 %491  ;;  %1255 = vmatpush1.bf16.msra.mxu0 %v2561_v14  ;;  %vm559_vm4 = vcmp.eq.s32.totalorder %v495_v43, %v2684_v7 }
  0xa9   : > { %vm558_vm3 = vcmp.eq.s32.totalorder %v492_v44, %v2684_v7  ;;  %1256 = vmatprep.subr.bf16.mxu0 %v2443_v0  ;;  %v1998_v14 = vsel %vm559_vm4, 1.0, %v2444_v12 }
  0xaa   : > { %v1997_v45 = vsel %vm558_vm3, 1.0, %v2444_v12 }
  0xab   : > { %2270 = vmatmul.mubr.msk.f32.gmra.mxu0 %vm641_vm2, %v1996_v11  ;;  %v501_v46 = vpop.permute.xlu1 %500 }
  0xac   : > { %2272 = vmatprep.mubr.msk.f32.mxu0 %vm641_vm2, %v1997_v45  ;;  %v498_v47 = vpop.permute.xlu0 %497  ;;  %1257 = vmatpush1.bf16.msra.mxu0 %v2570_v17  ;;  %vm561_vm6 = vcmp.eq.s32.totalorder %v501_v46, %v2684_v7 }
  0xad   : > { %vm560_vm5 = vcmp.eq.s32.totalorder %v498_v47, %v2684_v7  ;;  %1258 = vmatprep.subr.bf16.mxu0 %v2443_v0  ;;  %v2000_v17 = vsel %vm561_vm6, 1.0, %v2444_v12 }
  0xae   : > { %v1999_v48 = vsel %vm560_vm5, 1.0, %v2444_v12 }
  0xaf   : > { %2273 = vmatmul.mubr.msk.f32.gmra.mxu0 %vm641_vm2, %v1998_v14  ;;  %v507_v49 = vpop.permute.xlu1 %506 }
  0xb0   : > { %2275 = vmatprep.mubr.msk.f32.mxu0 %vm641_vm2, %v1999_v48  ;;  %v504_v50 = vpop.permute.xlu0 %503  ;;  %1259 = vmatpush1.bf16.msra.mxu0 %v2590_v22  ;;  %vm563_vm8 = vcmp.eq.s32.totalorder %v507_v49, %v2684_v7 }
  0xb1   : > { %vm562_vm7 = vcmp.eq.s32.totalorder %v504_v50, %v2684_v7  ;;  %1264 = vmatprep.subr.bf16.mxu0 %v2443_v0  ;;  %v2002_v22 = vsel %vm563_vm8, 1.0, %v2444_v12  ;;  %vm1743_vm8 = vcmask 523264  }
  0xb2   : > { %v2001_v51 = vsel %vm562_vm7, 1.0, %v2444_v12 }
  0xb3   : > { %2276 = vmatmul.mubr.msk.f32.gmra.mxu0 %vm641_vm2, %v2000_v17  ;;  %v513_v52 = vpop.permute.xlu1 %512 }
  0xb4   : > { %2278 = vmatprep.mubr.msk.f32.mxu0 %vm641_vm2, %v2001_v51  ;;  %v510_v53 = vpop.permute.xlu0 %509  ;;  %1265 = vmatpush2.bf16.msra.mxu0 %v2601_v26  ;;  %vm565_vm10 = vcmp.eq.s32.totalorder %v513_v52, %v2684_v7 }
  0xb5   : > { %vm564_vm9 = vcmp.eq.s32.totalorder %v510_v53, %v2684_v7  ;;  %1266 = vmatprep.subr.bf16.mxu0 %v2443_v0  ;;  %v2004_v26 = vsel %vm565_vm10, 1.0, %v2444_v12 }
  0xb6   : > { %v2003_v54 = vsel %vm564_vm9, 1.0, %v2444_v12 }
  0xb7   : > { %2279 = vmatmul.mubr.msk.f32.gmra.mxu0 %vm641_vm2, %v2002_v22  ;;  %v519_v55 = vpop.permute.xlu1 %518 }
  0xb8   : > { %2281 = vmatprep.mubr.msk.f32.mxu0 %vm641_vm2, %v2003_v54  ;;  %v516_v56 = vpop.permute.xlu0 %515  ;;  %1267 = vmatpush2.bf16.msra.mxu0 %v2609_v28  ;;  %vm567_vm12 = vcmp.eq.s32.totalorder %v519_v55, %v2684_v7 }
  0xb9   : > { %vm566_vm11 = vcmp.eq.s32.totalorder %v516_v56, %v2684_v7  ;;  %1268 = vmatprep.subr.bf16.mxu0 %v2443_v0  ;;  %v2006_v28 = vsel %vm567_vm12, 1.0, %v2444_v12 }
  0xba   : > { %v2005_v57 = vsel %vm566_vm11, 1.0, %v2444_v12 }
  0xbb   : > { %2282 = vmatmul.mubr.msk.f32.gmra.mxu0 %vm641_vm2, %v2004_v26  ;;  %v525_v58 = vpop.permute.xlu1 %524 }
  0xbc   : > { %2284 = vmatprep.mubr.msk.f32.mxu0 %vm641_vm2, %v2005_v57  ;;  %v522_v59 = vpop.permute.xlu0 %521  ;;  %1269 = vmatpush2.bf16.msra.mxu0 %v2619_v31  ;;  %vm569_vm14 = vcmp.eq.s32.totalorder %v525_v58, %v2684_v7 }
  0xbd   : > { %vm568_vm13 = vcmp.eq.s32.totalorder %v522_v59, %v2684_v7  ;;  %1270 = vmatprep.subr.bf16.mxu0 %v2443_v0  ;;  %v2008_v31 = vsel %vm569_vm14, 1.0, %v2444_v12 }
  0xbe   : > { %v2007_v60 = vsel %vm568_vm13, 1.0, %v2444_v12 }
  0xbf   : > { %2285 = vmatmul.mubr.msk.f32.gmra.mxu0 %vm641_vm2, %v2006_v28  ;;  %v531_v61 = vpop.permute.xlu1 %530 }
  0xc0   : > { %2287 = vmatprep.mubr.msk.f32.mxu0 %vm641_vm2, %v2007_v60  ;;  %v528_v62 = vpop.permute.xlu0 %527  ;;  %1271 = vmatpush2.bf16.msra.mxu0 %v2628_v34  ;;  %vm571_vm0 = vcmp.eq.s32.totalorder %v531_v61, %v2684_v7 }
  0xc1   : > { %vm570_vm15 = vcmp.eq.s32.totalorder %v528_v62, %v2684_v7  ;;  %1272 = vmatprep.subr.bf16.mxu0 %v2443_v0  ;;  %v2010_v34 = vsel %vm571_vm0, 1.0, %v2444_v12 }
  0xc2   : > { %v2009_v63 = vsel %vm570_vm15, 1.0, %v2444_v12 }
  0xc3   : > { %2288 = vmatmul.mubr.msk.f32.gmra.mxu0 %vm641_vm2, %v2008_v31  ;;  %v537_v3 = vpop.permute.xlu1 %536 }
  0xc4   : > { %2290 = vmatprep.mubr.msk.f32.mxu0 %vm641_vm2, %v2009_v63  ;;  %v534_v4 = vpop.permute.xlu0 %533  ;;  %1273 = vmatpush2.bf16.msra.mxu0 %v2637_v37  ;;  %vm573_vm4 = vcmp.eq.s32.totalorder %v537_v3, %v2684_v7 }
  0xc5   : > { %vm572_vm3 = vcmp.eq.s32.totalorder %v534_v4, %v2684_v7  ;;  %1274 = vmatprep.subr.bf16.mxu0 %v2443_v0  ;;  %v2012_v0 = vsel %vm573_vm4, 1.0, %v2444_v12 }
  0xc6   : > { %v2011_v9 = vsel %vm572_vm3, 1.0, %v2444_v12 }
  0xc7   : > { %2291 = vmatmul.mubr.msk.f32.gmra.mxu0 %vm641_vm2, %v2010_v34  ;;  %v543_v10 = vpop.permute.xlu1 %542 }
  0xc8   : > { %2293 = vmatprep.mubr.msk.f32.mxu0 %vm641_vm2, %v2011_v9  ;;  %v540_v13 = vpop.permute.xlu0 %539  ;;  %1275 = vmatpush2.bf16.msra.mxu0 %v2646_v40  ;;  %vm575_vm6 = vcmp.eq.s32.totalorder %v543_v10, %v2684_v7  ;;  %v2398_v40 = vld [vmem:[%s2577_s27] ss:$8 sps:$4 sm:$0xff]  }
  0xc9   : > { %vm574_vm5 = vcmp.eq.s32.totalorder %v540_v13, %v2684_v7  ;;  %v2014_v16 = vsel %vm575_vm6, 1.0, %v2444_v12  ;;  %v2403_v7 = vld [vmem:[%s2577_s27 + $0x10] ss:$8 sps:$4 sm:$0xff]  }
  0xca   : > { %v2013_v37 = vsel %vm574_vm5, 1.0, %v2444_v12 }
  0xcb   : > { %2294 = vmatmul.mubr.msk.f32.gmra.mxu0 %vm641_vm2, %v2012_v0 }
  0xcc   : > { %2296 = vmatprep.mubr.msk.f32.mxu0 %vm641_vm2, %v2013_v37 }
  0xcf   : > { %2297 = vmatmul.mubr.msk.f32.gmra.mxu0 %vm641_vm2, %v2014_v16 }
  0xd0   : > { %2094 = vmatprep.mubr.msk.bf16.mxu0 %vm1195_vm1, %v2400_v15 }
  0xd3   : > { %1277 = vmatmul.mubr.bf16.vlgmr.msra.gmra.mxu0 %v2398_v40 }
  0xd4   : > { %2095 = vmatprep.mubr.msk.bf16.mxu0 %vm1195_vm1, %v2401_v18 }
  0xdb   : > { %1285 = vmatmul.mubr.bf16.gmra.mxu0 %v2403_v7 }
  0xdc   : > { %2096 = vmatprep.mubr.msk.bf16.mxu0 %vm1195_vm1, %v2404_v19 }
  0xe3   : > { %1293 = vmatmul.mubr.bf16.gmra.mxu0 %v2406_v20 }
  0xe4   : > { %2097 = vmatprep.mubr.msk.bf16.mxu0 %vm1195_vm1, %v2407_v21 }
  0xeb   : > { %1301 = vmatmul.mubr.bf16.gmra.mxu0 %v2409_v23 }
  0xec   : > { %2098 = vmatprep.mubr.msk.bf16.mxu0 %vm1195_vm1, %v2410_v24 }
  0xf3   : > { %1309 = vmatmul.mubr.bf16.gmra.mxu0 %v2412_v25 }
  0xf4   : > { %2099 = vmatprep.mubr.msk.bf16.mxu0 %vm1195_vm1, %v2413_v27 }
  0xfb   : > { %1317 = vmatmul.mubr.bf16.gmra.mxu0 %v2415_v1 }
  0xfc   : > { %2100 = vmatprep.mubr.msk.bf16.mxu0 %vm1195_vm1, %v2416_v29  ;;  %vm1533_vm1 = vcmask 519168  }
 0x103   : > { %1325 = vmatmul.mubr.bf16.gmra.mxu0 %v2418_v30 }
 0x106   : > { %v1334_v32 = vpop.f32.mrf.mxu1 }
 0x108   : > { %v1336_v2 = vpop.f32.mrf.mxu1 }
 0x10a   : > { %v1337_v33 = vpop.f32.mrf.mxu1 }
 0x10c   : > { %v1339_v35 = vpop.f32.mrf.mxu1 }
 0x10e   : > { %v2830_v36 = vpop.f32.mrf.mxu1 }
 0x110   : > { %v1344_v5 = vpop.f32.mrf.mxu1 }
 0x112   : > { %v1345_v38 = vpop.f32.mrf.mxu1 }
 0x114   : > { %v1347_v39 = vpop.f32.mrf.mxu1 }
 0x116   : > { %v2832_v41 = vpop.f32.mrf.mxu1 }
 0x118   : > { %v1352_v8 = vpop.f32.mrf.mxu1 }
 0x11a   : > { %v2834_v42 = vpop.f32.mrf.mxu1 }
 0x11c   : > { %v1355_v43 = vpop.f32.mrf.mxu1 }
 0x11e   : > { %v2836_v44 = vpop.f32.mrf.mxu1 }
 0x120   : > { %v1360_v11 = vpop.f32.mrf.mxu1 }
 0x122   : > { %v2838_v45 = vpop.f32.mrf.mxu1 }
 0x124   : > { %v1363_v46 = vpop.f32.mrf.mxu1 }
 0x126   : > { %v2840_v47 = vpop.f32.mrf.mxu1 }
 0x128   : > { %v1368_v14 = vpop.f32.mrf.mxu1 }
 0x12a   : > { %v2842_v48 = vpop.f32.mrf.mxu1 }
 0x12c   : > { %v1371_v49 = vpop.f32.mrf.mxu1 }
 0x12e   : > { %v2844_v50 = vpop.f32.mrf.mxu1 }
 0x130   : > { %v1376_v17 = vpop.f32.mrf.mxu1 }
 0x132   : > { %v2846_v51 = vpop.f32.mrf.mxu1 }
 0x134   : > { %v1379_v52 = vpop.f32.mrf.mxu1 }
 0x136   : > { %v2848_v53 = vpop.f32.mrf.mxu1 }
 0x138   : > { %v1384_v22 = vpop.f32.mrf.mxu1 }
 0x13a   : > { %v2850_v54 = vpop.f32.mrf.mxu1 }
 0x13c   : > { %v1387_v55 = vpop.f32.mrf.mxu1 }
 0x13e   : > { %v2852_v56 = vpop.f32.mrf.mxu1 }
 0x140   : > { %v1392_v26 = vpop.f32.mrf.mxu1 }
 0x142   : > { %v2854_v57 = vpop.f32.mrf.mxu1 }
 0x144   : > { %v1395_v58 = vpop.f32.mrf.mxu1 }
 0x146   : > { %v2856_v59 = vpop.f32.mrf.mxu1 }
 0x148   : > { %v1400_v28 = vpop.f32.mrf.mxu1 }
 0x14a   : > { %v2858_v60 = vpop.f32.mrf.mxu1 }
 0x14c   : > { %v1403_v61 = vpop.f32.mrf.mxu1 }
 0x153   : > { %v2860_v62 = vpop.f32.mrf.mxu0 }
 0x155   : > { %v2862_v31 = vpop.f32.mrf.mxu0 }
 0x157   : > { %v2864_v63 = vpop.f32.mrf.mxu0 }
 0x159   : > { %v2866_v3 = vpop.f32.mrf.mxu0 }
 0x15b   : > { %v2868_v4 = vpop.f32.mrf.mxu0 }
 0x15d   : > { %v2870_v34 = vpop.f32.mrf.mxu0 }
 0x15f   : > { %v2872_v9 = vpop.f32.mrf.mxu0 }
 0x161   : > { %v2874_v10 = vpop.f32.mrf.mxu0 }
 0x163   : > { %v2876_v13 = vpop.f32.mrf.mxu0 }
 0x165   : > { %v2878_v0 = vpop.f32.mrf.mxu0 }
 0x167   : > { %v2880_v37 = vpop.f32.mrf.mxu0 }
 0x169   : > { %v2882_v15 = vpop.f32.mrf.mxu0 }
 0x16b   : > { %v2884_v16 = vpop.f32.mrf.mxu0 }
 0x16d   : > { %v2886_v40 = vpop.f32.mrf.mxu0 }
 0x16f   : > { %v2274_v18 = vpop.f32.mrf.mxu0 }
 0x170   : > { %v2889_v7 = vadd.f32 %v2274_v18, %v1337_v33 }
 0x171   : > { %v878_v19 = vpop.f32.mrf.mxu0 }
 0x172   : > { %v2164_v20 = vpack.c.bf16 %v2889_v7, %v2889_v7  ;;  %v2898_v21 = vadd.f32 %v1334_v32, %v878_v19  ;;  %v1598_v23 = vmul.f32 %v2889_v7, %v2889_v7 }
 0x173   : > { %v2277_v24 = vpop.f32.mrf.mxu0 }
 0x174   : > { %1549 = vst.msk [vmem:[%s2894_s28 + $0x3c] sm:$0xf] %vm1533_vm1, %v2164_v20  ;;  %v2163_v25 = vpack.c.bf16 %v2898_v21, %v2898_v21  ;;  %v2906_v27 = vadd.f32 %v2277_v24, %v1345_v38  ;;  %1677 = vrot.lane.b32.xlu1 %v1598_v23, %s2445_s25  ;;  %v1597_v32 = vmul.f32 %v2898_v21, %v2898_v21 }
 0x175   : > { %v888_v1 = vpop.f32.mrf.mxu0 }
 0x176   : > { %1548 = vst.msk [vmem:[%s2894_s28 + $0x38] sm:$0xf] %vm1533_vm1, %v2163_v25  ;;  %v2166_v29 = vpack.c.bf16 %v2906_v27, %v2906_v27  ;;  %v2914_v30 = vadd.f32 %v2830_v36, %v888_v1 }
 0x177   : > { %v2280_v2 = vpop.f32.mrf.mxu0 }
 0x178   : > { %1551 = vst.msk [vmem:[%s2894_s28 + $0x44] sm:$0xf] %vm1533_vm1, %v2166_v29  ;;  %v2165_v33 = vpack.c.bf16 %v2914_v30, %v2914_v30  ;;  %v2923_v35 = vadd.f32 %v2280_v2, %v2834_v42  ;;  %1675 = vrot.lane.b32.xlu1 %v1597_v32, %s2445_s25 }
 0x179   : > { %v898_v5 = vpop.f32.mrf.mxu0 }
 0x17a   : > { %1550 = vst.msk [vmem:[%s2894_s28 + $0x40] sm:$0xf] %vm1533_vm1, %v2165_v33  ;;  %v2168_v36 = vpack.c.bf16 %v2923_v35, %v2923_v35  ;;  %v2931_v38 = vadd.f32 %v2832_v41, %v898_v5 }
 0x17b   : > { %v2283_v39 = vpop.f32.mrf.mxu0 }
 0x17c   : > { %1553 = vst.msk [vmem:[%s2894_s28 + $0x4c] sm:$0xf] %vm1533_vm1, %v2168_v36  ;;  %v2167_v8 = vpack.c.bf16 %v2931_v38, %v2931_v38  ;;  %v2938_v42 = vadd.f32 %v2283_v39, %v2838_v45 }
 0x17d   : > { %v908_v43 = vpop.f32.mrf.mxu0 }
 0x17e   : > { %1552 = vst.msk [vmem:[%s2894_s28 + $0x48] sm:$0xf] %vm1533_vm1, %v2167_v8  ;;  %v2170_v11 = vpack.c.bf16 %v2938_v42, %v2938_v42  ;;  %v2945_v46 = vadd.f32 %v2836_v44, %v908_v43 }
 0x17f   : > { %v2286_v41 = vpop.f32.mrf.mxu0 }
 0x180   : > { %1555 = vst.msk [vmem:[%s2894_s28 + $0x54] sm:$0xf] %vm1533_vm1, %v2170_v11  ;;  %v2169_v14 = vpack.c.bf16 %v2945_v46, %v2945_v46  ;;  %v2952_v49 = vadd.f32 %v2286_v41, %v2842_v48 }
 0x181   : > { %v918_v45 = vpop.f32.mrf.mxu0 }
 0x182   : > { %1554 = vst.msk [vmem:[%s2894_s28 + $0x50] sm:$0xf] %vm1533_vm1, %v2169_v14  ;;  %v2172_v17 = vpack.c.bf16 %v2952_v49, %v2952_v49  ;;  %v2959_v44 = vadd.f32 %v2840_v47, %v918_v45  ;;  %v1606_v52 = vmul.f32 %v2952_v49, %v2952_v49 }
 0x183   : > { %v2289_v22 = vpop.f32.mrf.mxu0 }
 0x184   : > { %1557 = vst.msk [vmem:[%s2894_s28 + $0x5c] sm:$0xf] %vm1533_vm1, %v2172_v17  ;;  %v2171_v48 = vpack.c.bf16 %v2959_v44, %v2959_v44  ;;  %v2968_v55 = vadd.f32 %v2289_v22, %v2846_v51  ;;  %1693 = vrot.lane.b32.xlu0 %v1606_v52, %s2445_s25 }
 0x185   : > { %v928_v26 = vpop.f32.mrf.mxu0 }
 0x186   : > { %1556 = vst.msk [vmem:[%s2894_s28 + $0x58] sm:$0xf] %vm1533_vm1, %v2171_v48  ;;  %v2174_v47 = vpack.c.bf16 %v2968_v55, %v2968_v55  ;;  %v2976_v58 = vadd.f32 %v2844_v50, %v928_v26  ;;  %v1608_v28 = vmul.f32 %v2968_v55, %v2968_v55 }
 0x187   : > { %v2292_v61 = vpop.f32.mrf.mxu0 }
 0x188   : > { %1559 = vst.msk [vmem:[%s2894_s28 + $0x64] sm:$0xf] %vm1533_vm1, %v2174_v47  ;;  %v2173_v51 = vpack.c.bf16 %v2976_v58, %v2976_v58  ;;  %v2985_v18 = vadd.f32 %v2292_v61, %v2850_v54  ;;  %1697 = vrot.lane.b32.xlu0 %v1608_v28, %s2445_s25  ;;  %v1607_v23 = vmul.f32 %v2976_v58, %v2976_v58 }
 0x189   : > { %v938_v19 = vpop.f32.mrf.mxu0 }
 0x18a   : > { %1558 = vst.msk [vmem:[%s2894_s28 + $0x60] sm:$0xf] %vm1533_vm1, %v2173_v51  ;;  %v2176_v50 = vpack.c.bf16 %v2985_v18, %v2985_v18  ;;  %v2993_v20 = vadd.f32 %v2848_v53, %v938_v19  ;;  %v1610_v32 = vmul.f32 %v2985_v18, %v2985_v18 }
 0x18b   : > { %v2295_v24 = vpop.f32.mrf.mxu0 }
 0x18c   : > { %1561 = vst.msk [vmem:[%s2894_s28 + $0x6c] sm:$0xf] %vm1533_vm1, %v2176_v50  ;;  %v2175_v54 = vpack.c.bf16 %v2993_v20, %v2993_v20  ;;  %v3002_v25 = vadd.f32 %v2295_v24, %v2854_v57  ;;  %1695 = vrot.lane.b32.xlu0 %v1607_v23, %s2445_s25  ;;  %v1609_v39 = vmul.f32 %v2993_v20, %v2993_v20 }
 0x18d   : > { %v948_v1 = vpop.f32.mrf.mxu0 }
 0x18e   : > { %1560 = vst.msk [vmem:[%s2894_s28 + $0x68] sm:$0xf] %vm1533_vm1, %v2175_v54  ;;  %v2178_v53 = vpack.c.bf16 %v3002_v25, %v3002_v25  ;;  %v3010_v29 = vadd.f32 %v2852_v56, %v948_v1  ;;  %v1612_v41 = vmul.f32 %v3002_v25, %v3002_v25  ;;  %v1605_v54 = vmul.f32 %v2959_v44, %v2959_v44 }
 0x18f   : > { %v2298_v2 = vpop.f32.mrf.mxu0 }
 0x190   : > { %1563 = vst.msk [vmem:[%s2894_s28 + $0x74] sm:$0xf] %vm1533_vm1, %v2178_v53  ;;  %v2177_v57 = vpack.c.bf16 %v3010_v29, %v3010_v29  ;;  %v3019_v33 = vadd.f32 %v2298_v2, %v2858_v60  ;;  %1701 = vrot.lane.b32.xlu0 %v1610_v32, %s2445_s25  ;;  %v1611_v52 = vmul.f32 %v3010_v29, %v3010_v29 }
 0x191   : > { %v958_v5 = vpop.f32.mrf.mxu0  ;;  %v1604_v2 = vmul.f32 %v2938_v42, %v2938_v42 }
 0x192   : > { %1562 = vst.msk [vmem:[%s2894_s28 + $0x70] sm:$0xf] %vm1533_vm1, %v2177_v57  ;;  %v2180_v56 = vpack.c.bf16 %v3019_v33, %v3019_v33  ;;  %v3027_v36 = vadd.f32 %v2856_v59, %v958_v5  ;;  %v1614_v47 = vmul.f32 %v3019_v33, %v3019_v33 }
 0x193   : > { %v1278_v8 = vpop.f32.mrf.mxu0 }
 0x194   : > { %1565 = vst.msk [vmem:[%s2894_s28 + $0x7c] sm:$0xf] %vm1533_vm1, %v2180_v56  ;;  %v2179_v60 = vpack.c.bf16 %v3027_v36, %v3027_v36  ;;  %v3036_v43 = vadd.f32 %v1278_v8, %v2862_v31  ;;  %1699 = vrot.lane.b32.xlu0 %v1609_v39, %s2445_s25  ;;  %v1613_v19 = vmul.f32 %v3027_v36, %v3027_v36 }
 0x195   : > { %v1280_v11 = vpop.f32.mrf.mxu0  ;;  %v1603_v39 = vmul.f32 %v2945_v46, %v2945_v46 }
 0x196   : > { %1564 = vst.msk [vmem:[%s2894_s28 + $0x78] sm:$0xf] %vm1533_vm1, %v2179_v60  ;;  %v2149_v59 = vpack.c.bf16 %v3036_v43, %v3036_v43 }
 0x197   : > { %v1281_v14 = vpop.f32.mrf.mxu0 }
 0x198   : > { %1534 = vst.msk [vmem:[%s2894_s28] sm:$0xf] %vm1533_vm1, %v2149_v59  ;;  %v3048_v45 = vadd.f32 %v2860_v62, %v1281_v14  ;;  %1705 = vrot.lane.b32.xlu0 %v1612_v41, %s2445_s25  ;;  %v1602_v59 = vmul.f32 %v2923_v35, %v2923_v35 }
 0x199   : > { %v1283_v31 = vpop.f32.mrf.mxu0 }
 0x19a   : > { %v2150_v17 = vpack.c.bf16 %v3048_v45, %v3048_v45 }
 0x19b   : > { %v1286_v22 = vpop.f32.mrf.mxu0 }
 0x19c   : > { %1535 = vst.msk [vmem:[%s2894_s28 + $0x4] sm:$0xf] %vm1533_vm1, %v2150_v17  ;;  %v3058_v48 = vadd.f32 %v1286_v22, %v2866_v3  ;;  %1703 = vrot.lane.b32.xlu0 %v1611_v52, %s2445_s25  ;;  %v1601_v52 = vmul.f32 %v2931_v38, %v2931_v38 }
 0x19d   : > { %v1288_v62 = vpop.f32.mrf.mxu0 }
 0x19e   : > { %v2151_v26 = vpack.c.bf16 %v3058_v48, %v3058_v48 }
 0x19f   : > { %v1289_v28 = vpop.f32.mrf.mxu0 }
 0x1a0   : > { %1536 = vst.msk [vmem:[%s2894_s28 + $0x8] sm:$0xf] %vm1533_vm1, %v2151_v26  ;;  %v3068_v61 = vadd.f32 %v2864_v63, %v1289_v28  ;;  %1709 = vrot.lane.b32.xlu0 %v1614_v47, %s2445_s25  ;;  %v1600_v28 = vmul.f32 %v2906_v27, %v2906_v27 }
 0x1a1   : > { %v1291_v3 = vpop.f32.mrf.mxu0 }
 0x1a2   : > { %v2152_v51 = vpack.c.bf16 %v3068_v61, %v3068_v61 }
 0x1a3   : > { %v1294_v50 = vpop.f32.mrf.mxu0 }
 0x1a4   : > { %1537 = vst.msk [vmem:[%s2894_s28 + $0xc] sm:$0xf] %vm1533_vm1, %v2152_v51  ;;  %v3078_v23 = vadd.f32 %v1294_v50, %v2870_v34  ;;  %1707 = vrot.lane.b32.xlu0 %v1613_v19, %s2445_s25 }
 0x1a5   : > { %v1296_v63 = vpop.f32.mrf.mxu0 }
 0x1a6   : > { %v2153_v24 = vpack.c.bf16 %v3078_v23, %v3078_v23  ;;  %v1599_v63 = vmul.f32 %v2914_v30, %v2914_v30 }
 0x1a7   : > { %v1297_v1 = vpop.f32.mrf.mxu0 }
 0x1a8   : > { %1538 = vst.msk [vmem:[%s2894_s28 + $0x10] sm:$0xf] %vm1533_vm1, %v2153_v24  ;;  %v3088_v53 = vadd.f32 %v2868_v4, %v1297_v1  ;;  %1691 = vrot.lane.b32.xlu0 %v1605_v54, %s2445_s25 }
 0x1a9   : > { %v1299_v34 = vpop.f32.mrf.mxu0 }
 0x1aa   : > { %v2154_v32 = vpack.c.bf16 %v3088_v53, %v3088_v53 }
 0x1ab   : > { %v1302_v57 = vpop.f32.mrf.mxu0 }
 0x1ac   : > { %1539 = vst.msk [vmem:[%s2894_s28 + $0x14] sm:$0xf] %vm1533_vm1, %v2154_v32  ;;  %v3098_v5 = vadd.f32 %v1302_v57, %v2874_v10  ;;  %1689 = vrot.lane.b32.xlu0 %v1604_v2, %s2445_s25 }
 0x1ad   : > { %v1304_v4 = vpop.f32.mrf.mxu0 }
 0x1ae   : > { %v2155_v56 = vpack.c.bf16 %v3098_v5, %v3098_v5 }
 0x1af   : > { %v1305_v8 = vpop.f32.mrf.mxu0 }
 0x1b0   : > { %1540 = vst.msk [vmem:[%s2894_s28 + $0x18] sm:$0xf] %vm1533_vm1, %v2155_v56  ;;  %v3108_v60 = vadd.f32 %v2872_v9, %v1305_v8  ;;  %1687 = vrot.lane.b32.xlu0 %v1603_v39, %s2445_s25 }
 0x1b1   : > { %v1307_v10 = vpop.f32.mrf.mxu0 }
 0x1b2   : > { %v2156_v11 = vpack.c.bf16 %v3108_v60, %v3108_v60  ;;  %v1590_v41 = vmul.f32 %v3108_v60, %v3108_v60 }
 0x1b3   : > { %v1310_v14 = vpop.f32.mrf.mxu0 }
 0x1b4   : > { %1541 = vst.msk [vmem:[%s2894_s28 + $0x1c] sm:$0xf] %vm1533_vm1, %v2156_v11  ;;  %v3120_v31 = vadd.f32 %v1310_v14, %v2878_v0  ;;  %1685 = vrot.lane.b32.xlu0 %v1602_v59, %s2445_s25  ;;  %1661 = vrot.lane.b32.xlu1 %v1590_v41, %s2445_s25  ;;  %v1589_v59 = vmul.f32 %v3098_v5, %v3098_v5  ;;  %v3198_v41 = vshrl.u32 %v446_v6, 7 }
 0x1b5   : > { %v1312_v9 = vpop.f32.mrf.mxu0  ;;  %v1587_v14 = vmul.f32 %v3078_v23, %v3078_v23 }
 0x1b6   : > { %v2157_v17 = vpack.c.bf16 %v3120_v31, %v3120_v31  ;;  %v1591_v22 = vmul.f32 %v3120_v31, %v3120_v31  ;;  %v1575_v9 = vsub.s32 1, %v3198_v41 }
 0x1b7   : > { %v1313_v62 = vpop.f32.mrf.mxu0 }
 0x1b8   : > { %1542 = vst.msk [vmem:[%s2894_s28 + $0x20] sm:$0xf] %vm1533_vm1, %v2157_v17  ;;  %v3133_v0 = vadd.f32 %v2876_v13, %v1313_v62  ;;  %1683 = vrot.lane.b32.xlu0 %v1601_v52, %s2445_s25  ;;  %1663 = vrot.lane.b32.xlu1 %v1591_v22, %s2445_s25  ;;  %v1566_v17 = vld [vmem:[%s333_s8] sm:$0x3]  ;;  %v1571_v52 = vsub.s32 0, %v3198_v41  ;;  %v1586_v62 = vmul.f32 %v3068_v61, %v3068_v61 }
 0x1b9   : > { %v1315_v26 = vpop.f32.mrf.mxu0  ;;  %v1576_v22 = vrot.slane %v1566_v17, %v1575_v9 }
 0x1ba   : > { %v2158_v47 = vpack.c.bf16 %v3133_v0, %v3133_v0  ;;  %v1592_v3 = vmul.f32 %v3133_v0, %v3133_v0  ;;  %v3210_v6 = vrot.slane %v1566_v17, %v1571_v52  ;;  %v2446_v26 = vmov 1.0  }
 0x1bb   : > { %v1318_v51 = vpop.f32.mrf.mxu0  ;;  %vm1578_vm2 = vcmp.eq.s32.totalorder %v1576_v22, %v3198_v41 }
 0x1bc   : > { %1543 = vst.msk [vmem:[%s2894_s28 + $0x24] sm:$0xf] %vm1533_vm1, %v2158_v47  ;;  %v3146_v13 = vadd.f32 %v1318_v51, %v2882_v15  ;;  %1681 = vrot.lane.b32.xlu0 %v1600_v28, %s2445_s25  ;;  %1665 = vrot.lane.b32.xlu1 %v1592_v3, %s2445_s25  ;;  %vm1577_vm7 = vcmp.eq.s32.totalorder %v3210_v6, %v3198_v41 }
 0x1bd   : > { %v1320_v19 = vpop.f32.mrf.mxu0  ;;  %2144 = vmatprep.mubr.msk.f32.mxu0 %vm1578_vm2, %v2446_v26  ;;  %v1585_v47 = vmul.f32 %v3058_v48, %v3058_v48  ;;  %v1584_v28 = vmul.f32 %v3048_v45, %v3048_v45  ;;  %v1583_v3 = vmul.f32 %v3036_v43, %v3036_v43 }
 0x1be   : > { %v2159_v50 = vpack.c.bf16 %v3146_v13, %v3146_v13  ;;  %v1593_v24 = vmul.f32 %v3146_v13, %v3146_v13 }
 0x1bf   : > { %v1321_v54 = vpop.f32.mrf.mxu0 }
 0x1c0   : > { %1544 = vst.msk [vmem:[%s2894_s28 + $0x28] sm:$0xf] %vm1533_vm1, %v2159_v50  ;;  %v3159_v15 = vadd.f32 %v2880_v37, %v1321_v54  ;;  %1679 = vrot.lane.b32.xlu0 %v1599_v63, %s2445_s25  ;;  %1667 = vrot.lane.b32.xlu1 %v1593_v24, %s2445_s25 }
 0x1c1   : > { %v1323_v1 = vpop.f32.mrf.mxu0 }
 0x1c2   : > { %v2160_v34 = vpack.c.bf16 %v3159_v15, %v3159_v15  ;;  %v1594_v32 = vmul.f32 %v3159_v15, %v3159_v15 }
 0x1c3   : > { %v1326_v2 = vpop.f32.mrf.mxu0 }
 0x1c4   : > { %1545 = vst.msk [vmem:[%s2894_s28 + $0x2c] sm:$0xf] %vm1533_vm1, %v2160_v34  ;;  %v3170_v57 = vadd.f32 %v1326_v2, %v2886_v40  ;;  %1669 = vrot.lane.b32.xlu1 %v1594_v32, %s2445_s25 }
 0x1c5   : > { %v1328_v37 = vpop.f32.mrf.mxu0 }
 0x1c6   : > { %v2161_v4 = vpack.c.bf16 %v3170_v57, %v3170_v57  ;;  %v1595_v56 = vmul.f32 %v3170_v57, %v3170_v57 }
 0x1c7   : > { %v1329_v39 = vpop.f32.mrf.mxu0 }
 0x1c8   : > { %1546 = vst.msk [vmem:[%s2894_s28 + $0x30] sm:$0xf] %vm1533_vm1, %v2161_v4  ;;  %v3180_v8 = vadd.f32 %v2884_v16, %v1329_v39  ;;  %1671 = vrot.lane.b32.xlu1 %v1595_v56, %s2445_s25  ;;  %v1588_v16 = vmul.f32 %v3088_v53, %v3088_v53 }
 0x1c9   : > { %v1331_v40 = vpop.f32.mrf.mxu0 }
 0x1ca   : > { %v2162_v10 = vpack.c.bf16 %v3180_v8, %v3180_v8  ;;  %v1596_v11 = vmul.f32 %v3180_v8, %v3180_v8 }
 0x1cc   : > { %1547 = vst.msk [vmem:[%s2894_s28 + $0x34] sm:$0xf] %vm1533_vm1, %v2162_v10  ;;  %1673 = vrot.lane.b32.xlu1 %v1596_v11, %s2445_s25 }
 0x1d0   : > { %1659 = vrot.lane.b32.xlu1 %v1589_v59, %s2445_s25 }
 0x1d4   : > { %1657 = vrot.lane.b32.xlu1 %v1588_v16, %s2445_s25 }
 0x1d8   : > { %1655 = vrot.lane.b32.xlu1 %v1587_v14, %s2445_s25 }
 0x1dc   : > { %1653 = vrot.lane.b32.xlu1 %v1586_v62, %s2445_s25 }
 0x1e0   : > { %1651 = vrot.lane.b32.xlu1 %v1585_v47, %s2445_s25 }
 0x1e4   : > { %1649 = vrot.lane.b32.xlu1 %v1584_v28, %s2445_s25 }
 0x1e6   : > { %v1678_v34 = vpop.permute.xlu1 %1677 }
 0x1e7   : > { %v1759_v37 = vsel %vm1743_vm8, %v2889_v7, %v1678_v34 }
 0x1e8   : > { %1647 = vrot.lane.b32.xlu1 %v1583_v3, %s2445_s25 }
 0x1ea   : > { %v1676_v4 = vpop.permute.xlu1 %1675 }
 0x1eb   : > { %v1758_v40 = vsel %vm1743_vm8, %v2898_v21, %v1676_v4 }
 0x1f6   : > { %v1694_v51 = vpop.permute.xlu0 %1693 }
 0x1fa   : > { %v1698_v19 = vpop.permute.xlu0 %1697 }
 0x1fe   : > { %v1696_v50 = vpop.permute.xlu0 %1695 }
 0x202   : > { %v1702_v63 = vpop.permute.xlu0 %1701 }
 0x203   : > { %v1771_v47 = vsel %vm1743_vm8, %v2985_v18, %v1702_v63 }
 0x206   : > { %v1700_v24 = vpop.permute.xlu0 %1699 }
 0x20a   : > { %v1706_v54 = vpop.permute.xlu0 %1705 }
 0x20b   : > { %v1773_v10 = vsel %vm1743_vm8, %v3002_v25, %v1706_v54  ;;  %v1769_v54 = vsel %vm1743_vm8, %v2968_v55, %v1698_v19 }
 0x20e   : > { %v1704_v1 = vpop.permute.xlu0 %1703 }
 0x20f   : > { %v1772_v21 = vsel %vm1743_vm8, %v3010_v29, %v1704_v1 }
 0x212   : > { %v1710_v32 = vpop.permute.xlu0 %1709 }
 0x213   : > { %v1775_v2 = vsel %vm1743_vm8, %v3019_v33, %v1710_v32 }
 0x214   : > { %2214 = vmatprep.subr.mxu0 %v1775_v2 }
 0x215   : > { %2215 = vmatpush3.msra.mxu0 %v1759_v37 }
 0x216   : > { %v1708_v56 = vpop.permute.xlu0 %1707 }
 0x217   : > { %v1774_v39 = vsel %vm1743_vm8, %v3027_v36, %v1708_v56 }
 0x218   : > { %2216 = vmatprep.subr.mxu0 %v1774_v39 }
 0x219   : > { %2217 = vmatpush3.msra.mxu0 %v1758_v40 }
 0x21a   : > { %2218 = vmatprep.subr.mxu0 %v1773_v10  ;;  %v1692_v7 = vpop.permute.xlu0 %1691 }
 0x21e   : > { %v1690_v9 = vpop.permute.xlu0 %1689 }
 0x21f   : > { %v1765_v19 = vsel %vm1743_vm8, %v2938_v42, %v1690_v9 }
 0x222   : > { %v1688_v52 = vpop.permute.xlu0 %1687 }
 0x226   : > { %v1662_v33 = vpop.permute.xlu1 %1661  ;;  %v1686_v28 = vpop.permute.xlu0 %1685 }
 0x227   : > { %v1751_v55 = vsel %vm1743_vm8, %v3108_v60, %v1662_v33  ;;  %v1764_v60 = vsel %vm1743_vm8, %v2945_v46, %v1688_v52 }
 0x22a   : > { %v1664_v11 = vpop.permute.xlu1 %1663  ;;  %v1684_v63 = vpop.permute.xlu0 %1683 }
 0x22e   : > { %v1666_v59 = vpop.permute.xlu1 %1665 }
 0x22f   : > { %v1753_v18 = vsel %vm1743_vm8, %v3133_v0, %v1666_v59  ;;  %v1766_v0 = vsel %vm1743_vm8, %v2959_v44, %v1692_v7 }
 0x232   : > { %v1668_v16 = vpop.permute.xlu1 %1667 }
 0x233   : > { %v1754_v29 = vsel %vm1743_vm8, %v3146_v13, %v1668_v16 }
 0x236   : > { %v1670_v14 = vpop.permute.xlu1 %1669 }
 0x237   : > { %v1755_v3 = vsel %vm1743_vm8, %v3159_v15, %v1670_v14  ;;  %v1768_v15 = vsel %vm1743_vm8, %v2976_v58, %v1696_v50  ;;  %v1682_v50 = vpop.permute.xlu0 %1681 }
 0x23a   : > { %v1672_v17 = vpop.permute.xlu1 %1671 }
 0x23b   : > { %v1756_v25 = vsel %vm1743_vm8, %v3170_v57, %v1672_v17  ;;  %v1680_v1 = vpop.permute.xlu0 %1679 }
 0x23e   : > { %v1674_v22 = vpop.permute.xlu1 %1673 }
 0x23f   : > { %v1757_v36 = vsel %vm1743_vm8, %v3180_v8, %v1674_v22  ;;  %v1770_v8 = vsel %vm1743_vm8, %v2993_v20, %v1700_v24  ;;  %v1752_v20 = vsel %vm1743_vm8, %v3120_v31, %v1664_v11  ;;  %v1767_v24 = vsel %vm1743_vm8, %v2952_v49, %v1694_v51 }
 0x240   : > { %2219 = vmatpush3.msra.mxu0 %v1757_v36  ;;  %v1763_v51 = vsel %vm1743_vm8, %v2923_v35, %v1686_v28  ;;  %v1761_v35 = vsel %vm1743_vm8, %v2906_v27, %v1682_v50 }
 0x241   : > { %2220 = vmatprep.subr.mxu0 %v1772_v21 }
 0x242   : > { %2221 = vmatpush3.msra.mxu0 %v1756_v25  ;;  %v1660_v62 = vpop.permute.xlu1 %1659 }
 0x243   : > { %2222 = vmatprep.subr.mxu0 %v1771_v47  ;;  %v1750_v58 = vsel %vm1743_vm8, %v3098_v5, %v1660_v62 }
 0x244   : > { %2223 = vmatpush3.msra.mxu0 %v1755_v3 }
 0x245   : > { %2224 = vmatprep.subr.mxu0 %v1770_v8 }
 0x246   : > { %2225 = vmatpush3.msra.mxu0 %v1754_v29  ;;  %v1658_v57 = vpop.permute.xlu1 %1657 }
 0x247   : > { %2226 = vmatprep.subr.mxu0 %v1769_v54  ;;  %v1749_v49 = vsel %vm1743_vm8, %v3088_v53, %v1658_v57  ;;  %v1762_v53 = vsel %vm1743_vm8, %v2931_v38, %v1684_v63  ;;  %v1760_v38 = vsel %vm1743_vm8, %v2914_v30, %v1680_v1  ;;  %v1776_v30 = vld [vmem:[%s347_s13] sm:$0x3] }
 0x248   : > { %2227 = vmatpush3.msra.mxu0 %v1753_v18 }
 0x249   : > { %2228 = vmatprep.subr.mxu0 %v1768_v15 }
 0x24a   : > { %2229 = vmatpush3.msra.mxu0 %v1752_v20  ;;  %v1656_v13 = vpop.permute.xlu1 %1655 }
 0x24b   : > { %2230 = vmatprep.subr.mxu0 %v1767_v24  ;;  %v1748_v44 = vsel %vm1743_vm8, %v3078_v23, %v1656_v13 }
 0x24c   : > { %2231 = vmatpush3.msra.mxu0 %v1751_v55 }
 0x24d   : > { %2232 = vmatprep.subr.mxu0 %v1766_v0 }
 0x24e   : > { %2233 = vmatpush3.msra.mxu0 %v1750_v58  ;;  %v1654_v31 = vpop.permute.xlu1 %1653 }
 0x24f   : > { %2234 = vmatprep.subr.mxu0 %v1765_v19  ;;  %v1747_v42 = vsel %vm1743_vm8, %v3068_v61, %v1654_v31 }
 0x250   : > { %2235 = vmatpush3.msra.mxu0 %v1749_v49 }
 0x251   : > { %2236 = vmatprep.subr.mxu0 %v1764_v60 }
 0x252   : > { %2237 = vmatpush3.msra.mxu0 %v1748_v44  ;;  %v1652_v5 = vpop.permute.xlu1 %1651 }
 0x253   : > { %2238 = vmatprep.subr.mxu0 %v1763_v51  ;;  %v1746_v46 = vsel %vm1743_vm8, %v3058_v48, %v1652_v5 }
 0x254   : > { %2239 = vmatpush3.msra.mxu0 %v1747_v42 }
 0x255   : > { %2240 = vmatprep.subr.mxu0 %v1762_v53 }
 0x256   : > { %2241 = vmatpush3.msra.mxu0 %v1746_v46  ;;  %v1650_v23 = vpop.permute.xlu1 %1649 }
 0x257   : > { %v1745_v61 = vsel %vm1743_vm8, %v3048_v45, %v1650_v23  ;;  %2242 = vmatprep.subr.mxu0 %v1761_v35 }
 0x258   : > { %2243 = vmatpush3.msra.mxu0 %v1745_v61 }
 0x259   : > { %2244 = vmatprep.subr.mxu0 %v1760_v38 }
 0x25a   : > { %v1648_v34 = vpop.permute.xlu1 %1647 }
 0x25b   : > { %v1744_v32 = vsel %vm1743_vm8, %v3036_v43, %v1648_v34 }
 0x25c   : > { %2245 = vmatpush3.msra.mxu0 %v1744_v32 }
 0x25d   : > { %2145 = vmatmul.mubr.msk.f32.vlgmr.msra.gmra.mxu0 %vm1577_vm7, %v2446_v26 }
 0x31d   : > { %v2246_v27 = vpop.f32.mrf.mxu0 }
 0x31f   : > { %v2247_v45 = vpop.f32.mrf.mxu0 }
 0x320   : > { %v2248_v48 = vadd.f32 %v2247_v45, %v2246_v27 }
 0x322   : > { %v1847_v43 = vadd.f32 %v2248_v48, %v1776_v30 }
 0x324   : > { %1848 = vst [vmem:[%s347_s13] sm:$0x3] %v1847_v43 }
 0x325 PF: > { %s17_s23 = sadd.s32 1, %s2441_s23   ;;  %s3316_s21 = smov %s2437_s22 }
 0x326   : > { %p14_p7 = scmp.ge.s32.totalorder %s17_s23, 4   ;;  %s3317_s22 = smov %s3319_s24 }
 0x328   :  { %16 = sbr.rel (!%p14_p7) target bundleno = 2 (0x2), region = 92 }

// kernel: graph_res_block_embed_forward.8
= control target key start
LH: loop header
LB: loop body
LE: loop exit
PB: predicated region body
PF: predicated region fallthrough
CT: control target
= control target key end

     0   :  { %s1024_s12 = smov 0   ;;  %s1173_s0 = inlined_call_operand.vmem [shape: bf16[256,128], index: 0, kind: input, shape index: {}]   ;;  %s1174_s1 = inlined_call_operand.vmem [shape: f32[256,4], index: 1, kind: input, shape index: {}]   ;;  %s1175_s2 = inlined_call_operand.vmem [shape: f32[4,256], index: 2, kind: input, shape index: {}]   ;;  %s1176_s3 = inlined_call_operand.vmem [shape: bf16[256,128], index: 3, kind: output, shape index: {}]  }
   0x1 LB: > { %s754_s13 = sadd.s32 4294967295, %s1001_s12   ;;  %p758_p0 = scmp.ge.s32.totalorder %s1001_s12, 1  ;;  %s1001_s12 = sphi %s1024_s12, %s13_s12  }
   0x2   : > { %p149_p1 = scmp.lt.s32.totalorder %s1001_s12, 3 }
   0x4   : > { %p150_p2 = pnand %p758_p0, %p149_p1 }
   0x5   : > { %s759_s16 = sshll.u32 (!%p150_p2), %s754_s13, 4 }
   0x6   : > { %153 = sbr.rel (%p150_p2) target bundleno = 281 (0x119), region = 32  ;;  %p179_p3 = scmp.lt.s32.totalorder (!%p150_p2), %s759_s16, 31 }
   0xb   : > { %v244_v0 = vld [vmem:[%s1175_s2] sm:$0xff]  ;;  %vm296_vm0 = vcmask 1043456   ;;  %v1003_v2 = vmov 0.0   ;;  %s1178_s16 = smov (!%p179_p3, %s759_s16), 31  ;;  %vm247_vm1 = vcmask 31744  }
   0xc   : > { %v246_v1 = vcombine.high %v244_v0, %v244_v0  ;;  %365 = vmatprep.mubr.f32.mxu0 %v1003_v2  ;;  %413 = vmatprep.mubr.f32.mxu1 %v1003_v2  ;;  %s762_s17 = sshll.u32 %s1178_s16, 3  ;;  %s760_s21 = sshll.u32 %s1178_s16, 2 }
   0xd   : > { %s1041_s20 = scalar_lea.vmem %s1174_s1, %s762_s17  ;;  %s1081_s24 = scalar_lea.vmem %s1173_s0, %s760_s21 }
   0xe   : > { %765 = vmatprep.subr.msk.mxu0 %vm296_vm0, %v246_v1  ;;  %919 = vmatprep.subr.msk.mxu1 %vm296_vm0, %v246_v1  ;;  %v228_v3 = vld [vmem:[%s1041_s20] sm:$0xff]  ;;  %v229_v5 = vld [vmem:[%s1041_s20 + $0x8] sm:$0xff]  ;;  %v230_v7 = vld [vmem:[%s1041_s20 + $0x10] sm:$0xff]  ;;  %s1146_s27 = scalar_lea.vmem %s1176_s3, %s760_s21 }
   0xf   : > { %766 = vmatpush1.msk.msra.mxu0 %vm296_vm0, %v244_v0  ;;  %920 = vmatpush1.msk.msra.mxu1 %vm296_vm0, %v244_v0  ;;  %v236_v4 = vld [vmem:[%s1041_s20 + $0x40] sm:$0xff]  ;;  %v237_v6 = vld [vmem:[%s1041_s20 + $0x48] sm:$0xff]  ;;  %v238_v8 = vld [vmem:[%s1041_s20 + $0x50] sm:$0xff] }
  0x10   : > { %767 = vmatmul.mubr.msk.f32.vlgmr.msra.gmra.mxu0 %vm247_vm1, %v228_v3  ;;  %775 = vmatmul.mubr.msk.f32.vlgmr.msra.gmra.mxu1 %vm247_vm1, %v236_v4  ;;  %v231_v9 = vld [vmem:[%s1041_s20 + $0x18] sm:$0xff]  ;;  %v232_v11 = vld [vmem:[%s1041_s20 + $0x20] sm:$0xff]  ;;  %v233_v13 = vld [vmem:[%s1041_s20 + $0x28] sm:$0xff] }
  0x11   : > { %371 = vmatprep.mubr.f32.mxu0 %v1003_v2  ;;  %419 = vmatprep.mubr.f32.mxu1 %v1003_v2  ;;  %v239_v10 = vld [vmem:[%s1041_s20 + $0x58] sm:$0xff]  ;;  %v240_v12 = vld [vmem:[%s1041_s20 + $0x60] sm:$0xff]  ;;  %v241_v14 = vld [vmem:[%s1041_s20 + $0x68] sm:$0xff] }
  0x12   : > { %v234_v15 = vld [vmem:[%s1041_s20 + $0x30] sm:$0xff]  ;;  %v235_v17 = vld [vmem:[%s1041_s20 + $0x38] sm:$0xff]  ;;  %v834_v19 = vld [vmem:[%s1081_s24] sm:$0xff]  }
  0x13   : > { %v242_v16 = vld [vmem:[%s1041_s20 + $0x70] sm:$0xff]  ;;  %v243_v18 = vld [vmem:[%s1041_s20 + $0x78] sm:$0xff]  ;;  %v908_v20 = vld [vmem:[%s1081_s24 + $0x20] sm:$0xff]   ;;  %v835_v21 = vunpack.c.l.bf16 %v834_v19  ;;  %v836_v27 = vunpack.c.h.bf16 %v834_v19 }
  0x14   : > { %768 = vmatmul.mubr.msk.f32.gmra.mxu0 %vm247_vm1, %v229_v5  ;;  %776 = vmatmul.mubr.msk.f32.gmra.mxu1 %vm247_vm1, %v237_v6  ;;  %v851_v22 = vunpack.c.l.bf16 %v908_v20  ;;  %v852_v28 = vunpack.c.h.bf16 %v908_v20  ;;  %v905_v29 = vld [vmem:[%s1081_s24 + $0x8] sm:$0xff]   ;;  %v906_v55 = vld [vmem:[%s1081_s24 + $0x10] sm:$0xff]   ;;  %v907_v19 = vld [vmem:[%s1081_s24 + $0x18] sm:$0xff]  }
  0x15   : > { %377 = vmatprep.mubr.f32.mxu0 %v1003_v2  ;;  %425 = vmatprep.mubr.f32.mxu1 %v1003_v2  ;;  %v909_v30 = vld [vmem:[%s1081_s24 + $0x28] sm:$0xff]   ;;  %v839_v37 = vunpack.c.l.bf16 %v905_v29  ;;  %v840_v49 = vunpack.c.h.bf16 %v905_v29  ;;  %v910_v56 = vld [vmem:[%s1081_s24 + $0x30] sm:$0xff]   ;;  %v843_v63 = vunpack.c.l.bf16 %v906_v55 }
  0x16   : > { %v855_v38 = vunpack.c.l.bf16 %v909_v30  ;;  %v856_v50 = vunpack.c.h.bf16 %v909_v30  ;;  %v859_v0 = vunpack.c.l.bf16 %v910_v56  ;;  %v847_v30 = vunpack.c.l.bf16 %v907_v19 }
  0x18   : > { %769 = vmatmul.mubr.msk.f32.gmra.mxu0 %vm247_vm1, %v230_v7  ;;  %777 = vmatmul.mubr.msk.f32.gmra.mxu1 %vm247_vm1, %v238_v8 }
  0x19   : > { %383 = vmatprep.mubr.f32.mxu0 %v1003_v2  ;;  %431 = vmatprep.mubr.f32.mxu1 %v1003_v2 }
  0x1c   : > { %770 = vmatmul.mubr.msk.f32.gmra.mxu0 %vm247_vm1, %v231_v9  ;;  %778 = vmatmul.mubr.msk.f32.gmra.mxu1 %vm247_vm1, %v239_v10 }
  0x1d   : > { %389 = vmatprep.mubr.f32.mxu0 %v1003_v2  ;;  %437 = vmatprep.mubr.f32.mxu1 %v1003_v2 }
  0x20   : > { %771 = vmatmul.mubr.msk.f32.gmra.mxu0 %vm247_vm1, %v232_v11  ;;  %779 = vmatmul.mubr.msk.f32.gmra.mxu1 %vm247_vm1, %v240_v12  ;;  %v844_v11 = vunpack.c.h.bf16 %v906_v55 }
  0x21   : > { %395 = vmatprep.mubr.f32.mxu0 %v1003_v2  ;;  %443 = vmatprep.mubr.f32.mxu1 %v1003_v2 }
  0x24   : > { %772 = vmatmul.mubr.msk.f32.gmra.mxu0 %vm247_vm1, %v233_v13  ;;  %780 = vmatmul.mubr.msk.f32.gmra.mxu1 %vm247_vm1, %v241_v14 }
  0x25   : > { %401 = vmatprep.mubr.f32.mxu0 %v1003_v2  ;;  %449 = vmatprep.mubr.f32.mxu1 %v1003_v2 }
  0x28   : > { %773 = vmatmul.mubr.msk.f32.gmra.mxu0 %vm247_vm1, %v234_v15  ;;  %781 = vmatmul.mubr.msk.f32.gmra.mxu1 %vm247_vm1, %v242_v16 }
  0x29   : > { %407 = vmatprep.mubr.f32.mxu0 %v1003_v2  ;;  %455 = vmatprep.mubr.f32.mxu1 %v1003_v2 }
  0x2c   : > { %774 = vmatmul.mubr.msk.f32.gmra.mxu0 %vm247_vm1, %v235_v17  ;;  %782 = vmatmul.mubr.msk.f32.gmra.mxu1 %vm247_vm1, %v243_v18  ;;  %v860_v18 = vunpack.c.h.bf16 %v910_v56 }
  0xd0   : > { %v367_v23 = vpop.f32.mrf.mxu0  ;;  %v415_v24 = vpop.f32.mrf.mxu1 }
  0xd1   : > { %v462_v25 = vmul.f32 %v835_v21, %v367_v23  ;;  %v470_v26 = vmul.f32 %v851_v22, %v415_v24  ;;  %v911_v22 = vld [vmem:[%s1081_s24 + $0x38] sm:$0xff]  }
  0xd2   : > { %v369_v31 = vpop.f32.mrf.mxu0  ;;  %v417_v32 = vpop.f32.mrf.mxu1 }
  0xd3   : > { %v1087_v33 = vadd.f32 %v462_v25, %v369_v31  ;;  %v1089_v34 = vadd.f32 %v470_v26, %v417_v32 }
  0xd4   : > { %v373_v35 = vpop.f32.mrf.mxu0  ;;  %v421_v36 = vpop.f32.mrf.mxu1 }
  0xd5   : > { %v783_v39 = vmul.f32 -1.442695, %v1087_v33  ;;  %v791_v40 = vmul.f32 -1.442695, %v1089_v34  ;;  %v463_v41 = vmul.f32 %v836_v27, %v373_v35  ;;  %v471_v42 = vmul.f32 %v852_v28, %v421_v36 }
  0xd6   : > { %v375_v43 = vpop.f32.mrf.mxu0  ;;  %v423_v44 = vpop.f32.mrf.mxu1 }
  0xd7   : > { %931 = vpow2.f32 %v783_v39  ;;  %v1093_v45 = vadd.f32 %v463_v41, %v375_v43  ;;  %v1095_v46 = vadd.f32 %v471_v42, %v423_v44  ;;  %v848_v44 = vunpack.c.h.bf16 %v907_v19 }
  0xd8   : > { %933 = vpow2.f32 %v791_v40  ;;  %v379_v47 = vpop.f32.mrf.mxu0  ;;  %v427_v48 = vpop.f32.mrf.mxu1 }
  0xd9   : > { %v784_v51 = vmul.f32 -1.442695, %v1093_v45  ;;  %v792_v52 = vmul.f32 -1.442695, %v1095_v46  ;;  %v464_v53 = vmul.f32 %v839_v37, %v379_v47  ;;  %v472_v54 = vmul.f32 %v855_v38, %v427_v48 }
  0xda   : > { %v381_v57 = vpop.f32.mrf.mxu0  ;;  %v429_v58 = vpop.f32.mrf.mxu1  ;;  %v863_v38 = vunpack.c.l.bf16 %v911_v22  ;;  %v864_v47 = vunpack.c.h.bf16 %v911_v22 }
  0xdb   : > { %935 = vpow2.f32 %v784_v51  ;;  %v1101_v59 = vadd.f32 %v464_v53, %v381_v57  ;;  %v1103_v60 = vadd.f32 %v472_v54, %v429_v58 }
  0xdc   : > { %937 = vpow2.f32 %v792_v52  ;;  %v385_v61 = vpop.f32.mrf.mxu0  ;;  %v433_v62 = vpop.f32.mrf.mxu1 }
  0xdd   : > { %v785_v1 = vmul.f32 -1.442695, %v1101_v59  ;;  %v793_v2 = vmul.f32 -1.442695, %v1103_v60  ;;  %v465_v3 = vmul.f32 %v840_v49, %v385_v61  ;;  %v473_v4 = vmul.f32 %v856_v50, %v433_v62 }
  0xde   : > { %v387_v5 = vpop.f32.mrf.mxu0  ;;  %v435_v6 = vpop.f32.mrf.mxu1 }
  0xdf   : > { %939 = vpow2.f32 %v785_v1  ;;  %v1107_v7 = vadd.f32 %v465_v3, %v387_v5  ;;  %v1109_v8 = vadd.f32 %v473_v4, %v435_v6 }
  0xe0   : > { %941 = vpow2.f32 %v793_v2  ;;  %v391_v9 = vpop.f32.mrf.mxu0  ;;  %v439_v10 = vpop.f32.mrf.mxu1 }
  0xe1   : > { %v786_v12 = vmul.f32 -1.442695, %v1107_v7  ;;  %v794_v13 = vmul.f32 -1.442695, %v1109_v8  ;;  %v466_v14 = vmul.f32 %v843_v63, %v391_v9  ;;  %v474_v15 = vmul.f32 %v859_v0, %v439_v10 }
  0xe2   : > { %v393_v16 = vpop.f32.mrf.mxu0  ;;  %v441_v17 = vpop.f32.mrf.mxu1 }
  0xe3   : > { %943 = vpow2.f32 %v786_v12  ;;  %v1114_v20 = vadd.f32 %v466_v14, %v393_v16  ;;  %v1116_v21 = vadd.f32 %v474_v15, %v441_v17 }
  0xe4   : > { %v932_v23 = vpop.eup %931  ;;  %945 = vpow2.f32 %v794_v13  ;;  %v397_v24 = vpop.f32.mrf.mxu0 }
  0xe5   : > { %v445_v25 = vpop.f32.mrf.mxu1  ;;  %v934_v26 = vpop.eup %933  ;;  %v542_v27 = vadd.f32 1.0, %v932_v23  ;;  %v787_v28 = vmul.f32 -1.442695, %v1114_v20  ;;  %v467_v29 = vmul.f32 %v844_v11, %v397_v24  ;;  %v795_v32 = vmul.f32 -1.442695, %v1116_v21 }
  0xe6   : > { %v550_v31 = vadd.f32 1.0, %v934_v26  ;;  %v475_v35 = vmul.f32 %v860_v18, %v445_v25  ;;  %v399_v36 = vpop.f32.mrf.mxu0 }
  0xe7   : > { %v447_v37 = vpop.f32.mrf.mxu1  ;;  %947 = vrcp.f32 %v542_v27  ;;  %v1121_v39 = vadd.f32 %v467_v29, %v399_v36 }
  0xe8   : > { %v936_v40 = vpop.eup %935  ;;  %949 = vrcp.f32 %v550_v31  ;;  %v1123_v41 = vadd.f32 %v475_v35, %v447_v37  ;;  %v403_v42 = vpop.f32.mrf.mxu0 }
  0xe9   : > { %v451_v43 = vpop.f32.mrf.mxu1  ;;  %v938_v48 = vpop.eup %937  ;;  %v543_v49 = vadd.f32 1.0, %v936_v40  ;;  %951 = vpow2.f32 %v787_v28  ;;  %v788_v50 = vmul.f32 -1.442695, %v1121_v39  ;;  %v468_v51 = vmul.f32 %v847_v30, %v403_v42 }
  0xea   : > { %v551_v52 = vadd.f32 1.0, %v938_v48  ;;  %953 = vpow2.f32 %v795_v32  ;;  %v796_v53 = vmul.f32 -1.442695, %v1123_v41  ;;  %v476_v54 = vmul.f32 %v863_v38, %v451_v43  ;;  %v405_v55 = vpop.f32.mrf.mxu0 }
  0xeb   : > { %v453_v56 = vpop.f32.mrf.mxu1  ;;  %955 = vrcp.f32 %v543_v49  ;;  %v1127_v57 = vadd.f32 %v468_v51, %v405_v55 }
  0xec   : > { %v940_v58 = vpop.eup %939  ;;  %957 = vrcp.f32 %v551_v52  ;;  %v1129_v61 = vadd.f32 %v476_v54, %v453_v56  ;;  %v409_v62 = vpop.f32.mrf.mxu0 }
  0xed   : > { %v457_v63 = vpop.f32.mrf.mxu1  ;;  %v942_v0 = vpop.eup %941  ;;  %v544_v1 = vadd.f32 1.0, %v940_v58  ;;  %959 = vpow2.f32 %v788_v50  ;;  %v789_v2 = vmul.f32 -1.442695, %v1127_v57  ;;  %v469_v3 = vmul.f32 %v848_v44, %v409_v62 }
  0xee   : > { %v552_v4 = vadd.f32 1.0, %v942_v0  ;;  %961 = vpow2.f32 %v796_v53  ;;  %v797_v5 = vmul.f32 -1.442695, %v1129_v61  ;;  %v477_v6 = vmul.f32 %v864_v47, %v457_v63  ;;  %v411_v9 = vpop.f32.mrf.mxu0 }
  0xef   : > { %v459_v10 = vpop.f32.mrf.mxu1  ;;  %963 = vrcp.f32 %v544_v1  ;;  %v1133_v11 = vadd.f32 %v469_v3, %v411_v9 }
  0xf0   : > { %v944_v12 = vpop.eup %943  ;;  %965 = vrcp.f32 %v552_v4  ;;  %v1135_v13 = vadd.f32 %v477_v6, %v459_v10 }
  0xf1   : > { %v946_v14 = vpop.eup %945  ;;  %v545_v15 = vadd.f32 1.0, %v944_v12  ;;  %967 = vpow2.f32 %v789_v2  ;;  %v790_v16 = vmul.f32 -1.442695, %v1133_v11 }
  0xf2   : > { %v553_v17 = vadd.f32 1.0, %v946_v14  ;;  %969 = vpow2.f32 %v797_v5  ;;  %v798_v18 = vmul.f32 -1.442695, %v1135_v13 }
  0xf3   : > { %971 = vrcp.f32 %v545_v15 }
  0xf4   : > { %v948_v19 = vpop.eup %947  ;;  %973 = vrcp.f32 %v553_v17 }
  0xf5   : > { %v950_v22 = vpop.eup %949  ;;  %975 = vpow2.f32 %v790_v16  ;;  %v590_v29 = vmul.f32 %v948_v19, %v1087_v33 }
  0xf6   : > { %v952_v23 = vpop.eup %951  ;;  %977 = vpow2.f32 %v798_v18  ;;  %v598_v32 = vmul.f32 %v950_v22, %v1089_v34 }
  0xf7   : > { %v954_v24 = vpop.eup %953  ;;  %v546_v25 = vadd.f32 1.0, %v952_v23 }
  0xf8   : > { %v956_v26 = vpop.eup %955  ;;  %v554_v27 = vadd.f32 1.0, %v954_v24 }
  0xf9   : > { %v958_v28 = vpop.eup %957  ;;  %v591_v30 = vmul.f32 %v956_v26, %v1093_v45  ;;  %979 = vrcp.f32 %v546_v25 }
  0xfa   : > { %v960_v31 = vpop.eup %959  ;;  %v599_v35 = vmul.f32 %v958_v28, %v1095_v46  ;;  %981 = vrcp.f32 %v554_v27 }
  0xfb   : > { %v962_v36 = vpop.eup %961  ;;  %v868_v37 = vpack.c.bf16 %v591_v30, %v590_v29  ;;  %v547_v38 = vadd.f32 1.0, %v960_v31 }
  0xfc   : > { %v964_v33 = vpop.eup %963  ;;  %v888_v40 = vpack.c.bf16 %v599_v35, %v598_v32  ;;  %v555_v45 = vadd.f32 1.0, %v962_v36 }
  0xfd   : > { %v966_v42 = vpop.eup %965  ;;  %869 = vst [vmem:[%s1146_s27] sm:$0xff] %v868_v37   ;;  %983 = vrcp.f32 %v547_v38  ;;  %v592_v49 = vmul.f32 %v964_v33, %v1101_v59 }
  0xfe   : > { %v968_v43 = vpop.eup %967  ;;  %915 = vst [vmem:[%s1146_s27 + $0x20] sm:$0xff] %v888_v40   ;;  %985 = vrcp.f32 %v555_v45  ;;  %v600_v52 = vmul.f32 %v966_v42, %v1103_v60 }
  0xff   : > { %v970_v44 = vpop.eup %969  ;;  %v548_v47 = vadd.f32 1.0, %v968_v43 }
 0x100   : > { %v972_v34 = vpop.eup %971  ;;  %v556_v48 = vadd.f32 1.0, %v970_v44 }
 0x101   : > { %v974_v46 = vpop.eup %973  ;;  %v593_v50 = vmul.f32 %v972_v34, %v1107_v7  ;;  %987 = vrcp.f32 %v548_v47 }
 0x102   : > { %v976_v51 = vpop.eup %975  ;;  %v601_v53 = vmul.f32 %v974_v46, %v1109_v8  ;;  %989 = vrcp.f32 %v556_v48 }
 0x103   : > { %v978_v54 = vpop.eup %977  ;;  %v873_v55 = vpack.c.bf16 %v593_v50, %v592_v49  ;;  %v549_v56 = vadd.f32 1.0, %v976_v51 }
 0x104   : > { %v893_v58 = vpack.c.bf16 %v601_v53, %v600_v52  ;;  %v557_v62 = vadd.f32 1.0, %v978_v54 }
 0x105   : > { %912 = vst [vmem:[%s1146_s27 + $0x8] sm:$0xff] %v873_v55   ;;  %991 = vrcp.f32 %v549_v56 }
 0x106   : > { %916 = vst [vmem:[%s1146_s27 + $0x28] sm:$0xff] %v893_v58   ;;  %993 = vrcp.f32 %v557_v62  ;;  %v980_v59 = vpop.eup %979 }
 0x107   : > { %v982_v7 = vpop.eup %981  ;;  %v594_v60 = vmul.f32 %v980_v59, %v1114_v20 }
 0x108   : > { %v602_v1 = vmul.f32 %v982_v7, %v1116_v21 }
 0x10a   : > { %v984_v63 = vpop.eup %983 }
 0x10b   : > { %v986_v0 = vpop.eup %985  ;;  %v595_v8 = vmul.f32 %v984_v63, %v1121_v39 }
 0x10c   : > { %v603_v2 = vmul.f32 %v986_v0, %v1123_v41 }
 0x10d   : > { %v878_v3 = vpack.c.bf16 %v595_v8, %v594_v60 }
 0x10e   : > { %v898_v4 = vpack.c.bf16 %v603_v2, %v602_v1  ;;  %v988_v5 = vpop.eup %987 }
 0x10f   : > { %913 = vst [vmem:[%s1146_s27 + $0x10] sm:$0xff] %v878_v3   ;;  %v990_v6 = vpop.eup %989  ;;  %v596_v12 = vmul.f32 %v988_v5, %v1127_v57 }
 0x110   : > { %917 = vst [vmem:[%s1146_s27 + $0x30] sm:$0xff] %v898_v4   ;;  %v604_v39 = vmul.f32 %v990_v6, %v1129_v61 }
 0x112   : > { %v992_v9 = vpop.eup %991 }
 0x113   : > { %v994_v10 = vpop.eup %993  ;;  %v597_v20 = vmul.f32 %v992_v9, %v1133_v11 }
 0x114   : > { %v605_v21 = vmul.f32 %v994_v10, %v1135_v13 }
 0x115   : > { %v883_v14 = vpack.c.bf16 %v597_v20, %v596_v12 }
 0x116   : > { %v903_v15 = vpack.c.bf16 %v605_v21, %v604_v39 }
 0x117   : > { %914 = vst [vmem:[%s1146_s27 + $0x18] sm:$0xff] %v883_v14  }
 0x118   : > { %918 = vst [vmem:[%s1146_s27 + $0x38] sm:$0xff] %v903_v15  }
 0x119 PF: > { %s13_s12 = sadd.s32 1, %s1001_s12  }
 0x11a   : > { %p10_p4 = scmp.ge.s32.totalorder %s13_s12, 4  }
 0x11c   :  { %12 = sbr.rel (!%p10_p4) target bundleno = 1 (0x1), region = 65 }

// kernel: graph_res_block_embed_forward.9
= control target key start
LH: loop header
LB: loop body
LE: loop exit
PB: predicated region body
PF: predicated region fallthrough
CT: control target
= control target key end

     0   :  { %s1641_s9 = smov 0   ;;  %s1974_s0 = inlined_call_operand.vmem [shape: bf16[512,480], index: 0, kind: input, shape index: {}]   ;;  %s1975_s1 = inlined_call_operand.vmem [shape: bf16[480,64], index: 1, kind: input, shape index: {}]   ;;  %s1976_s2 = inlined_call_operand.vmem [shape: f32[512,64], index: 2, kind: output, shape index: {}]  }
   0x1 LB: > { %s1219_s10 = sadd.s32 4294967295, %s1623_s9   ;;  %p1223_p0 = scmp.ge.s32.totalorder %s1623_s9, 1  ;;  %s1623_s9 = sphi %s1641_s9, %s12_s9  }
   0x2   : > { %p114_p1 = scmp.lt.s32.totalorder %s1623_s9, 3 }
   0x4   : > { %p115_p2 = pnand %p1223_p0, %p114_p1 }
   0x5   : > { %s1224_s29 = sshll.u32 (!%p115_p2), %s1219_s10, 5 }
   0x6   : > { %118 = sbr.rel (%p115_p2) target bundleno = 380 (0x17c), region = 28  ;;  %p138_p3 = scmp.lt.s32.totalorder (!%p115_p2), %s1224_s29, 63 }
   0xb   : > { %v1491_v0 = vld [vmem:[%s1975_s1 + $0x78] sm:$0xff]   ;;  %v1625_v1 = vmov 0   ;;  %v1494_v4 = vld [vmem:[%s1975_s1 + $0x70] sm:$0xff]   ;;  %v1497_v7 = vld [vmem:[%s1975_s1 + $0x68] sm:$0xff]   ;;  %s1978_s29 = smov (!%p138_p3, %s1224_s29), 63  ;;  %vm759_vm0 = vcmask 785408  }
   0xc   : > { %1454 = vmatprep.subr.bf16.mxu1 %v1625_v1  ;;  %v1656_v2 = vld [vmem:[%s1975_s1 + $0xb8] sm:$0xff]   ;;  %1342 = vmatprep.subr.bf16.mxu0 %v1491_v0  ;;  %v1669_v5 = vld [vmem:[%s1975_s1 + $0xb0] sm:$0xff]   ;;  %v1681_v8 = vld [vmem:[%s1975_s1 + $0xa8] sm:$0xff]   ;;  %s1341_s19 = sshll.u32 %s1978_s29, 4  ;;  %s1228_s23 = sshll.u32 %s1978_s29, 3  ;;  %vm1130_vm1 = vcmask 523264  }
   0xd   : > { %v1493_v3 = vld [vmem:[%s1975_s1 + $0x38] sm:$0xff]   ;;  %1468 = vmatpush1.bf16.msra.mxu1 %v1656_v2  ;;  %v1496_v6 = vld [vmem:[%s1975_s1 + $0x30] sm:$0xff]   ;;  %v1499_v9 = vld [vmem:[%s1975_s1 + $0x28] sm:$0xff]   ;;  %s1740_s28 = scalar_lea.vmem %s1974_s0, %s1341_s19  ;;  %s1903_s26 = scalar_lea.vmem %s1976_s2, %s1228_s23 }
   0xe   : > { %1343 = vmatpush3.bf16.msra.mxu0 %v1493_v3  ;;  %1455 = vmatprep.subr.bf16.mxu1 %v1625_v1  ;;  %v1500_v10 = vld [vmem:[%s1975_s1 + $0x60] sm:$0xff]   ;;  %v1503_v13 = vld [vmem:[%s1975_s1 + $0x58] sm:$0xff]   ;;  %v1506_v16 = vld [vmem:[%s1975_s1 + $0x50] sm:$0xff]  }
   0xf   : > { %1344 = vmatprep.subr.bf16.mxu0 %v1494_v4  ;;  %v1694_v11 = vld [vmem:[%s1975_s1 + $0xa0] sm:$0xff]   ;;  %v1707_v14 = vld [vmem:[%s1975_s1 + $0x98] sm:$0xff]   ;;  %v1722_v17 = vld [vmem:[%s1975_s1 + $0x90] sm:$0xff]  }
  0x10   : > { %v1502_v12 = vld [vmem:[%s1975_s1 + $0x20] sm:$0xff]   ;;  %v1505_v15 = vld [vmem:[%s1975_s1 + $0x18] sm:$0xff]   ;;  %v1508_v18 = vld [vmem:[%s1975_s1 + $0x10] sm:$0xff]  }
  0x11   : > { %1469 = vmatpush1.bf16.msra.mxu1 %v1669_v5  ;;  %v1509_v19 = vld [vmem:[%s1975_s1 + $0x48] sm:$0xff]   ;;  %v1512_v22 = vld [vmem:[%s1975_s1 + $0x40] sm:$0xff]   ;;  %v1523_v32 = vld [vmem:[%s1975_s1 + $0xd8] sm:$0xff]  }
  0x12   : > { %1345 = vmatpush3.bf16.msra.mxu0 %v1496_v6  ;;  %1456 = vmatprep.subr.bf16.mxu1 %v1625_v1  ;;  %v1735_v20 = vld [vmem:[%s1975_s1 + $0x88] sm:$0xff]   ;;  %v1517_v23 = vld [vmem:[%s1740_s28 + $0x4] ss:$16 sps:$4 sm:$0xff]   ;;  %v1515_v26 = vld [vmem:[%s1740_s28] ss:$16 sps:$4 sm:$0xff]  }
  0x13   : > { %1346 = vmatprep.subr.bf16.mxu0 %v1497_v7  ;;  %v1511_v21 = vld [vmem:[%s1975_s1 + $0x8] sm:$0xff]   ;;  %v1755_v24 = vld [vmem:[%s1975_s1 + $0x80] sm:$0xff]   ;;  %840 = vmatprep.mubr.bf16.mxu0 %v1517_v23  ;;  %v1524_v34 = vld [vmem:[%s1975_s1 + $0xd0] sm:$0xff]  }
  0x14   : > { %v1514_v25 = vld [vmem:[%s1975_s1] sm:$0xff]   ;;  %v1766_v27 = vld [vmem:[%s1975_s1 + $0xe8] sm:$0xff]  }
  0x15   : > { %1470 = vmatpush1.bf16.msra.mxu1 %v1681_v8  ;;  %v1520_v28 = vld [vmem:[%s1740_s28 + $0x24] ss:$16 sps:$4 sm:$0xff]   ;;  %v1532_v30 = vld [vmem:[%s1740_s28 + $0x2c] ss:$16 sps:$4 sm:$0xff]   ;;  %v1522_v31 = vld [vmem:[%s1740_s28 + $0x20] ss:$16 sps:$4 sm:$0xff]  }
  0x16   : > { %1347 = vmatpush3.bf16.msra.mxu0 %v1499_v9  ;;  %1457 = vmatprep.subr.bf16.mxu1 %v1625_v1  ;;  %v1774_v29 = vld [vmem:[%s1975_s1 + $0xe0] sm:$0xff]   ;;  %v1528_v36 = vld [vmem:[%s1975_s1 + $0xc8] sm:$0xff]  }
  0x17   : > { %1348 = vmatprep.subr.bf16.mxu0 %v1500_v10  ;;  %1324 = vmatprep.mubr.msk.bf16.mxu1 %vm759_vm0, %v1532_v30  ;;  %v1525_v33 = vld [vmem:[%s1740_s28 + $0x44] ss:$16 sps:$4 sm:$0xff]   ;;  %v1527_v35 = vld [vmem:[%s1740_s28 + $0x40] ss:$16 sps:$4 sm:$0xff]   ;;  %v1530_v39 = vld [vmem:[%s1740_s28 + $0x28] ss:$16 sps:$4 sm:$0xff]  }
  0x18   : > { %v1533_v37 = vld [vmem:[%s1740_s28 + $0x64] ss:$16 sps:$4 sm:$0xff]   ;;  %v1535_v40 = vld [vmem:[%s1740_s28 + $0x60] ss:$16 sps:$4 sm:$0xff]   ;;  %v1536_v41 = vld [vmem:[%s1740_s28 + $0x4c] ss:$16 sps:$4 sm:$0xff]  }
  0x19   : > { %1471 = vmatpush1.bf16.msra.mxu1 %v1694_v11  ;;  %v1529_v38 = vld [vmem:[%s1975_s1 + $0xc0] sm:$0xff]   ;;  %v1540_v43 = vld [vmem:[%s1740_s28 + $0x48] ss:$16 sps:$4 sm:$0xff]   ;;  %v1542_v45 = vld [vmem:[%s1740_s28 + $0x6c] ss:$16 sps:$4 sm:$0xff]  }
  0x1a   : > { %1349 = vmatpush3.bf16.msra.mxu0 %v1502_v12  ;;  %1458 = vmatprep.subr.bf16.mxu1 %v1625_v1  ;;  %v1538_v42 = vld [vmem:[%s1740_s28 + $0x84] ss:$16 sps:$4 sm:$0xff]   ;;  %v1541_v44 = vld [vmem:[%s1740_s28 + $0x80] ss:$16 sps:$4 sm:$0xff]   ;;  %v1546_v47 = vld [vmem:[%s1740_s28 + $0x68] ss:$16 sps:$4 sm:$0xff]  }
  0x1b   : > { %1350 = vmatprep.subr.bf16.mxu0 %v1503_v13  ;;  %v1544_v46 = vld [vmem:[%s1740_s28 + $0xa4] ss:$16 sps:$4 sm:$0xff]   ;;  %v1547_v48 = vld [vmem:[%s1740_s28 + $0xa0] ss:$16 sps:$4 sm:$0xff]   ;;  %v1548_v49 = vld [vmem:[%s1740_s28 + $0x8c] ss:$16 sps:$4 sm:$0xff]  }
  0x1c   : > { %v1550_v50 = vld [vmem:[%s1740_s28 + $0xc4] ss:$16 sps:$4 sm:$0xff]   ;;  %v1552_v51 = vld [vmem:[%s1740_s28 + $0x88] ss:$16 sps:$4 sm:$0xff]   ;;  %v1553_v52 = vld [vmem:[%s1740_s28 + $0xc0] ss:$16 sps:$4 sm:$0xff]  }
  0x1d   : > { %1472 = vmatpush1.bf16.msra.mxu1 %v1707_v14  ;;  %v1554_v53 = vld [vmem:[%s1740_s28 + $0xac] ss:$16 sps:$4 sm:$0xff]   ;;  %v1556_v54 = vld [vmem:[%s1740_s28 + $0xe4] ss:$16 sps:$4 sm:$0xff]   ;;  %v1558_v55 = vld [vmem:[%s1740_s28 + $0xa8] ss:$16 sps:$4 sm:$0xff]  }
  0x1e   : > { %1351 = vmatpush3.bf16.msra.mxu0 %v1505_v15  ;;  %1459 = vmatprep.subr.bf16.mxu1 %v1625_v1  ;;  %v1559_v56 = vld [vmem:[%s1740_s28 + $0xe0] ss:$16 sps:$4 sm:$0xff]   ;;  %v1560_v57 = vld [vmem:[%s1740_s28 + $0xcc] ss:$16 sps:$4 sm:$0xff]   ;;  %v1562_v58 = vld [vmem:[%s1740_s28 + $0x104] ss:$16 sps:$4 sm:$0xff]  }
  0x1f   : > { %1352 = vmatprep.subr.bf16.mxu0 %v1506_v16  ;;  %v1564_v59 = vld [vmem:[%s1740_s28 + $0xc8] ss:$16 sps:$4 sm:$0xff]   ;;  %v1565_v60 = vld [vmem:[%s1740_s28 + $0x100] ss:$16 sps:$4 sm:$0xff]   ;;  %v1566_v61 = vld [vmem:[%s1740_s28 + $0xec] ss:$16 sps:$4 sm:$0xff]  }
  0x20   : > { %v1568_v62 = vld [vmem:[%s1740_s28 + $0x124] ss:$16 sps:$4 sm:$0xff]   ;;  %v1570_v63 = vld [vmem:[%s1740_s28 + $0xe8] ss:$16 sps:$4 sm:$0xff]   ;;  %v1571_v0 = vld [vmem:[%s1740_s28 + $0x120] ss:$16 sps:$4 sm:$0xff]  }
  0x21   : > { %1473 = vmatpush1.bf16.msra.mxu1 %v1722_v17  ;;  %v1576_v3 = vld [vmem:[%s1740_s28 + $0x108] ss:$16 sps:$4 sm:$0xff]   ;;  %v1577_v4 = vld [vmem:[%s1740_s28 + $0x140] ss:$16 sps:$4 sm:$0xff]   ;;  %v1580_v6 = vld [vmem:[%s1740_s28 + $0x164] ss:$16 sps:$4 sm:$0xff]  }
  0x22   : > { %1353 = vmatpush3.bf16.msra.mxu0 %v1508_v18  ;;  %1460 = vmatprep.subr.bf16.mxu1 %v1625_v1  ;;  %v1582_v7 = vld [vmem:[%s1740_s28 + $0x128] ss:$16 sps:$4 sm:$0xff]   ;;  %v1584_v9 = vld [vmem:[%s1740_s28 + $0x14c] ss:$16 sps:$4 sm:$0xff]   ;;  %v1586_v10 = vld [vmem:[%s1740_s28 + $0x184] ss:$16 sps:$4 sm:$0xff]  }
  0x23   : > { %1354 = vmatprep.subr.bf16.mxu0 %v1509_v19  ;;  %v1589_v12 = vld [vmem:[%s1740_s28 + $0x180] ss:$16 sps:$4 sm:$0xff]   ;;  %v1590_v13 = vld [vmem:[%s1740_s28 + $0x16c] ss:$16 sps:$4 sm:$0xff]   ;;  %v1594_v15 = vld [vmem:[%s1740_s28 + $0x168] ss:$16 sps:$4 sm:$0xff]  }
  0x24   : > { %v1595_v16 = vld [vmem:[%s1740_s28 + $0x1a0] ss:$16 sps:$4 sm:$0xff]   ;;  %v1598_v18 = vld [vmem:[%s1740_s28 + $0x1c4] ss:$16 sps:$4 sm:$0xff]   ;;  %v1600_v19 = vld [vmem:[%s1740_s28 + $0x188] ss:$16 sps:$4 sm:$0xff]  }
  0x25   : > { %1474 = vmatpush1.bf16.msra.mxu1 %v1735_v20  ;;  %v1606_v23 = vld [vmem:[%s1740_s28 + $0x1a8] ss:$16 sps:$4 sm:$0xff]  }
  0x26   : > { %1355 = vmatpush3.bf16.msra.mxu0 %v1511_v21  ;;  %1461 = vmatprep.subr.bf16.mxu1 %v1625_v1  ;;  %v1602_v21 = vld [vmem:[%s1740_s28 + $0x1ac] ss:$16 sps:$4 sm:$0xff]   ;;  %v1616_v30 = vld [vmem:[%s1740_s28 + $0x1e8] ss:$16 sps:$4 sm:$0xff]  }
  0x27   : > { %1356 = vmatprep.subr.bf16.mxu0 %v1512_v22  ;;  %v1604_v22 = vld [vmem:[%s1740_s28 + $0x1e4] ss:$16 sps:$4 sm:$0xff]  }
  0x29   : > { %1475 = vmatpush1.bf16.msra.mxu1 %v1755_v24 }
  0x2a   : > { %1357 = vmatpush3.bf16.msra.mxu0 %v1514_v25  ;;  %1462 = vmatprep.subr.bf16.mxu1 %v1625_v1  ;;  %v1608_v25 = vld [vmem:[%s1740_s28 + $0x1cc] ss:$16 sps:$4 sm:$0xff]  }
  0x2b   : > { %969 = vmatprep.subr.bf16.mxu0 %v1625_v1 }
  0x2d   : > { %841 = vmatmul.mubr.bf16.vlgmr.msra.gmra.mxu0 %v1515_v26  ;;  %1476 = vmatpush2.bf16.msra.mxu1 %v1766_v27  ;;  %v1612_v26 = vld [vmem:[%s1740_s28 + $0xc] ss:$16 sps:$4 sm:$0xff]  }
  0x2e   : > { %1463 = vmatprep.subr.bf16.mxu1 %v1625_v1  ;;  %848 = vmatprep.mubr.bf16.mxu0 %v1520_v28  ;;  %v1610_v28 = vld [vmem:[%s1740_s28 + $0x8] ss:$16 sps:$4 sm:$0xff]  }
  0x2f   : > { %970 = vmatpush1.bf16.msra.mxu0 %v1656_v2  ;;  %v1574_v2 = vld [vmem:[%s1740_s28 + $0x144] ss:$16 sps:$4 sm:$0xff]  }
  0x30   : > { %971 = vmatprep.subr.bf16.mxu0 %v1625_v1 }
  0x31   : > { %1477 = vmatpush2.bf16.msra.mxu1 %v1774_v29 }
  0x32   : > { %1464 = vmatprep.subr.bf16.mxu1 %v1625_v1 }
  0x33   : > { %972 = vmatpush1.bf16.msra.mxu0 %v1669_v5  ;;  %v1578_v5 = vld [vmem:[%s1740_s28 + $0x12c] ss:$16 sps:$4 sm:$0xff]  }
  0x34   : > { %973 = vmatprep.subr.bf16.mxu0 %v1625_v1 }
  0x35   : > { %849 = vmatmul.mubr.bf16.gmra.mxu0 %v1522_v31  ;;  %1478 = vmatpush2.bf16.msra.mxu1 %v1523_v32 }
  0x36   : > { %1465 = vmatprep.subr.bf16.mxu1 %v1625_v1  ;;  %856 = vmatprep.mubr.bf16.mxu0 %v1525_v33 }
  0x37   : > { %974 = vmatpush1.bf16.msra.mxu0 %v1681_v8  ;;  %v1583_v8 = vld [vmem:[%s1740_s28 + $0x160] ss:$16 sps:$4 sm:$0xff]  }
  0x38   : > { %975 = vmatprep.subr.bf16.mxu0 %v1625_v1 }
  0x39   : > { %1479 = vmatpush2.bf16.msra.mxu1 %v1524_v34 }
  0x3a   : > { %1466 = vmatprep.subr.bf16.mxu1 %v1625_v1 }
  0x3b   : > { %976 = vmatpush1.bf16.msra.mxu0 %v1694_v11  ;;  %v1588_v11 = vld [vmem:[%s1740_s28 + $0x148] ss:$16 sps:$4 sm:$0xff]  }
  0x3c   : > { %977 = vmatprep.subr.bf16.mxu0 %v1625_v1 }
  0x3d   : > { %857 = vmatmul.mubr.bf16.gmra.mxu0 %v1527_v35  ;;  %1480 = vmatpush2.bf16.msra.mxu1 %v1528_v36 }
  0x3e   : > { %1467 = vmatprep.subr.bf16.mxu1 %v1625_v1  ;;  %864 = vmatprep.mubr.bf16.mxu0 %v1533_v37 }
  0x3f   : > { %978 = vmatpush1.bf16.msra.mxu0 %v1707_v14  ;;  %v1592_v14 = vld [vmem:[%s1740_s28 + $0x1a4] ss:$16 sps:$4 sm:$0xff]  }
  0x40   : > { %979 = vmatprep.subr.bf16.mxu0 %v1625_v1 }
  0x41   : > { %1481 = vmatpush2.bf16.msra.mxu1 %v1529_v38 }
  0x43   : > { %980 = vmatpush1.bf16.msra.mxu0 %v1722_v17  ;;  %v1596_v17 = vld [vmem:[%s1740_s28 + $0x18c] ss:$16 sps:$4 sm:$0xff]  }
  0x44   : > { %1010 = vmatmul.mubr.bf16.vlgmr.msra.gmra.mxu1 %v1530_v39  ;;  %981 = vmatprep.subr.bf16.mxu0 %v1625_v1 }
  0x45   : > { %865 = vmatmul.mubr.bf16.gmra.mxu0 %v1535_v40  ;;  %1325 = vmatprep.mubr.msk.bf16.mxu1 %vm759_vm0, %v1536_v41 }
  0x46   : > { %872 = vmatprep.mubr.bf16.mxu0 %v1538_v42 }
  0x47   : > { %982 = vmatpush1.bf16.msra.mxu0 %v1735_v20  ;;  %v1601_v20 = vld [vmem:[%s1740_s28 + $0x1c0] ss:$16 sps:$4 sm:$0xff]  }
  0x48   : > { %983 = vmatprep.subr.bf16.mxu0 %v1625_v1 }
  0x4b   : > { %984 = vmatpush1.bf16.msra.mxu0 %v1755_v24  ;;  %v1607_v24 = vld [vmem:[%s1740_s28 + $0x1e0] ss:$16 sps:$4 sm:$0xff]  }
  0x4c   : > { %1018 = vmatmul.mubr.bf16.gmra.mxu1 %v1540_v43  ;;  %989 = vmatprep.subr.bf16.mxu0 %v1625_v1 }
  0x4d   : > { %873 = vmatmul.mubr.bf16.gmra.mxu0 %v1541_v44  ;;  %1326 = vmatprep.mubr.msk.bf16.mxu1 %vm759_vm0, %v1542_v45 }
  0x4e   : > { %880 = vmatprep.mubr.bf16.mxu0 %v1544_v46 }
  0x4f   : > { %990 = vmatpush2.bf16.msra.mxu0 %v1766_v27  ;;  %v1613_v27 = vld [vmem:[%s1740_s28 + $0x1c8] ss:$16 sps:$4 sm:$0xff]  }
  0x50   : > { %991 = vmatprep.subr.bf16.mxu0 %v1625_v1 }
  0x53   : > { %992 = vmatpush2.bf16.msra.mxu0 %v1774_v29  ;;  %v1614_v29 = vld [vmem:[%s1740_s28 + $0x1ec] ss:$16 sps:$4 sm:$0xff]  }
  0x54   : > { %1026 = vmatmul.mubr.bf16.gmra.mxu1 %v1546_v47  ;;  %993 = vmatprep.subr.bf16.mxu0 %v1625_v1 }
  0x55   : > { %881 = vmatmul.mubr.bf16.gmra.mxu0 %v1547_v48  ;;  %1327 = vmatprep.mubr.msk.bf16.mxu1 %vm759_vm0, %v1548_v49 }
  0x56   : > { %888 = vmatprep.mubr.bf16.mxu0 %v1550_v50 }
  0x57   : > { %994 = vmatpush2.bf16.msra.mxu0 %v1523_v32 }
  0x58   : > { %995 = vmatprep.subr.bf16.mxu0 %v1625_v1 }
  0x5b   : > { %996 = vmatpush2.bf16.msra.mxu0 %v1524_v34 }
  0x5c   : > { %1034 = vmatmul.mubr.bf16.gmra.mxu1 %v1552_v51  ;;  %997 = vmatprep.subr.bf16.mxu0 %v1625_v1 }
  0x5d   : > { %889 = vmatmul.mubr.bf16.gmra.mxu0 %v1553_v52  ;;  %1328 = vmatprep.mubr.msk.bf16.mxu1 %vm759_vm0, %v1554_v53 }
  0x5e   : > { %896 = vmatprep.mubr.bf16.mxu0 %v1556_v54 }
  0x5f   : > { %998 = vmatpush2.bf16.msra.mxu0 %v1528_v36 }
  0x60   : > { %999 = vmatprep.subr.bf16.mxu0 %v1625_v1  ;;  %v1572_v1 = vld [vmem:[%s1740_s28 + $0x10c] ss:$16 sps:$4 sm:$0xff]  }
  0x63   : > { %1000 = vmatpush2.bf16.msra.mxu0 %v1529_v38 }
  0x64   : > { %1042 = vmatmul.mubr.bf16.gmra.mxu1 %v1558_v55 }
  0x65   : > { %897 = vmatmul.mubr.bf16.gmra.mxu0 %v1559_v56  ;;  %1329 = vmatprep.mubr.msk.bf16.mxu1 %vm759_vm0, %v1560_v57 }
  0x66   : > { %904 = vmatprep.mubr.bf16.mxu0 %v1562_v58 }
  0x6c   : > { %1050 = vmatmul.mubr.bf16.gmra.mxu1 %v1564_v59 }
  0x6d   : > { %905 = vmatmul.mubr.bf16.gmra.mxu0 %v1565_v60  ;;  %1330 = vmatprep.mubr.msk.bf16.mxu1 %vm759_vm0, %v1566_v61 }
  0x6e   : > { %912 = vmatprep.mubr.bf16.mxu0 %v1568_v62 }
  0x74   : > { %1058 = vmatmul.mubr.bf16.gmra.mxu1 %v1570_v63 }
  0x75   : > { %913 = vmatmul.mubr.bf16.gmra.mxu0 %v1571_v0  ;;  %1331 = vmatprep.mubr.msk.bf16.mxu1 %vm759_vm0, %v1572_v1 }
  0x76   : > { %920 = vmatprep.mubr.bf16.mxu0 %v1574_v2 }
  0x7c   : > { %1066 = vmatmul.mubr.bf16.gmra.mxu1 %v1576_v3 }
  0x7d   : > { %921 = vmatmul.mubr.bf16.gmra.mxu0 %v1577_v4  ;;  %1332 = vmatprep.mubr.msk.bf16.mxu1 %vm759_vm0, %v1578_v5 }
  0x7e   : > { %928 = vmatprep.mubr.bf16.mxu0 %v1580_v6 }
  0x84   : > { %1074 = vmatmul.mubr.bf16.gmra.mxu1 %v1582_v7 }
  0x85   : > { %929 = vmatmul.mubr.bf16.gmra.mxu0 %v1583_v8  ;;  %1333 = vmatprep.mubr.msk.bf16.mxu1 %vm759_vm0, %v1584_v9 }
  0x86   : > { %936 = vmatprep.mubr.bf16.mxu0 %v1586_v10 }
  0x8c   : > { %1082 = vmatmul.mubr.bf16.gmra.mxu1 %v1588_v11 }
  0x8d   : > { %937 = vmatmul.mubr.bf16.gmra.mxu0 %v1589_v12  ;;  %1334 = vmatprep.mubr.msk.bf16.mxu1 %vm759_vm0, %v1590_v13 }
  0x8e   : > { %944 = vmatprep.mubr.bf16.mxu0 %v1592_v14 }
  0x94   : > { %1090 = vmatmul.mubr.bf16.gmra.mxu1 %v1594_v15 }
  0x95   : > { %945 = vmatmul.mubr.bf16.gmra.mxu0 %v1595_v16  ;;  %1335 = vmatprep.mubr.msk.bf16.mxu1 %vm759_vm0, %v1596_v17 }
  0x96   : > { %952 = vmatprep.mubr.bf16.mxu0 %v1598_v18 }
  0x9c   : > { %1098 = vmatmul.mubr.bf16.gmra.mxu1 %v1600_v19 }
  0x9d   : > { %953 = vmatmul.mubr.bf16.gmra.mxu0 %v1601_v20  ;;  %1336 = vmatprep.mubr.msk.bf16.mxu1 %vm759_vm0, %v1602_v21 }
  0x9e   : > { %960 = vmatprep.mubr.bf16.mxu0 %v1604_v22 }
  0xa4   : > { %1106 = vmatmul.mubr.bf16.gmra.mxu1 %v1606_v23 }
  0xa5   : > { %961 = vmatmul.mubr.bf16.gmra.mxu0 %v1607_v24  ;;  %1337 = vmatprep.mubr.msk.bf16.mxu1 %vm759_vm0, %v1608_v25 }
  0xa6   : > { %1323 = vmatprep.mubr.msk.bf16.mxu0 %vm759_vm0, %v1612_v26 }
  0xac   : > { %1114 = vmatmul.mubr.bf16.gmra.mxu1 %v1613_v27 }
  0xad   : > { %1002 = vmatmul.mubr.bf16.vlgmr.msra.gmra.mxu0 %v1610_v28  ;;  %1338 = vmatprep.mubr.msk.bf16.mxu1 %vm759_vm0, %v1614_v29 }
  0xb4   : > { %1122 = vmatmul.mubr.bf16.gmra.mxu1 %v1616_v30 }
  0xed   : > { %v1358_v31 = vpop.f32.mrf.mxu0 }
  0xef   : > { %v1359_v32 = vpop.f32.mrf.mxu0 }
  0xf0   : > { %v1895_v33 = vadd.f32 %v1359_v32, %v1358_v31 }
  0xf1   : > { %v1361_v34 = vpop.f32.mrf.mxu0 }
  0xf3   : > { %v1362_v35 = vpop.f32.mrf.mxu0 }
  0xf4   : > { %v1897_v36 = vadd.f32 %v1362_v35, %v1361_v34 }
  0xf5   : > { %v1364_v37 = vpop.f32.mrf.mxu0 }
  0xf7   : > { %v1365_v38 = vpop.f32.mrf.mxu0 }
  0xf8   : > { %v1366_v44 = vadd.f32 %v1365_v38, %v1364_v37 }
  0xf9   : > { %v1367_v39 = vpop.f32.mrf.mxu0 }
  0xfb   : > { %v1368_v40 = vpop.f32.mrf.mxu0 }
  0xfc   : > { %v1369_v50 = vadd.f32 %v1368_v40, %v1367_v39 }
  0xfd   : > { %v1370_v41 = vpop.f32.mrf.mxu0 }
  0xff   : > { %v1371_v42 = vpop.f32.mrf.mxu0 }
 0x100   : > { %v1372_v56 = vadd.f32 %v1371_v42, %v1370_v41 }
 0x101   : > { %v1373_v43 = vpop.f32.mrf.mxu0 }
 0x103   : > { %v1374_v45 = vpop.f32.mrf.mxu0 }
 0x104   : > { %v1011_v46 = vpop.f32.mrf.mxu1  ;;  %v1375_v62 = vadd.f32 %v1374_v45, %v1373_v43 }
 0x105   : > { %v1012_v47 = vadd.f32 %v1366_v44, %v1011_v46  ;;  %v1376_v48 = vpop.f32.mrf.mxu0 }
 0x106   : > { %v1013_v49 = vpop.f32.mrf.mxu1 }
 0x107   : > { %1133 = vst.msk [vmem:[%s1903_s26 + $0x10] sm:$0xff] %vm1130_vm1, %v1012_v47  ;;  %v1377_v51 = vpop.f32.mrf.mxu0 }
 0x108   : > { %v1014_v52 = vpop.f32.mrf.mxu1  ;;  %v1378_v4 = vadd.f32 %v1377_v51, %v1376_v48 }
 0x109   : > { %v1015_v53 = vadd.f32 %v1369_v50, %v1014_v52  ;;  %v1379_v54 = vpop.f32.mrf.mxu0 }
 0x10a   : > { %v1016_v55 = vpop.f32.mrf.mxu1 }
 0x10b   : > { %1134 = vst.msk [vmem:[%s1903_s26 + $0x18] sm:$0xff] %vm1130_vm1, %v1015_v53  ;;  %v1380_v57 = vpop.f32.mrf.mxu0 }
 0x10c   : > { %v1019_v58 = vpop.f32.mrf.mxu1  ;;  %v1381_v10 = vadd.f32 %v1380_v57, %v1379_v54 }
 0x10d   : > { %v1020_v59 = vadd.f32 %v1372_v56, %v1019_v58  ;;  %v1382_v60 = vpop.f32.mrf.mxu0 }
 0x10e   : > { %v1021_v61 = vpop.f32.mrf.mxu1 }
 0x10f   : > { %1135 = vst.msk [vmem:[%s1903_s26 + $0x20] sm:$0xff] %vm1130_vm1, %v1020_v59  ;;  %v1383_v63 = vpop.f32.mrf.mxu0 }
 0x110   : > { %v1022_v0 = vpop.f32.mrf.mxu1  ;;  %v1384_v16 = vadd.f32 %v1383_v63, %v1382_v60 }
 0x111   : > { %v1023_v1 = vadd.f32 %v1375_v62, %v1022_v0  ;;  %v1385_v2 = vpop.f32.mrf.mxu0 }
 0x112   : > { %v1024_v3 = vpop.f32.mrf.mxu1 }
 0x113   : > { %1136 = vst.msk [vmem:[%s1903_s26 + $0x28] sm:$0xff] %vm1130_vm1, %v1023_v1  ;;  %v1386_v5 = vpop.f32.mrf.mxu0 }
 0x114   : > { %v1027_v6 = vpop.f32.mrf.mxu1  ;;  %v1387_v22 = vadd.f32 %v1386_v5, %v1385_v2 }
 0x115   : > { %v1028_v7 = vadd.f32 %v1378_v4, %v1027_v6  ;;  %v1388_v8 = vpop.f32.mrf.mxu0 }
 0x116   : > { %v1029_v9 = vpop.f32.mrf.mxu1 }
 0x117   : > { %1137 = vst.msk [vmem:[%s1903_s26 + $0x30] sm:$0xff] %vm1130_vm1, %v1028_v7  ;;  %v1389_v11 = vpop.f32.mrf.mxu0 }
 0x118   : > { %v1030_v12 = vpop.f32.mrf.mxu1  ;;  %v1390_v28 = vadd.f32 %v1389_v11, %v1388_v8 }
 0x119   : > { %v1031_v13 = vadd.f32 %v1381_v10, %v1030_v12  ;;  %v1391_v14 = vpop.f32.mrf.mxu0 }
 0x11a   : > { %v1032_v15 = vpop.f32.mrf.mxu1 }
 0x11b   : > { %1138 = vst.msk [vmem:[%s1903_s26 + $0x38] sm:$0xff] %vm1130_vm1, %v1031_v13  ;;  %v1392_v17 = vpop.f32.mrf.mxu0 }
 0x11c   : > { %v1035_v18 = vpop.f32.mrf.mxu1  ;;  %v1393_v35 = vadd.f32 %v1392_v17, %v1391_v14 }
 0x11d   : > { %v1036_v19 = vadd.f32 %v1384_v16, %v1035_v18  ;;  %v1394_v20 = vpop.f32.mrf.mxu0 }
 0x11e   : > { %v1037_v21 = vpop.f32.mrf.mxu1 }
 0x11f   : > { %1139 = vst.msk [vmem:[%s1903_s26 + $0x40] sm:$0xff] %vm1130_vm1, %v1036_v19  ;;  %v1395_v23 = vpop.f32.mrf.mxu0 }
 0x120   : > { %v1038_v24 = vpop.f32.mrf.mxu1  ;;  %v1396_v42 = vadd.f32 %v1395_v23, %v1394_v20 }
 0x121   : > { %v1039_v25 = vadd.f32 %v1387_v22, %v1038_v24  ;;  %v1397_v26 = vpop.f32.mrf.mxu0 }
 0x122   : > { %v1040_v27 = vpop.f32.mrf.mxu1 }
 0x123   : > { %1140 = vst.msk [vmem:[%s1903_s26 + $0x48] sm:$0xff] %vm1130_vm1, %v1039_v25  ;;  %v1398_v29 = vpop.f32.mrf.mxu0 }
 0x124   : > { %v1043_v30 = vpop.f32.mrf.mxu1  ;;  %v1399_v48 = vadd.f32 %v1398_v29, %v1397_v26 }
 0x125   : > { %v1044_v31 = vadd.f32 %v1390_v28, %v1043_v30  ;;  %v1400_v32 = vpop.f32.mrf.mxu0 }
 0x126   : > { %v1045_v34 = vpop.f32.mrf.mxu1 }
 0x127   : > { %1141 = vst.msk [vmem:[%s1903_s26 + $0x50] sm:$0xff] %vm1130_vm1, %v1044_v31  ;;  %v1401_v37 = vpop.f32.mrf.mxu0 }
 0x128   : > { %v1046_v38 = vpop.f32.mrf.mxu1  ;;  %v1402_v54 = vadd.f32 %v1401_v37, %v1400_v32 }
 0x129   : > { %v1047_v39 = vadd.f32 %v1393_v35, %v1046_v38  ;;  %v1403_v40 = vpop.f32.mrf.mxu0 }
 0x12a   : > { %v1048_v41 = vpop.f32.mrf.mxu1 }
 0x12b   : > { %1142 = vst.msk [vmem:[%s1903_s26 + $0x58] sm:$0xff] %vm1130_vm1, %v1047_v39  ;;  %v1404_v43 = vpop.f32.mrf.mxu0 }
 0x12c   : > { %v1051_v44 = vpop.f32.mrf.mxu1  ;;  %v1405_v60 = vadd.f32 %v1404_v43, %v1403_v40 }
 0x12d   : > { %v1052_v45 = vadd.f32 %v1396_v42, %v1051_v44  ;;  %v1406_v46 = vpop.f32.mrf.mxu0 }
 0x12e   : > { %v1053_v47 = vpop.f32.mrf.mxu1 }
 0x12f   : > { %1143 = vst.msk [vmem:[%s1903_s26 + $0x60] sm:$0xff] %vm1130_vm1, %v1052_v45  ;;  %v1407_v49 = vpop.f32.mrf.mxu0 }
 0x130   : > { %v1054_v50 = vpop.f32.mrf.mxu1  ;;  %v1408_v2 = vadd.f32 %v1407_v49, %v1406_v46 }
 0x131   : > { %v1055_v51 = vadd.f32 %v1399_v48, %v1054_v50  ;;  %v1409_v52 = vpop.f32.mrf.mxu0 }
 0x132   : > { %v1056_v53 = vpop.f32.mrf.mxu1 }
 0x133   : > { %1144 = vst.msk [vmem:[%s1903_s26 + $0x68] sm:$0xff] %vm1130_vm1, %v1055_v51  ;;  %v1410_v55 = vpop.f32.mrf.mxu0 }
 0x134   : > { %v1059_v56 = vpop.f32.mrf.mxu1  ;;  %v1411_v8 = vadd.f32 %v1410_v55, %v1409_v52 }
 0x135   : > { %v1060_v57 = vadd.f32 %v1402_v54, %v1059_v56  ;;  %v1412_v58 = vpop.f32.mrf.mxu0 }
 0x136   : > { %v1061_v59 = vpop.f32.mrf.mxu1 }
 0x137   : > { %1145 = vst.msk [vmem:[%s1903_s26 + $0x70] sm:$0xff] %vm1130_vm1, %v1060_v57  ;;  %v1413_v61 = vpop.f32.mrf.mxu0 }
 0x138   : > { %v1062_v62 = vpop.f32.mrf.mxu1  ;;  %v1414_v14 = vadd.f32 %v1413_v61, %v1412_v58 }
 0x139   : > { %v1063_v63 = vadd.f32 %v1405_v60, %v1062_v62  ;;  %v1415_v0 = vpop.f32.mrf.mxu0 }
 0x13a   : > { %v1064_v1 = vpop.f32.mrf.mxu1 }
 0x13b   : > { %1146 = vst.msk [vmem:[%s1903_s26 + $0x78] sm:$0xff] %vm1130_vm1, %v1063_v63  ;;  %v1416_v3 = vpop.f32.mrf.mxu0 }
 0x13c   : > { %v1067_v4 = vpop.f32.mrf.mxu1  ;;  %v1417_v20 = vadd.f32 %v1416_v3, %v1415_v0 }
 0x13d   : > { %v1068_v5 = vadd.f32 %v1408_v2, %v1067_v4  ;;  %v1418_v6 = vpop.f32.mrf.mxu0 }
 0x13e   : > { %v1069_v7 = vpop.f32.mrf.mxu1 }
 0x13f   : > { %1147 = vst.msk [vmem:[%s1903_s26 + $0x80] sm:$0xff] %vm1130_vm1, %v1068_v5  ;;  %v1419_v9 = vpop.f32.mrf.mxu0 }
 0x140   : > { %v1070_v10 = vpop.f32.mrf.mxu1  ;;  %v1420_v26 = vadd.f32 %v1419_v9, %v1418_v6 }
 0x141   : > { %v1071_v11 = vadd.f32 %v1411_v8, %v1070_v10  ;;  %v1421_v12 = vpop.f32.mrf.mxu0 }
 0x142   : > { %v1072_v13 = vpop.f32.mrf.mxu1 }
 0x143   : > { %1148 = vst.msk [vmem:[%s1903_s26 + $0x88] sm:$0xff] %vm1130_vm1, %v1071_v11  ;;  %v1422_v15 = vpop.f32.mrf.mxu0 }
 0x144   : > { %v1075_v16 = vpop.f32.mrf.mxu1  ;;  %v1423_v32 = vadd.f32 %v1422_v15, %v1421_v12 }
 0x145   : > { %v1076_v17 = vadd.f32 %v1414_v14, %v1075_v16  ;;  %v1424_v18 = vpop.f32.mrf.mxu0 }
 0x146   : > { %v1077_v19 = vpop.f32.mrf.mxu1 }
 0x147   : > { %1149 = vst.msk [vmem:[%s1903_s26 + $0x90] sm:$0xff] %vm1130_vm1, %v1076_v17  ;;  %v1425_v21 = vpop.f32.mrf.mxu0 }
 0x148   : > { %v1078_v22 = vpop.f32.mrf.mxu1  ;;  %v1426_v40 = vadd.f32 %v1425_v21, %v1424_v18 }
 0x149   : > { %v1079_v23 = vadd.f32 %v1417_v20, %v1078_v22  ;;  %v1427_v24 = vpop.f32.mrf.mxu0 }
 0x14a   : > { %v1080_v25 = vpop.f32.mrf.mxu1 }
 0x14b   : > { %1150 = vst.msk [vmem:[%s1903_s26 + $0x98] sm:$0xff] %vm1130_vm1, %v1079_v23  ;;  %v1428_v27 = vpop.f32.mrf.mxu0 }
 0x14c   : > { %v1083_v28 = vpop.f32.mrf.mxu1  ;;  %v1429_v46 = vadd.f32 %v1428_v27, %v1427_v24 }
 0x14d   : > { %v1084_v29 = vadd.f32 %v1420_v26, %v1083_v28  ;;  %v1430_v30 = vpop.f32.mrf.mxu0 }
 0x14e   : > { %v1085_v31 = vpop.f32.mrf.mxu1 }
 0x14f   : > { %1151 = vst.msk [vmem:[%s1903_s26 + $0xa0] sm:$0xff] %vm1130_vm1, %v1084_v29  ;;  %v1431_v34 = vpop.f32.mrf.mxu0 }
 0x150   : > { %v1086_v35 = vpop.f32.mrf.mxu1  ;;  %v1432_v52 = vadd.f32 %v1431_v34, %v1430_v30 }
 0x151   : > { %v1087_v37 = vadd.f32 %v1423_v32, %v1086_v35  ;;  %v1433_v38 = vpop.f32.mrf.mxu0 }
 0x152   : > { %v1088_v39 = vpop.f32.mrf.mxu1 }
 0x153   : > { %1152 = vst.msk [vmem:[%s1903_s26 + $0xa8] sm:$0xff] %vm1130_vm1, %v1087_v37  ;;  %v1434_v41 = vpop.f32.mrf.mxu0 }
 0x154   : > { %v1091_v42 = vpop.f32.mrf.mxu1  ;;  %v1435_v58 = vadd.f32 %v1434_v41, %v1433_v38 }
 0x155   : > { %v1092_v43 = vadd.f32 %v1426_v40, %v1091_v42  ;;  %v1436_v44 = vpop.f32.mrf.mxu0 }
 0x156   : > { %v1093_v45 = vpop.f32.mrf.mxu1 }
 0x157   : > { %1153 = vst.msk [vmem:[%s1903_s26 + $0xb0] sm:$0xff] %vm1130_vm1, %v1092_v43  ;;  %v1437_v47 = vpop.f32.mrf.mxu0 }
 0x158   : > { %v1094_v48 = vpop.f32.mrf.mxu1  ;;  %v1438_v0 = vadd.f32 %v1437_v47, %v1436_v44 }
 0x159   : > { %v1095_v49 = vadd.f32 %v1429_v46, %v1094_v48  ;;  %v1439_v50 = vpop.f32.mrf.mxu0 }
 0x15a   : > { %v1096_v51 = vpop.f32.mrf.mxu1 }
 0x15b   : > { %1154 = vst.msk [vmem:[%s1903_s26 + $0xb8] sm:$0xff] %vm1130_vm1, %v1095_v49  ;;  %v1440_v53 = vpop.f32.mrf.mxu0 }
 0x15c   : > { %v1099_v54 = vpop.f32.mrf.mxu1  ;;  %v1441_v6 = vadd.f32 %v1440_v53, %v1439_v50 }
 0x15d   : > { %v1100_v55 = vadd.f32 %v1432_v52, %v1099_v54  ;;  %v1442_v56 = vpop.f32.mrf.mxu0 }
 0x15e   : > { %v1101_v57 = vpop.f32.mrf.mxu1 }
 0x15f   : > { %1155 = vst.msk [vmem:[%s1903_s26 + $0xc0] sm:$0xff] %vm1130_vm1, %v1100_v55  ;;  %v1443_v59 = vpop.f32.mrf.mxu0 }
 0x160   : > { %v1102_v60 = vpop.f32.mrf.mxu1  ;;  %v1444_v12 = vadd.f32 %v1443_v59, %v1442_v56 }
 0x161   : > { %v1103_v61 = vadd.f32 %v1435_v58, %v1102_v60  ;;  %v1445_v62 = vpop.f32.mrf.mxu0 }
 0x162   : > { %v1104_v63 = vpop.f32.mrf.mxu1 }
 0x163   : > { %1156 = vst.msk [vmem:[%s1903_s26 + $0xc8] sm:$0xff] %vm1130_vm1, %v1103_v61  ;;  %v1446_v1 = vpop.f32.mrf.mxu0 }
 0x164   : > { %v1107_v2 = vpop.f32.mrf.mxu1  ;;  %v1447_v19 = vadd.f32 %v1446_v1, %v1445_v62 }
 0x165   : > { %v1108_v3 = vadd.f32 %v1438_v0, %v1107_v2  ;;  %v1448_v4 = vpop.f32.mrf.mxu0 }
 0x166   : > { %v1109_v5 = vpop.f32.mrf.mxu1 }
 0x167   : > { %1157 = vst.msk [vmem:[%s1903_s26 + $0xd0] sm:$0xff] %vm1130_vm1, %v1108_v3  ;;  %v1449_v7 = vpop.f32.mrf.mxu0 }
 0x168   : > { %v1110_v8 = vpop.f32.mrf.mxu1  ;;  %v1450_v26 = vadd.f32 %v1449_v7, %v1448_v4 }
 0x169   : > { %v1111_v9 = vadd.f32 %v1441_v6, %v1110_v8  ;;  %v1451_v10 = vpop.f32.mrf.mxu0 }
 0x16a   : > { %v1112_v11 = vpop.f32.mrf.mxu1 }
 0x16b   : > { %1158 = vst.msk [vmem:[%s1903_s26 + $0xd8] sm:$0xff] %vm1130_vm1, %v1111_v9  ;;  %v1452_v13 = vpop.f32.mrf.mxu0 }
 0x16c   : > { %v1115_v14 = vpop.f32.mrf.mxu1  ;;  %v1453_v30 = vadd.f32 %v1452_v13, %v1451_v10 }
 0x16d   : > { %v1116_v15 = vadd.f32 %v1444_v12, %v1115_v14  ;;  %v1003_v16 = vpop.f32.mrf.mxu0 }
 0x16e   : > { %v1004_v17 = vadd.f32 %v1895_v33, %v1003_v16  ;;  %v1117_v18 = vpop.f32.mrf.mxu1 }
 0x16f   : > { %1159 = vst.msk [vmem:[%s1903_s26 + $0xe0] sm:$0xff] %vm1130_vm1, %v1116_v15  ;;  %v1005_v20 = vpop.f32.mrf.mxu0 }
 0x170   : > { %1131 = vst.msk [vmem:[%s1903_s26] sm:$0xff] %vm1130_vm1, %v1004_v17  ;;  %v1118_v21 = vpop.f32.mrf.mxu1 }
 0x171   : > { %v1119_v22 = vadd.f32 %v1447_v19, %v1118_v21  ;;  %v1006_v23 = vpop.f32.mrf.mxu0 }
 0x172   : > { %v1007_v24 = vadd.f32 %v1897_v36, %v1006_v23  ;;  %v1120_v25 = vpop.f32.mrf.mxu1 }
 0x173   : > { %1160 = vst.msk [vmem:[%s1903_s26 + $0xe8] sm:$0xff] %vm1130_vm1, %v1119_v22  ;;  %v1008_v27 = vpop.f32.mrf.mxu0 }
 0x174   : > { %1132 = vst.msk [vmem:[%s1903_s26 + $0x8] sm:$0xff] %vm1130_vm1, %v1007_v24  ;;  %v1123_v33 = vpop.f32.mrf.mxu1 }
 0x175   : > { %v1124_v28 = vadd.f32 %v1450_v26, %v1123_v33 }
 0x176   : > { %v1125_v29 = vpop.f32.mrf.mxu1 }
 0x177   : > { %1161 = vst.msk [vmem:[%s1903_s26 + $0xf0] sm:$0xff] %vm1130_vm1, %v1124_v28 }
 0x178   : > { %v1126_v31 = vpop.f32.mrf.mxu1 }
 0x179   : > { %v1127_v32 = vadd.f32 %v1453_v30, %v1126_v31 }
 0x17a   : > { %v1128_v34 = vpop.f32.mrf.mxu1 }
 0x17b   : > { %1162 = vst.msk [vmem:[%s1903_s26 + $0xf8] sm:$0xff] %vm1130_vm1, %v1127_v32 }
 0x17c PF: > { %s12_s9 = sadd.s32 1, %s1623_s9  }
 0x17d   : > { %p9_p4 = scmp.ge.s32.totalorder %s12_s9, 4  }
 0x17f   :  { %11 = sbr.rel (!%p9_p4) target bundleno = 1 (0x1), region = 58 }

</bundles_post_ra>
